<compile_context>
chip_gen: v6e
topology: v6e:2x2x1
jax: 0.10.0
libtpu: 0.0.40
codegen_flags: <defaults>
</compile_context>

<pallas_src>
import numpy as np
import jax
import jax.numpy as jnp
from jax import lax
from jax.experimental import pallas as pl
from jax.experimental.pallas import tpu as pltpu


LEAD = 8  # zero rows in front of the row space (>= max dilation, multiple of 8)


def _round_up(x, m):
    return (x + m - 1) // m * m


# ----------------------------------------------------------------------------
# Fused forward: one pallas_call for the whole network
# ----------------------------------------------------------------------------
@jax.jit
def text_classifier_forward(x_ncl, kp):
    """x_ncl: (B, input_size, max_length) float32 -> (B, num_classes) float32."""
    B, cin, L = x_ncl.shape
    num_classes = kp["fc2_b"].shape[1]
    c_out = [kp[f"conv{i}_b"].shape[1] for i in range(1, 5)]       # 256,128,64,32
    l_in = [L, L // 2, (L // 2) // 2, ((L // 2) // 2) // 2]        # conv input lengths
    dil = [1, 2, 4, 8]                                             # row-space dilations
    n_pos = l_in[3]                                                # positions into the FC head
    S = _round_up(L + 2, 8)                                        # rows per sample
    R = LEAD + B * S                                               # total row-space rows
    a4 = dil[3]
    LG = R - 2 * a4 - a4 * (n_pos - 1)                             # FC row-space length

    # ---- row-space input: channels-last, one S-row slab per sample ----------
    xt = jnp.transpose(x_ncl, (0, 2, 1))                           # (B, L, Cin)
    xt = jnp.pad(xt, ((0, 0), (0, S - L), (0, 0)))                 # zero tail -> (B, S, Cin)
    x1 = jnp.pad(xt.reshape(B * S, cin), ((LEAD, 0), (0, 0)))      # (R, Cin)

    # ---- 0/1 "valid pooled row" masks per deeper layer (trace-time constants)
    def valid_rows_mask(a_next, len_next):
        m = np.zeros((R, 1), np.float32)
        for b in range(B):
            base = LEAD + b * S
            m[base + a_next * np.arange(len_next), 0] = 1.0
        return jnp.asarray(m)

    masks = [valid_rows_mask(dil[i + 1], l_in[i + 1]) for i in range(3)]

    def kernel(x1_ref,
               w1_ref, b1_ref, w2_ref, b2_ref, w3_ref, b3_ref, w4_ref, b4_ref,
               f1w_ref, f1b_ref, f2w_ref, f2b_ref,
               m2_ref, m3_ref, m4_ref,
               o_ref,
               x2_ref, x3_ref, x4_ref):
        # Scratch zero-init: the never-written rows ARE the conv "same" padding.
        x2_ref[...] = jnp.zeros_like(x2_ref)
        x3_ref[...] = jnp.zeros_like(x3_ref)
        x4_ref[...] = jnp.zeros_like(x4_ref)

        def conv_relu(x_ref, w_ref, b_ref, a):
            # k=3 conv with dilation `a` over the whole row space (batch folded
            # into M): bf16 MXU inputs, f32 accumulation, bias+ReLU on the VPU.
            # Result row k corresponds to row-space row (k + a).
            n = R - 2 * a
            y = jnp.dot(x_ref[0:n, :].astype(jnp.bfloat16), w_ref[0],
                        preferred_element_type=jnp.float32)
            y = y + jnp.dot(x_ref[a:a + n, :].astype(jnp.bfloat16), w_ref[1],
                            preferred_element_type=jnp.float32)
            y = y + jnp.dot(x_ref[2 * a:2 * a + n, :].astype(jnp.bfloat16), w_ref[2],
                            preferred_element_type=jnp.float32)
            return jnp.maximum(y + b_ref[...], 0.0)

        def pool_store(y, a, mask_ref, dst_ref):
            # MaxPool1d(2, 2): VPU pair-max at stride `a`, zero every row that
            # is not a valid pooled position (recreates the zero padding for
            # the next, dilated conv), store aligned with the row space.
            n = R - 3 * a
            p = jnp.maximum(y[0:n, :], y[a:a + n, :])
            dst_ref[a:a + n, :] = p * mask_ref[a:a + n, :]

        y1 = conv_relu(x1_ref, w1_ref, b1_ref, dil[0])
        pool_store(y1, dil[0], m2_ref, x2_ref)
        y2 = conv_relu(x2_ref, w2_ref, b2_ref, dil[1])
        pool_store(y2, dil[1], m3_ref, x3_ref)
        y3 = conv_relu(x3_ref, w3_ref, b3_ref, dil[2])
        pool_store(y3, dil[2], m4_ref, x4_ref)
        y4 = conv_relu(x4_ref, w4_ref, b4_ref, dil[3]).astype(jnp.bfloat16)

        # FC head.  torch Flatten's (C, L) order is baked into f1w's layout,
        # so fc1 is a sum of per-position matmuls over the row space.
        g = jnp.dot(y4[0:LG, :], f1w_ref[0], preferred_element_type=jnp.float32)
        for l in range(1, n_pos):
            g = g + jnp.dot(y4[a4 * l:a4 * l + LG, :], f1w_ref[l],
                            preferred_element_type=jnp.float32)
        h = jnp.maximum(g + f1b_ref[...], 0.0).astype(jnp.bfloat16)
        logits = (jnp.dot(h, f2w_ref[...], preferred_element_type=jnp.float32)
                  + f2b_ref[...])
        # Sample b's logits live at row (LEAD - a4 + b*S) of the row-space result.
        for b in range(B):
            r = LEAD - a4 + b * S
            o_ref[b:b + 1, :] = logits[r:r + 1, :]

    return pl.pallas_call(
        kernel,
        out_shape=jax.ShapeDtypeStruct((B, num_classes), jnp.float32),
        scratch_shapes=[
            pltpu.VMEM((R, c_out[0]), jnp.float32),   # padded input of conv2
            pltpu.VMEM((R, c_out[1]), jnp.float32),   # padded input of conv3
            pltpu.VMEM((R, c_out[2]), jnp.float32),   # padded input of conv4
        ],
    )(x1,
      kp["conv1_w"], kp["conv1_b"], kp["conv2_w"], kp["conv2_b"],
      kp["conv3_w"], kp["conv3_b"], kp["conv4_w"], kp["conv4_b"],
      kp["fc1_w"], kp["fc1_b"], kp["fc2_w"], kp["fc2_b"],
      masks[0], masks[1], masks[2])


# ----------------------------------------------------------------------------
# Parameters (deterministic, synthetic) and layout conversion
# ----------------------------------------------------------------------------
def init_params(key, input_size, max_length, num_classes):
    """Torch-layout parameters: conv (Cout, Cin, 3), linear (out, in)."""
    if max_length == 100:
        fc_in, fc_hidden = 384, 128
    elif max_length == 50:
        fc_in, fc_hidden = 192, 64
    else:
        raise ValueError("max_length must be 50 or 100 for the default fc head")
    conv_dims = [(input_size, 256), (256, 128), (128, 64), (64, 32)]
    keys = jax.random.split(key, 2 * len(conv_dims) + 4)
    params = {}
    k = 0
    for i, (cin, cout) in enumerate(conv_dims):
        params[f"conv{i + 1}_w"] = 0.05 * jax.random.normal(keys[k], (cout, cin, 3), jnp.float32)
        params[f"conv{i + 1}_b"] = 0.01 * jax.random.normal(keys[k + 1], (cout,), jnp.float32)
        k += 2
    params["fc1_w"] = 0.05 * jax.random.normal(keys[k], (fc_hidden, fc_in), jnp.float32)
    params["fc1_b"] = 0.01 * jax.random.normal(keys[k + 1], (fc_hidden,), jnp.float32)
    params["fc2_w"] = 0.05 * jax.random.normal(keys[k + 2], (num_classes, fc_hidden), jnp.float32)
    params["fc2_b"] = 0.01 * jax.random.normal(keys[k + 3], (num_classes,), jnp.float32)
    return params


def to_kernel_layout(params, max_length):
    """Torch-layout params -> kernel layouts (bf16 MXU weights, f32 biases)."""
    n_pos = ((max_length // 2) // 2) // 2
    kp = {}
    for i in range(1, 5):
        # (Cout, Cin, K) -> (K, Cin, Cout), bf16 for the MXU
        kp[f"conv{i}_w"] = jnp.transpose(params[f"conv{i}_w"], (2, 1, 0)).astype(jnp.bfloat16)
        kp[f"conv{i}_b"] = params[f"conv{i}_b"][None, :].astype(jnp.float32)
    c4 = params["conv4_w"].shape[0]
    hidden = params["fc1_w"].shape[0]
    # torch Flatten order is (C, L): feature j = c * n_pos + l.  Re-arrange fc1
    # so the kernel consumes per-position (channels-last) slices directly.
    w1 = params["fc1_w"].reshape(hidden, c4, n_pos)                   # [o, c, l]
    kp["fc1_w"] = jnp.transpose(w1, (2, 1, 0)).astype(jnp.bfloat16)   # (n_pos, C4, hidden)
    kp["fc1_b"] = params["fc1_b"][None, :].astype(jnp.float32)
    kp["fc2_w"] = params["fc2_w"].T.astype(jnp.bfloat16)              # (hidden, classes)
    kp["fc2_b"] = params["fc2_b"][None, :].astype(jnp.float32)
    return kp


# ----------------------------------------------------------------------------
# Pure-JAX f32 reference (mirrors the PyTorch module semantics)
# ----------------------------------------------------------------------------
def reference_forward(x_ncl, params):
    x = x_ncl
    for i in range(1, 5):
        w = params[f"conv{i}_w"]
        b = params[f"conv{i}_b"]
        x = lax.conv_general_dilated(
            x, w, window_strides=(1,), padding=((1, 1),),
            dimension_numbers=("NCH", "OIH", "NCH"),
            precision=lax.Precision.HIGHEST)
        x = jnp.maximum(x + b[None, :, None], 0.0)
        if i < 4:
            Lc = x.shape[2]
            Lp = Lc // 2
            x = x[:, :, :2 * Lp].reshape(x.shape[0], x.shape[1], Lp, 2).max(axis=-1)
    Bn = x.shape[0]
    x = x.reshape(Bn, -1)
    h = jnp.maximum(
        jnp.dot(x, params["fc1_w"].T, precision=lax.Precision.HIGHEST) + params["fc1_b"], 0.0)
    return jnp.dot(h, params["fc2_w"].T, precision=lax.Precision.HIGHEST) + params["fc2_b"]


# TODO(synk): predict_classes() uses a pickled label decoder; label decoding is
# host-side string lookup and has no Pallas equivalent (logits only here).

if __name__ == "__main__":
    # Small, module-consistent shapes: max_length=50 path -> fc = 192->64->C.
    batch = 2
    input_size = 16
    max_length = 50
    num_classes = 4

    key = jax.random.PRNGKey(0)
    k_params, k_x = jax.random.split(key)
    params = init_params(k_params, input_size, max_length, num_classes)
    kparams = to_kernel_layout(params, max_length)

    x = jax.random.normal(k_x, (batch, input_size, max_length), jnp.float32)

    out = jax.block_until_ready(text_classifier_forward(x, kparams))
    ref = reference_forward(x, params)

    assert out.shape == (batch, num_classes)
    # bf16 MXU inputs + bf16-rounded intermediates vs. an f32 (HIGHEST) reference:
    # expected max |diff| is O(1e-3); 2e-2 leaves a comfortable margin.
    max_diff = float(jnp.max(jnp.abs(out - ref)))
    assert jnp.allclose(out, ref, atol=2e-2, rtol=2e-2), (
        f"mismatch: max abs diff {max_diff}")

    print("KERNEL_OK")
</pallas_src>

<mosaic_0001>
module attributes {stable_mosaic.version = 11 : i64} {
  func.func @kernel(%arg0: memref<120x16xf32, #tpu.memory_space<vmem>>, %arg1: memref<3x16x256xbf16, #tpu.memory_space<vmem>>, %arg2: memref<1x256xf32, #tpu.memory_space<vmem>>, %arg3: memref<3x256x128xbf16, #tpu.memory_space<vmem>>, %arg4: memref<1x128xf32, #tpu.memory_space<vmem>>, %arg5: memref<3x128x64xbf16, #tpu.memory_space<vmem>>, %arg6: memref<1x64xf32, #tpu.memory_space<vmem>>, %arg7: memref<3x64x32xbf16, #tpu.memory_space<vmem>>, %arg8: memref<1x32xf32, #tpu.memory_space<vmem>>, %arg9: memref<6x32x64xbf16, #tpu.memory_space<vmem>>, %arg10: memref<1x64xf32, #tpu.memory_space<vmem>>, %arg11: memref<64x4xbf16, #tpu.memory_space<vmem>>, %arg12: memref<1x4xf32, #tpu.memory_space<vmem>>, %arg13: memref<120x1xf32, #tpu.memory_space<vmem>>, %arg14: memref<120x1xf32, #tpu.memory_space<vmem>>, %arg15: memref<120x1xf32, #tpu.memory_space<vmem>>, %arg16: memref<2x4xf32, #tpu.memory_space<vmem>>, %arg17: memref<120x256xf32, #tpu.memory_space<vmem>>, %arg18: memref<120x128xf32, #tpu.memory_space<vmem>>, %arg19: memref<120x64xf32, #tpu.memory_space<vmem>>) attributes {dimension_semantics = [], scalar_prefetch = 0 : i64, scratch_operands = 3 : i64, tpu.core_type = #tpu.core_type<tc>} {
    %cst = arith.constant 0.000000e+00 : f32
    %0 = vector.broadcast %cst : f32 to vector<120x256xf32>
    %c0 = arith.constant 0 : index
    %c0_0 = arith.constant 0 : index
    %1 = vector.load %arg17[%c0, %c0_0] : memref<120x256xf32, #tpu.memory_space<vmem>>, vector<120x256xf32>
    tpu.vector_store %arg17[%c0, %c0_0], %0 {strides = array<i32>} : memref<120x256xf32, #tpu.memory_space<vmem>>, vector<120x256xf32>,
    %cst_1 = arith.constant 0.000000e+00 : f32
    %2 = vector.broadcast %cst_1 : f32 to vector<120x128xf32>
    %c0_2 = arith.constant 0 : index
    %c0_3 = arith.constant 0 : index
    %3 = vector.load %arg18[%c0_2, %c0_3] : memref<120x128xf32, #tpu.memory_space<vmem>>, vector<120x128xf32>
    tpu.vector_store %arg18[%c0_2, %c0_3], %2 {strides = array<i32>} : memref<120x128xf32, #tpu.memory_space<vmem>>, vector<120x128xf32>,
    %cst_4 = arith.constant 0.000000e+00 : f32
    %4 = vector.broadcast %cst_4 : f32 to vector<120x64xf32>
    %c0_5 = arith.constant 0 : index
    %c0_6 = arith.constant 0 : index
    %5 = vector.load %arg19[%c0_5, %c0_6] : memref<120x64xf32, #tpu.memory_space<vmem>>, vector<120x64xf32>
    tpu.vector_store %arg19[%c0_5, %c0_6], %4 {strides = array<i32>} : memref<120x64xf32, #tpu.memory_space<vmem>>, vector<120x64xf32>,
    %c0_7 = arith.constant 0 : index
    %c0_8 = arith.constant 0 : index
    %6 = vector.load %arg0[%c0_7, %c0_8] : memref<120x16xf32, #tpu.memory_space<vmem>>, vector<118x16xf32>
    %7 = arith.truncf %6 : vector<118x16xf32> to vector<118x16xbf16>
    %c0_9 = arith.constant 0 : index
    %c0_10 = arith.constant 0 : index
    %c0_11 = arith.constant 0 : index
    %8 = vector.load %arg1[%c0_9, %c0_10, %c0_11] : memref<3x16x256xbf16, #tpu.memory_space<vmem>>, vector<1x16x256xbf16>
    %9 = vector.shape_cast %8 : vector<1x16x256xbf16> to vector<16x256xbf16>
    %cst_12 = arith.constant dense<0.000000e+00> : vector<118x256xf32>
    %10 = tpu.matmul %7, %9, %cst_12 {dimension_numbers = #tpu.dot_dimension_numbers<[1], [0], [0], [1], [0, 0, 1, 1], [], []>} : vector<118x16xbf16>, vector<16x256xbf16>, vector<118x256xf32> -> vector<118x256xf32>
    %c1 = arith.constant 1 : index
    %c0_13 = arith.constant 0 : index
    %11 = vector.load %arg0[%c1, %c0_13] : memref<120x16xf32, #tpu.memory_space<vmem>>, vector<118x16xf32>
    %12 = arith.truncf %11 : vector<118x16xf32> to vector<118x16xbf16>
    %c1_14 = arith.constant 1 : index
    %c0_15 = arith.constant 0 : index
    %c0_16 = arith.constant 0 : index
    %13 = vector.load %arg1[%c1_14, %c0_15, %c0_16] : memref<3x16x256xbf16, #tpu.memory_space<vmem>>, vector<1x16x256xbf16>
    %14 = vector.shape_cast %13 : vector<1x16x256xbf16> to vector<16x256xbf16>
    %cst_17 = arith.constant dense<0.000000e+00> : vector<118x256xf32>
    %15 = tpu.matmul %12, %14, %cst_17 {dimension_numbers = #tpu.dot_dimension_numbers<[1], [0], [0], [1], [0, 0, 1, 1], [], []>} : vector<118x16xbf16>, vector<16x256xbf16>, vector<118x256xf32> -> vector<118x256xf32>
    %16 = arith.addf %10, %15 : vector<118x256xf32>
    %c2 = arith.constant 2 : index
    %c0_18 = arith.constant 0 : index
    %17 = vector.load %arg0[%c2, %c0_18] : memref<120x16xf32, #tpu.memory_space<vmem>>, vector<118x16xf32>
    %18 = arith.truncf %17 : vector<118x16xf32> to vector<118x16xbf16>
    %c2_19 = arith.constant 2 : index
    %c0_20 = arith.constant 0 : index
    %c0_21 = arith.constant 0 : index
    %19 = vector.load %arg1[%c2_19, %c0_20, %c0_21] : memref<3x16x256xbf16, #tpu.memory_space<vmem>>, vector<1x16x256xbf16>
    %20 = vector.shape_cast %19 : vector<1x16x256xbf16> to vector<16x256xbf16>
    %cst_22 = arith.constant dense<0.000000e+00> : vector<118x256xf32>
    %21 = tpu.matmul %18, %20, %cst_22 {dimension_numbers = #tpu.dot_dimension_numbers<[1], [0], [0], [1], [0, 0, 1, 1], [], []>} : vector<118x16xbf16>, vector<16x256xbf16>, vector<118x256xf32> -> vector<118x256xf32>
    %22 = arith.addf %16, %21 : vector<118x256xf32>
    %c0_23 = arith.constant 0 : index
    %c0_24 = arith.constant 0 : index
    %23 = vector.load %arg2[%c0_23, %c0_24] : memref<1x256xf32, #tpu.memory_space<vmem>>, vector<1x256xf32>
    %24 = vector.broadcast %23 : vector<1x256xf32> to vector<118x256xf32>
    %25 = arith.addf %22, %24 : vector<118x256xf32>
    %cst_25 = arith.constant 0.000000e+00 : f32
    %26 = vector.broadcast %cst_25 : f32 to vector<118x256xf32>
    %27 = arith.maximumf %25, %26 : vector<118x256xf32>
    %28 = vector.extract_strided_slice %27 {offsets = [0, 0], sizes = [117, 256], strides = [1, 1]} : vector<118x256xf32> to vector<117x256xf32>
    %29 = vector.extract_strided_slice %27 {offsets = [1, 0], sizes = [117, 256], strides = [1, 1]} : vector<118x256xf32> to vector<117x256xf32>
    %30 = arith.maximumf %28, %29 : vector<117x256xf32>
    %c1_26 = arith.constant 1 : index
    %c0_27 = arith.constant 0 : index
    %31 = vector.load %arg13[%c1_26, %c0_27] : memref<120x1xf32, #tpu.memory_space<vmem>>, vector<117x1xf32>
    %32 = vector.broadcast %31 : vector<117x1xf32> to vector<117x256xf32>
    %33 = arith.mulf %30, %32 : vector<117x256xf32>
    %c1_28 = arith.constant 1 : index
    %c0_29 = arith.constant 0 : index
    %34 = vector.load %arg17[%c1_28, %c0_29] : memref<120x256xf32, #tpu.memory_space<vmem>>, vector<117x256xf32>
    tpu.vector_store %arg17[%c1_28, %c0_29], %33 {strides = array<i32>} : memref<120x256xf32, #tpu.memory_space<vmem>>, vector<117x256xf32>,
    %c0_30 = arith.constant 0 : index
    %c0_31 = arith.constant 0 : index
    %35 = vector.load %arg17[%c0_30, %c0_31] : memref<120x256xf32, #tpu.memory_space<vmem>>, vector<116x256xf32>
    %36 = arith.truncf %35 : vector<116x256xf32> to vector<116x256xbf16>
    %c0_32 = arith.constant 0 : index
    %c0_33 = arith.constant 0 : index
    %c0_34 = arith.constant 0 : index
    %37 = vector.load %arg3[%c0_32, %c0_33, %c0_34] : memref<3x256x128xbf16, #tpu.memory_space<vmem>>, vector<1x256x128xbf16>
    %38 = vector.shape_cast %37 : vector<1x256x128xbf16> to vector<256x128xbf16>
    %cst_35 = arith.constant dense<0.000000e+00> : vector<116x128xf32>
    %39 = tpu.matmul %36, %38, %cst_35 {dimension_numbers = #tpu.dot_dimension_numbers<[1], [0], [0], [1], [0, 0, 1, 1], [], []>} : vector<116x256xbf16>, vector<256x128xbf16>, vector<116x128xf32> -> vector<116x128xf32>
    %c2_36 = arith.constant 2 : index
    %c0_37 = arith.constant 0 : index
    %40 = vector.load %arg17[%c2_36, %c0_37] : memref<120x256xf32, #tpu.memory_space<vmem>>, vector<116x256xf32>
    %41 = arith.truncf %40 : vector<116x256xf32> to vector<116x256xbf16>
    %c1_38 = arith.constant 1 : index
    %c0_39 = arith.constant 0 : index
    %c0_40 = arith.constant 0 : index
    %42 = vector.load %arg3[%c1_38, %c0_39, %c0_40] : memref<3x256x128xbf16, #tpu.memory_space<vmem>>, vector<1x256x128xbf16>
    %43 = vector.shape_cast %42 : vector<1x256x128xbf16> to vector<256x128xbf16>
    %cst_41 = arith.constant dense<0.000000e+00> : vector<116x128xf32>
    %44 = tpu.matmul %41, %43, %cst_41 {dimension_numbers = #tpu.dot_dimension_numbers<[1], [0], [0], [1], [0, 0, 1, 1], [], []>} : vector<116x256xbf16>, vector<256x128xbf16>, vector<116x128xf32> -> vector<116x128xf32>
    %45 = arith.addf %39, %44 : vector<116x128xf32>
    %c4 = arith.constant 4 : index
    %c0_42 = arith.constant 0 : index
    %46 = vector.load %arg17[%c4, %c0_42] : memref<120x256xf32, #tpu.memory_space<vmem>>, vector<116x256xf32>
    %47 = arith.truncf %46 : vector<116x256xf32> to vector<116x256xbf16>
    %c2_43 = arith.constant 2 : index
    %c0_44 = arith.constant 0 : index
    %c0_45 = arith.constant 0 : index
    %48 = vector.load %arg3[%c2_43, %c0_44, %c0_45] : memref<3x256x128xbf16, #tpu.memory_space<vmem>>, vector<1x256x128xbf16>
    %49 = vector.shape_cast %48 : vector<1x256x128xbf16> to vector<256x128xbf16>
    %cst_46 = arith.constant dense<0.000000e+00> : vector<116x128xf32>
    %50 = tpu.matmul %47, %49, %cst_46 {dimension_numbers = #tpu.dot_dimension_numbers<[1], [0], [0], [1], [0, 0, 1, 1], [], []>} : vector<116x256xbf16>, vector<256x128xbf16>, vector<116x128xf32> -> vector<116x128xf32>
    %51 = arith.addf %45, %50 : vector<116x128xf32>
    %c0_47 = arith.constant 0 : index
    %c0_48 = arith.constant 0 : index
    %52 = vector.load %arg4[%c0_47, %c0_48] : memref<1x128xf32, #tpu.memory_space<vmem>>, vector<1x128xf32>
    %53 = vector.broadcast %52 : vector<1x128xf32> to vector<116x128xf32>
    %54 = arith.addf %51, %53 : vector<116x128xf32>
    %cst_49 = arith.constant 0.000000e+00 : f32
    %55 = vector.broadcast %cst_49 : f32 to vector<116x128xf32>
    %56 = arith.maximumf %54, %55 : vector<116x128xf32>
    %57 = vector.extract_strided_slice %56 {offsets = [0, 0], sizes = [114, 128], strides = [1, 1]} : vector<116x128xf32> to vector<114x128xf32>
    %58 = vector.extract_strided_slice %56 {offsets = [2, 0], sizes = [114, 128], strides = [1, 1]} : vector<116x128xf32> to vector<114x128xf32>
    %59 = arith.maximumf %57, %58 : vector<114x128xf32>
    %c2_50 = arith.constant 2 : index
    %c0_51 = arith.constant 0 : index
    %60 = vector.load %arg14[%c2_50, %c0_51] : memref<120x1xf32, #tpu.memory_space<vmem>>, vector<114x1xf32>
    %61 = vector.broadcast %60 : vector<114x1xf32> to vector<114x128xf32>
    %62 = arith.mulf %59, %61 : vector<114x128xf32>
    %c2_52 = arith.constant 2 : index
    %c0_53 = arith.constant 0 : index
    %63 = vector.load %arg18[%c2_52, %c0_53] : memref<120x128xf32, #tpu.memory_space<vmem>>, vector<114x128xf32>
    tpu.vector_store %arg18[%c2_52, %c0_53], %62 {strides = array<i32>} : memref<120x128xf32, #tpu.memory_space<vmem>>, vector<114x128xf32>,
    %c0_54 = arith.constant 0 : index
    %c0_55 = arith.constant 0 : index
    %64 = vector.load %arg18[%c0_54, %c0_55] : memref<120x128xf32, #tpu.memory_space<vmem>>, vector<112x128xf32>
    %65 = arith.truncf %64 : vector<112x128xf32> to vector<112x128xbf16>
    %c0_56 = arith.constant 0 : index
    %c0_57 = arith.constant 0 : index
    %c0_58 = arith.constant 0 : index
    %66 = vector.load %arg5[%c0_56, %c0_57, %c0_58] : memref<3x128x64xbf16, #tpu.memory_space<vmem>>, vector<1x128x64xbf16>
    %67 = vector.shape_cast %66 : vector<1x128x64xbf16> to vector<128x64xbf16>
    %cst_59 = arith.constant dense<0.000000e+00> : vector<112x64xf32>
    %68 = tpu.matmul %65, %67, %cst_59 {dimension_numbers = #tpu.dot_dimension_numbers<[1], [0], [0], [1], [0, 0, 1, 1], [], []>} : vector<112x128xbf16>, vector<128x64xbf16>, vector<112x64xf32> -> vector<112x64xf32>
    %c4_60 = arith.constant 4 : index
    %c0_61 = arith.constant 0 : index
    %69 = vector.load %arg18[%c4_60, %c0_61] : memref<120x128xf32, #tpu.memory_space<vmem>>, vector<112x128xf32>
    %70 = arith.truncf %69 : vector<112x128xf32> to vector<112x128xbf16>
    %c1_62 = arith.constant 1 : index
    %c0_63 = arith.constant 0 : index
    %c0_64 = arith.constant 0 : index
    %71 = vector.load %arg5[%c1_62, %c0_63, %c0_64] : memref<3x128x64xbf16, #tpu.memory_space<vmem>>, vector<1x128x64xbf16>
    %72 = vector.shape_cast %71 : vector<1x128x64xbf16> to vector<128x64xbf16>
    %cst_65 = arith.constant dense<0.000000e+00> : vector<112x64xf32>
    %73 = tpu.matmul %70, %72, %cst_65 {dimension_numbers = #tpu.dot_dimension_numbers<[1], [0], [0], [1], [0, 0, 1, 1], [], []>} : vector<112x128xbf16>, vector<128x64xbf16>, vector<112x64xf32> -> vector<112x64xf32>
    %74 = arith.addf %68, %73 : vector<112x64xf32>
    %c8 = arith.constant 8 : index
    %c0_66 = arith.constant 0 : index
    %75 = vector.load %arg18[%c8, %c0_66] : memref<120x128xf32, #tpu.memory_space<vmem>>, vector<112x128xf32>
    %76 = arith.truncf %75 : vector<112x128xf32> to vector<112x128xbf16>
    %c2_67 = arith.constant 2 : index
    %c0_68 = arith.constant 0 : index
    %c0_69 = arith.constant 0 : index
    %77 = vector.load %arg5[%c2_67, %c0_68, %c0_69] : memref<3x128x64xbf16, #tpu.memory_space<vmem>>, vector<1x128x64xbf16>
    %78 = vector.shape_cast %77 : vector<1x128x64xbf16> to vector<128x64xbf16>
    %cst_70 = arith.constant dense<0.000000e+00> : vector<112x64xf32>
    %79 = tpu.matmul %76, %78, %cst_70 {dimension_numbers = #tpu.dot_dimension_numbers<[1], [0], [0], [1], [0, 0, 1, 1], [], []>} : vector<112x128xbf16>, vector<128x64xbf16>, vector<112x64xf32> -> vector<112x64xf32>
    %80 = arith.addf %74, %79 : vector<112x64xf32>
    %c0_71 = arith.constant 0 : index
    %c0_72 = arith.constant 0 : index
    %81 = vector.load %arg6[%c0_71, %c0_72] : memref<1x64xf32, #tpu.memory_space<vmem>>, vector<1x64xf32>
    %82 = vector.broadcast %81 : vector<1x64xf32> to vector<112x64xf32>
    %83 = arith.addf %80, %82 : vector<112x64xf32>
    %cst_73 = arith.constant 0.000000e+00 : f32
    %84 = vector.broadcast %cst_73 : f32 to vector<112x64xf32>
    %85 = arith.maximumf %83, %84 : vector<112x64xf32>
    %86 = vector.extract_strided_slice %85 {offsets = [0, 0], sizes = [108, 64], strides = [1, 1]} : vector<112x64xf32> to vector<108x64xf32>
    %87 = vector.extract_strided_slice %85 {offsets = [4, 0], sizes = [108, 64], strides = [1, 1]} : vector<112x64xf32> to vector<108x64xf32>
    %88 = arith.maximumf %86, %87 : vector<108x64xf32>
    %c4_74 = arith.constant 4 : index
    %c0_75 = arith.constant 0 : index
    %89 = vector.load %arg15[%c4_74, %c0_75] : memref<120x1xf32, #tpu.memory_space<vmem>>, vector<108x1xf32>
    %90 = vector.broadcast %89 : vector<108x1xf32> to vector<108x64xf32>
    %91 = arith.mulf %88, %90 : vector<108x64xf32>
    %c4_76 = arith.constant 4 : index
    %c0_77 = arith.constant 0 : index
    %92 = vector.load %arg19[%c4_76, %c0_77] : memref<120x64xf32, #tpu.memory_space<vmem>>, vector<108x64xf32>
    tpu.vector_store %arg19[%c4_76, %c0_77], %91 {strides = array<i32>} : memref<120x64xf32, #tpu.memory_space<vmem>>, vector<108x64xf32>,
    %c0_78 = arith.constant 0 : index
    %c0_79 = arith.constant 0 : index
    %93 = vector.load %arg19[%c0_78, %c0_79] : memref<120x64xf32, #tpu.memory_space<vmem>>, vector<104x64xf32>
    %94 = arith.truncf %93 : vector<104x64xf32> to vector<104x64xbf16>
    %c0_80 = arith.constant 0 : index
    %c0_81 = arith.constant 0 : index
    %c0_82 = arith.constant 0 : index
    %95 = vector.load %arg7[%c0_80, %c0_81, %c0_82] : memref<3x64x32xbf16, #tpu.memory_space<vmem>>, vector<1x64x32xbf16>
    %96 = vector.shape_cast %95 : vector<1x64x32xbf16> to vector<64x32xbf16>
    %cst_83 = arith.constant dense<0.000000e+00> : vector<104x32xf32>
    %97 = tpu.matmul %94, %96, %cst_83 {dimension_numbers = #tpu.dot_dimension_numbers<[1], [0], [0], [1], [0, 0, 1, 1], [], []>} : vector<104x64xbf16>, vector<64x32xbf16>, vector<104x32xf32> -> vector<104x32xf32>
    %c8_84 = arith.constant 8 : index
    %c0_85 = arith.constant 0 : index
    %98 = vector.load %arg19[%c8_84, %c0_85] : memref<120x64xf32, #tpu.memory_space<vmem>>, vector<104x64xf32>
    %99 = arith.truncf %98 : vector<104x64xf32> to vector<104x64xbf16>
    %c1_86 = arith.constant 1 : index
    %c0_87 = arith.constant 0 : index
    %c0_88 = arith.constant 0 : index
    %100 = vector.load %arg7[%c1_86, %c0_87, %c0_88] : memref<3x64x32xbf16, #tpu.memory_space<vmem>>, vector<1x64x32xbf16>
    %101 = vector.shape_cast %100 : vector<1x64x32xbf16> to vector<64x32xbf16>
    %cst_89 = arith.constant dense<0.000000e+00> : vector<104x32xf32>
    %102 = tpu.matmul %99, %101, %cst_89 {dimension_numbers = #tpu.dot_dimension_numbers<[1], [0], [0], [1], [0, 0, 1, 1], [], []>} : vector<104x64xbf16>, vector<64x32xbf16>, vector<104x32xf32> -> vector<104x32xf32>
    %103 = arith.addf %97, %102 : vector<104x32xf32>
    %c16 = arith.constant 16 : index
    %c0_90 = arith.constant 0 : index
    %104 = vector.load %arg19[%c16, %c0_90] : memref<120x64xf32, #tpu.memory_space<vmem>>, vector<104x64xf32>
    %105 = arith.truncf %104 : vector<104x64xf32> to vector<104x64xbf16>
    %c2_91 = arith.constant 2 : index
    %c0_92 = arith.constant 0 : index
    %c0_93 = arith.constant 0 : index
    %106 = vector.load %arg7[%c2_91, %c0_92, %c0_93] : memref<3x64x32xbf16, #tpu.memory_space<vmem>>, vector<1x64x32xbf16>
    %107 = vector.shape_cast %106 : vector<1x64x32xbf16> to vector<64x32xbf16>
    %cst_94 = arith.constant dense<0.000000e+00> : vector<104x32xf32>
    %108 = tpu.matmul %105, %107, %cst_94 {dimension_numbers = #tpu.dot_dimension_numbers<[1], [0], [0], [1], [0, 0, 1, 1], [], []>} : vector<104x64xbf16>, vector<64x32xbf16>, vector<104x32xf32> -> vector<104x32xf32>
    %109 = arith.addf %103, %108 : vector<104x32xf32>
    %c0_95 = arith.constant 0 : index
    %c0_96 = arith.constant 0 : index
    %110 = vector.load %arg8[%c0_95, %c0_96] : memref<1x32xf32, #tpu.memory_space<vmem>>, vector<1x32xf32>
    %111 = vector.broadcast %110 : vector<1x32xf32> to vector<104x32xf32>
    %112 = arith.addf %109, %111 : vector<104x32xf32>
    %cst_97 = arith.constant 0.000000e+00 : f32
    %113 = vector.broadcast %cst_97 : f32 to vector<104x32xf32>
    %114 = arith.maximumf %112, %113 : vector<104x32xf32>
    %115 = arith.truncf %114 : vector<104x32xf32> to vector<104x32xbf16>
    %116 = vector.extract_strided_slice %115 {offsets = [0, 0], sizes = [64, 32], strides = [1, 1]} : vector<104x32xbf16> to vector<64x32xbf16>
    %c0_98 = arith.constant 0 : index
    %c0_99 = arith.constant 0 : index
    %c0_100 = arith.constant 0 : index
    %117 = vector.load %arg9[%c0_98, %c0_99, %c0_100] : memref<6x32x64xbf16, #tpu.memory_space<vmem>>, vector<1x32x64xbf16>
    %118 = vector.shape_cast %117 : vector<1x32x64xbf16> to vector<32x64xbf16>
    %cst_101 = arith.constant dense<0.000000e+00> : vector<64x64xf32>
    %119 = tpu.matmul %116, %118, %cst_101 {dimension_numbers = #tpu.dot_dimension_numbers<[1], [0], [0], [1], [0, 0, 1, 1], [], []>} : vector<64x32xbf16>, vector<32x64xbf16>, vector<64x64xf32> -> vector<64x64xf32>
    %120 = vector.extract_strided_slice %115 {offsets = [8, 0], sizes = [64, 32], strides = [1, 1]} : vector<104x32xbf16> to vector<64x32xbf16>
    %c1_102 = arith.constant 1 : index
    %c0_103 = arith.constant 0 : index
    %c0_104 = arith.constant 0 : index
    %121 = vector.load %arg9[%c1_102, %c0_103, %c0_104] : memref<6x32x64xbf16, #tpu.memory_space<vmem>>, vector<1x32x64xbf16>
    %122 = vector.shape_cast %121 : vector<1x32x64xbf16> to vector<32x64xbf16>
    %cst_105 = arith.constant dense<0.000000e+00> : vector<64x64xf32>
    %123 = tpu.matmul %120, %122, %cst_105 {dimension_numbers = #tpu.dot_dimension_numbers<[1], [0], [0], [1], [0, 0, 1, 1], [], []>} : vector<64x32xbf16>, vector<32x64xbf16>, vector<64x64xf32> -> vector<64x64xf32>
    %124 = arith.addf %119, %123 : vector<64x64xf32>
    %125 = vector.extract_strided_slice %115 {offsets = [16, 0], sizes = [64, 32], strides = [1, 1]} : vector<104x32xbf16> to vector<64x32xbf16>
    %c2_106 = arith.constant 2 : index
    %c0_107 = arith.constant 0 : index
    %c0_108 = arith.constant 0 : index
    %126 = vector.load %arg9[%c2_106, %c0_107, %c0_108] : memref<6x32x64xbf16, #tpu.memory_space<vmem>>, vector<1x32x64xbf16>
    %127 = vector.shape_cast %126 : vector<1x32x64xbf16> to vector<32x64xbf16>
    %cst_109 = arith.constant dense<0.000000e+00> : vector<64x64xf32>
    %128 = tpu.matmul %125, %127, %cst_109 {dimension_numbers = #tpu.dot_dimension_numbers<[1], [0], [0], [1], [0, 0, 1, 1], [], []>} : vector<64x32xbf16>, vector<32x64xbf16>, vector<64x64xf32> -> vector<64x64xf32>
    %129 = arith.addf %124, %128 : vector<64x64xf32>
    %130 = vector.extract_strided_slice %115 {offsets = [24, 0], sizes = [64, 32], strides = [1, 1]} : vector<104x32xbf16> to vector<64x32xbf16>
    %c3 = arith.constant 3 : index
    %c0_110 = arith.constant 0 : index
    %c0_111 = arith.constant 0 : index
    %131 = vector.load %arg9[%c3, %c0_110, %c0_111] : memref<6x32x64xbf16, #tpu.memory_space<vmem>>, vector<1x32x64xbf16>
    %132 = vector.shape_cast %131 : vector<1x32x64xbf16> to vector<32x64xbf16>
    %cst_112 = arith.constant dense<0.000000e+00> : vector<64x64xf32>
    %133 = tpu.matmul %130, %132, %cst_112 {dimension_numbers = #tpu.dot_dimension_numbers<[1], [0], [0], [1], [0, 0, 1, 1], [], []>} : vector<64x32xbf16>, vector<32x64xbf16>, vector<64x64xf32> -> vector<64x64xf32>
    %134 = arith.addf %129, %133 : vector<64x64xf32>
    %135 = vector.extract_strided_slice %115 {offsets = [32, 0], sizes = [64, 32], strides = [1, 1]} : vector<104x32xbf16> to vector<64x32xbf16>
    %c4_113 = arith.constant 4 : index
    %c0_114 = arith.constant 0 : index
    %c0_115 = arith.constant 0 : index
    %136 = vector.load %arg9[%c4_113, %c0_114, %c0_115] : memref<6x32x64xbf16, #tpu.memory_space<vmem>>, vector<1x32x64xbf16>
    %137 = vector.shape_cast %136 : vector<1x32x64xbf16> to vector<32x64xbf16>
    %cst_116 = arith.constant dense<0.000000e+00> : vector<64x64xf32>
    %138 = tpu.matmul %135, %137, %cst_116 {dimension_numbers = #tpu.dot_dimension_numbers<[1], [0], [0], [1], [0, 0, 1, 1], [], []>} : vector<64x32xbf16>, vector<32x64xbf16>, vector<64x64xf32> -> vector<64x64xf32>
    %139 = arith.addf %134, %138 : vector<64x64xf32>
    %140 = vector.extract_strided_slice %115 {offsets = [40, 0], sizes = [64, 32], strides = [1, 1]} : vector<104x32xbf16> to vector<64x32xbf16>
    %c5 = arith.constant 5 : index
    %c0_117 = arith.constant 0 : index
    %c0_118 = arith.constant 0 : index
    %141 = vector.load %arg9[%c5, %c0_117, %c0_118] : memref<6x32x64xbf16, #tpu.memory_space<vmem>>, vector<1x32x64xbf16>
    %142 = vector.shape_cast %141 : vector<1x32x64xbf16> to vector<32x64xbf16>
    %cst_119 = arith.constant dense<0.000000e+00> : vector<64x64xf32>
    %143 = tpu.matmul %140, %142, %cst_119 {dimension_numbers = #tpu.dot_dimension_numbers<[1], [0], [0], [1], [0, 0, 1, 1], [], []>} : vector<64x32xbf16>, vector<32x64xbf16>, vector<64x64xf32> -> vector<64x64xf32>
    %144 = arith.addf %139, %143 : vector<64x64xf32>
    %c0_120 = arith.constant 0 : index
    %c0_121 = arith.constant 0 : index
    %145 = vector.load %arg10[%c0_120, %c0_121] : memref<1x64xf32, #tpu.memory_space<vmem>>, vector<1x64xf32>
    %146 = vector.broadcast %145 : vector<1x64xf32> to vector<64x64xf32>
    %147 = arith.addf %144, %146 : vector<64x64xf32>
    %cst_122 = arith.constant 0.000000e+00 : f32
    %148 = vector.broadcast %cst_122 : f32 to vector<64x64xf32>
    %149 = arith.maximumf %147, %148 : vector<64x64xf32>
    %150 = arith.truncf %149 : vector<64x64xf32> to vector<64x64xbf16>
    %c0_123 = arith.constant 0 : index
    %c0_124 = arith.constant 0 : index
    %151 = vector.load %arg11[%c0_123, %c0_124] : memref<64x4xbf16, #tpu.memory_space<vmem>>, vector<64x4xbf16>
    %cst_125 = arith.constant dense<0.000000e+00> : vector<64x4xf32>
    %152 = tpu.matmul %150, %151, %cst_125 {dimension_numbers = #tpu.dot_dimension_numbers<[1], [0], [0], [1], [0, 0, 1, 1], [], []>} : vector<64x64xbf16>, vector<64x4xbf16>, vector<64x4xf32> -> vector<64x4xf32>
    %c0_126 = arith.constant 0 : index
    %c0_127 = arith.constant 0 : index
    %153 = vector.load %arg12[%c0_126, %c0_127] : memref<1x4xf32, #tpu.memory_space<vmem>>, vector<1x4xf32>
    %154 = vector.broadcast %153 : vector<1x4xf32> to vector<64x4xf32>
    %155 = arith.addf %152, %154 : vector<64x4xf32>
    %156 = vector.extract_strided_slice %155 {offsets = [0, 0], sizes = [1, 4], strides = [1, 1]} : vector<64x4xf32> to vector<1x4xf32>
    %c0_128 = arith.constant 0 : index
    %c0_129 = arith.constant 0 : index
    %157 = vector.load %arg16[%c0_128, %c0_129] : memref<2x4xf32, #tpu.memory_space<vmem>>, vector<1x4xf32>
    tpu.vector_store %arg16[%c0_128, %c0_129], %156 {strides = array<i32>} : memref<2x4xf32, #tpu.memory_space<vmem>>, vector<1x4xf32>,
    %158 = vector.extract_strided_slice %155 {offsets = [56, 0], sizes = [1, 4], strides = [1, 1]} : vector<64x4xf32> to vector<1x4xf32>
    %c1_130 = arith.constant 1 : index
    %c0_131 = arith.constant 0 : index
    %159 = vector.load %arg16[%c1_130, %c0_131] : memref<2x4xf32, #tpu.memory_space<vmem>>, vector<1x4xf32>
    tpu.vector_store %arg16[%c1_130, %c0_131], %158 {strides = array<i32>} : memref<2x4xf32, #tpu.memory_space<vmem>>, vector<1x4xf32>,
    return
  }
}

</mosaic_0001>

<bundles_post_ra>
// kernel: text_classifier_forward.1
= control target key start
LH: loop header
LB: loop body
LE: loop exit
PB: predicated region body
PF: predicated region fallthrough
CT: control target
= control target key end

     0   :  { %s7054_s0 = inlined_call_operand.vmem [shape: f32[120,16], index: 0, kind: input, shape index: {}]   ;;  %s7055_s1 = inlined_call_operand.vmem [shape: bf16[3,16,256], index: 1, kind: input, shape index: {}]   ;;  %s7056_s2 = inlined_call_operand.vmem [shape: f32[1,256], index: 2, kind: input, shape index: {}]   ;;  %s7057_s3 = inlined_call_operand.vmem [shape: bf16[3,256,128], index: 3, kind: input, shape index: {}]   ;;  %s7058_s4 = inlined_call_operand.vmem [shape: f32[1,128], index: 4, kind: input, shape index: {}]   ;;  %s7059_s5 = inlined_call_operand.vmem [shape: bf16[3,128,64], index: 5, kind: input, shape index: {}]   ;;  %s7060_s6 = inlined_call_operand.vmem [shape: f32[1,64], index: 6, kind: input, shape index: {}]   ;;  %s7061_s7 = inlined_call_operand.vmem [shape: bf16[3,64,32], index: 7, kind: input, shape index: {}]   ;;  %s7062_s8 = inlined_call_operand.vmem [shape: f32[1,32], index: 8, kind: input, shape index: {}]   ;;  %s7063_s9 = inlined_call_operand.vmem [shape: bf16[6,32,64], index: 9, kind: input, shape index: {}]   ;;  %s7064_s10 = inlined_call_operand.vmem [shape: f32[1,64], index: 10, kind: input, shape index: {}]   ;;  %s7065_s11 = inlined_call_operand.vmem [shape: bf16[64,4], index: 11, kind: input, shape index: {}]   ;;  %s7066_s12 = inlined_call_operand.vmem [shape: f32[1,4], index: 12, kind: input, shape index: {}]   ;;  %s7067_s13 = inlined_call_operand.vmem [shape: f32[120,1], index: 13, kind: input, shape index: {}]   ;;  %s7068_s14 = inlined_call_operand.vmem [shape: f32[120,1], index: 14, kind: input, shape index: {}]   ;;  %s7069_s15 = inlined_call_operand.vmem [shape: f32[120,1], index: 15, kind: input, shape index: {}]   ;;  %s7070_s16 = inlined_call_operand.hbm [shape: f32[2,4], index: 16, kind: output, shape index: {}]  }
   0x1   :  { %7072 = sst [smem:[#allocation14_spill]] %s7054_s0 }
   0x2   :  { %v5233_v0 = vld [vmem:[%s7055_s1 + $0x14] ss:$8 sps:$4 sm:$0xff]   ;;  %v5235_v1 = vld [vmem:[%s7055_s1 + $0x10] ss:$8 sps:$4 sm:$0xff]   ;;  %v5365_v2 = vmov 0   ;;  %s7073_s27 = sld [smem:[#allocation14_spill]] }
   0x3   :  { %234 = vmatprep.mubr.bf16.mxu0 %v5365_v2  ;;  %304 = vmatprep.mubr.bf16.mxu1 %v5365_v2  ;;  %vm177_vm0 = vcmask 130048   ;;  %v5236_v8 = vld [vmem:[%s7055_s1 + $0x20] ss:$8 sps:$4 sm:$0xff]   ;;  %v5238_v9 = vld [vmem:[%s7055_s1 + $0x24] ss:$8 sps:$4 sm:$0xff]   ;;  %v882_v22 = vld [vmem:[%s7067_s13 + $0x11] sm:$0xff] }
   0x4   :  { %216 = vmatprep.subr.bf16.mxu0 %v5233_v0  ;;  %5225 = vmatprep.subr.bf16.mxu1 %v5233_v0  ;;  %v5239_v10 = vld [vmem:[%s7055_s1] ss:$8 sps:$4 sm:$0xff]   ;;  %v5241_v11 = vld [vmem:[%s7055_s1 + $0x4] ss:$8 sps:$4 sm:$0xff]   ;;  %v886_v35 = vld [vmem:[%s7067_s13 + $0x31] sm:$0xff] }
   0x5   :  { %217 = vmatpush1.bf16.msra.mxu0 %v5235_v1  ;;  %5226 = vmatpush1.bf16.msra.mxu1 %v5235_v1  ;;  %v880_v23 = vld [vmem:[%s7067_s13 + $0x1] sm:$0xff]  ;;  %v883_v24 = vld [vmem:[%s7067_s13 + $0x19] sm:$0xff]  ;;  %v881_v25 = vld [vmem:[%s7067_s13 + $0x9] sm:$0xff] }
   0x6   :  { %5232 = vset.pattern.permute.xlu1 %v5365_v2  ;;  %5231 = vset.pattern.permute.xlu0 %v5365_v2  ;;  %v885_v28 = vld [vmem:[%s7067_s13 + $0x29] sm:$0xff]  ;;  %v884_v29 = vld [vmem:[%s7067_s13 + $0x21] sm:$0xff]  ;;  %v887_v34 = vld [vmem:[%s7067_s13 + $0x39] sm:$0xff] }
   0x7   :  { %532 = vmatprep.subr.bf16.mxu0 %v5238_v9  ;;  %361 = vmatprep.subr.bf16.mxu1 %v5241_v11  ;;  %v889_v38 = vld [vmem:[%s7067_s13 + $0x49] sm:$0xff]  ;;  %v888_v39 = vld [vmem:[%s7067_s13 + $0x41] sm:$0xff]  ;;  %v891_v44 = vld [vmem:[%s7067_s13 + $0x59] sm:$0xff] }
   0x8   :  { %v141_v3 = vld [vmem:[%s7073_s27 + $0x1] sm:$0xff]  ;;  %v142_v4 = vld [vmem:[%s7073_s27 + $0x9] sm:$0xff]  ;;  %v155_v6 = vld [vmem:[%s7073_s27 + $0x71] sm:$0x3f]  ;;  %907 = vperm.xlu1 %5232, %v882_v22   ;;  %897 = vperm.xlu0 %5231, %v880_v23  }
   0x9   :  { %v156_v5 = vpack.c.bf16 %v142_v4, %v141_v3  ;;  %v163_v7 = vpack.c.bf16 %v155_v6, %v155_v6  ;;  %v143_v12 = vld [vmem:[%s7073_s27 + $0x11] sm:$0xff]  ;;  %v144_v13 = vld [vmem:[%s7073_s27 + $0x19] sm:$0xff]  ;;  %v117_v15 = vld [vmem:[%s7073_s27 + $0x8] sm:$0xff] }
   0xa   :  { %v116_v14 = vld [vmem:[%s7073_s27] sm:$0xff]  ;;  %v157_v16 = vpack.c.bf16 %v144_v13, %v143_v12  ;;  %v146_v19 = vld [vmem:[%s7073_s27 + $0x29] sm:$0xff]  ;;  %v119_v21 = vld [vmem:[%s7073_s27 + $0x18] sm:$0xff] }
   0xb   :  { %4267 = vmatmul.mubr.msk.bf16.vlgmr.msra.gmra.mxu0 %vm177_vm0, %v156_v5  ;;  %4274 = vmatmul.mubr.msk.bf16.vlgmr.msra.gmra.mxu1 %vm177_vm0, %v163_v7  ;;  %v131_v17 = vpack.c.bf16 %v117_v15, %v116_v14  ;;  %v145_v18 = vld [vmem:[%s7073_s27 + $0x21] sm:$0xff]  ;;  %v118_v20 = vld [vmem:[%s7073_s27 + $0x10] sm:$0xff]  ;;  %v148_v31 = vld [vmem:[%s7073_s27 + $0x39] sm:$0xff] }
   0xc   :  { %533 = vmatpush1.bf16.msra.mxu0 %v5236_v8  ;;  %362 = vmatpush1.bf16.msra.mxu1 %v5239_v10  ;;  %v158_v26 = vpack.c.bf16 %v146_v19, %v145_v18  ;;  %v132_v27 = vpack.c.bf16 %v119_v21, %v118_v20  ;;  %v147_v30 = vld [vmem:[%s7073_s27 + $0x31] sm:$0xff]  ;;  %v120_v32 = vld [vmem:[%s7073_s27 + $0x20] sm:$0xff]  ;;  %v121_v33 = vld [vmem:[%s7073_s27 + $0x28] sm:$0xff] }
   0xd   :  { %244 = vmatprep.mubr.bf16.mxu0 %v5365_v2  ;;  %379 = vmatprep.mubr.bf16.mxu1 %v5365_v2  ;;  %v159_v36 = vpack.c.bf16 %v148_v31, %v147_v30  ;;  %v133_v37 = vpack.c.bf16 %v121_v33, %v120_v32  ;;  %v149_v40 = vld [vmem:[%s7073_s27 + $0x41] sm:$0xff]  ;;  %v150_v41 = vld [vmem:[%s7073_s27 + $0x49] sm:$0xff]  ;;  %v123_v43 = vld [vmem:[%s7073_s27 + $0x38] sm:$0xff] }
   0xe   :  { %912 = vperm.xlu1 %5232, %v883_v24   ;;  %902 = vperm.xlu0 %5231, %v881_v25   ;;  %v122_v42 = vld [vmem:[%s7073_s27 + $0x30] sm:$0xff]  ;;  %v160_v46 = vpack.c.bf16 %v150_v41, %v149_v40  ;;  %v892_v49 = vld [vmem:[%s7067_s13 + $0x61] sm:$0xff]  ;;  %v152_v51 = vld [vmem:[%s7073_s27 + $0x59] sm:$0xff] }
   0xf   :  { %v890_v45 = vld [vmem:[%s7067_s13 + $0x51] sm:$0xff]  ;;  %v134_v47 = vpack.c.bf16 %v123_v43, %v122_v42  ;;  %v893_v48 = vld [vmem:[%s7067_s13 + $0x69] sm:$0xff]  ;;  %v124_v52 = vld [vmem:[%s7073_s27 + $0x40] sm:$0xff] }
  0x10   :  { %v151_v50 = vld [vmem:[%s7073_s27 + $0x51] sm:$0xff]  ;;  %v125_v53 = vld [vmem:[%s7073_s27 + $0x48] sm:$0xff]  ;;  %v2129_v1 = vld [vmem:[%s7068_s14 + $0x1a] sm:$0xff] }
  0x11   :  { %v2126_v54 = vld [vmem:[%s7068_s14 + $0x2] sm:$0xff]  ;;  %v894_v55 = vld [vmem:[%s7067_s13 + $0x71] sm:$0x1f]  ;;  %v161_v56 = vpack.c.bf16 %v152_v51, %v151_v50  ;;  %v135_v57 = vpack.c.bf16 %v125_v53, %v124_v52  ;;  %v127_v63 = vld [vmem:[%s7073_s27 + $0x58] sm:$0xff] }
  0x12   :  { %922 = vperm.xlu1 %5232, %v885_v28   ;;  %917 = vperm.xlu0 %5231, %v884_v29   ;;  %v2128_v58 = vld [vmem:[%s7068_s14 + $0x12] sm:$0xff]  ;;  %v2127_v59 = vld [vmem:[%s7068_s14 + $0xa] sm:$0xff]  ;;  %v153_v60 = vld [vmem:[%s7073_s27 + $0x61] sm:$0xff] }
  0x13   :  { %4268 = vmatmul.mubr.msk.bf16.gmra.mxu0 %vm177_vm0, %v157_v16  ;;  %4277 = vmatmul.mubr.msk.bf16.vlgmr.msra.gmra.mxu1 %vm177_vm0, %v131_v17  ;;  %v154_v61 = vld [vmem:[%s7073_s27 + $0x69] sm:$0xff]  ;;  %v2132_v5 = vld [vmem:[%s7068_s14 + $0x32] sm:$0xff]  ;;  %v128_v7 = vld [vmem:[%s7073_s27 + $0x60] sm:$0xff] }
  0x14   :  { %254 = vmatprep.mubr.bf16.mxu0 %v5365_v2  ;;  %389 = vmatprep.mubr.bf16.mxu1 %v5365_v2  ;;  %v126_v62 = vld [vmem:[%s7073_s27 + $0x50] sm:$0xff]  ;;  %v2130_v0 = vld [vmem:[%s7068_s14 + $0x22] sm:$0xff]  ;;  %v162_v3 = vpack.c.bf16 %v154_v61, %v153_v60  ;;  %v2133_v12 = vld [vmem:[%s7068_s14 + $0x3a] sm:$0xff] }
  0x15   :  { %v136_v4 = vpack.c.bf16 %v127_v63, %v126_v62  ;;  %v2131_v6 = vld [vmem:[%s7068_s14 + $0x2a] sm:$0xff]  ;;  %v458_v9 = vld [vmem:[%s7073_s27 + $0x2] sm:$0xff]  ;;  %v2136_v15 = vld [vmem:[%s7068_s14 + $0x52] sm:$0xff] }
  0x16   :  { %932 = vperm.xlu1 %5232, %v887_v34   ;;  %927 = vperm.xlu0 %5231, %v886_v35   ;;  %v129_v8 = vld [vmem:[%s7073_s27 + $0x68] sm:$0xff]  ;;  %v130_v17 = vld [vmem:[%s7073_s27 + $0x70] sm:$0x3f]  ;;  %v461_v19 = vld [vmem:[%s7073_s27 + $0x1a] sm:$0xff] }
  0x17   :  { %v459_v10 = vld [vmem:[%s7073_s27 + $0xa] sm:$0xff]  ;;  %v2134_v11 = vld [vmem:[%s7068_s14 + $0x42] sm:$0xff]  ;;  %v137_v13 = vpack.c.bf16 %v129_v8, %v128_v7  ;;  %v460_v18 = vld [vmem:[%s7073_s27 + $0x12] sm:$0xff]  ;;  %v138_v22 = vpack.c.bf16 %v130_v17, %v130_v17 }
  0x18   :  { %v473_v14 = vpack.c.bf16 %v459_v10, %v458_v9  ;;  %v2135_v16 = vld [vmem:[%s7068_s14 + $0x4a] sm:$0xff]  ;;  %v2138_v20 = vld [vmem:[%s7068_s14 + $0x62] sm:$0xff]  ;;  %v2137_v21 = vld [vmem:[%s7068_s14 + $0x5a] sm:$0xff]  ;;  %v474_v23 = vpack.c.bf16 %v461_v19, %v460_v18 }
  0x19   :  { %v2140_v24 = vld [vmem:[%s7068_s14 + $0x72] sm:$0x3]  ;;  %v2139_v25 = vld [vmem:[%s7068_s14 + $0x6a] sm:$0xff]  ;;  %v2892_v31 = vld [vmem:[%s7069_s15 + $0x1c] sm:$0xff] }
  0x1a   :  { %942 = vperm.xlu1 %5232, %v889_v38   ;;  %937 = vperm.xlu0 %5231, %v888_v39   ;;  %v2890_v28 = vld [vmem:[%s7069_s15 + $0xc] sm:$0xff]  ;;  %v2889_v29 = vld [vmem:[%s7069_s15 + $0x4] sm:$0xff]  ;;  %v2891_v32 = vld [vmem:[%s7069_s15 + $0x14] sm:$0xff] }
  0x1b   :  { %4269 = vmatmul.mubr.msk.bf16.gmra.mxu0 %vm177_vm0, %v158_v26  ;;  %4278 = vmatmul.mubr.msk.bf16.gmra.mxu1 %vm177_vm0, %v132_v27  ;;  %v462_v26 = vld [vmem:[%s7073_s27 + $0x22] sm:$0xff]  ;;  %v463_v27 = vld [vmem:[%s7073_s27 + $0x2a] sm:$0xff]  ;;  %v464_v33 = vld [vmem:[%s7073_s27 + $0x32] sm:$0xff] }
  0x1c   :  { %264 = vmatprep.mubr.bf16.mxu0 %v5365_v2  ;;  %399 = vmatprep.mubr.bf16.mxu1 %v5365_v2  ;;  %v475_v30 = vpack.c.bf16 %v463_v27, %v462_v26  ;;  %v465_v34 = vld [vmem:[%s7073_s27 + $0x3a] sm:$0xff]  ;;  %v2894_v35 = vld [vmem:[%s7069_s15 + $0x2c] sm:$0xff]  ;;  %v466_v40 = vld [vmem:[%s7073_s27 + $0x42] sm:$0xff] }
  0x1d   :  { %v2896_v38 = vld [vmem:[%s7069_s15 + $0x3c] sm:$0xff]  ;;  %v2895_v39 = vld [vmem:[%s7069_s15 + $0x34] sm:$0xff]  ;;  %v467_v41 = vld [vmem:[%s7073_s27 + $0x4a] sm:$0xff] }
  0x1e   :  { %952 = vperm.xlu1 %5232, %v891_v44   ;;  %947 = vperm.xlu0 %5231, %v890_v45   ;;  %v2898_v42 = vld [vmem:[%s7069_s15 + $0x4c] sm:$0xff]  ;;  %v2897_v43 = vld [vmem:[%s7069_s15 + $0x44] sm:$0xff]  ;;  %v477_v44 = vpack.c.bf16 %v467_v41, %v466_v40  ;;  %v2900_v45 = vld [vmem:[%s7069_s15 + $0x5c] sm:$0xff] }
  0x1f   :  { %v2901_v50 = vld [vmem:[%s7069_s15 + $0x64] sm:$0xff] }
  0x22   :  { %962 = vperm.xlu1 %5232, %v893_v48   ;;  %957 = vperm.xlu0 %5231, %v892_v49   ;;  %v469_v48 = vld [vmem:[%s7073_s27 + $0x5a] sm:$0xff]  ;;  %v2902_v49 = vld [vmem:[%s7069_s15 + $0x6c] sm:$0xf] }
  0x23   :  { %4270 = vmatmul.mubr.msk.bf16.gmra.mxu0 %vm177_vm0, %v159_v36  ;;  %4279 = vmatmul.mubr.msk.bf16.gmra.mxu1 %vm177_vm0, %v133_v37  ;;  %v2893_v36 = vld [vmem:[%s7069_s15 + $0x24] sm:$0xff]  ;;  %v476_v37 = vpack.c.bf16 %v465_v34, %v464_v33 }
  0x24   :  { %274 = vmatprep.mubr.bf16.mxu0 %v5365_v2  ;;  %409 = vmatprep.mubr.bf16.mxu1 %v5365_v2 }
  0x26   :  { %2143 = vperm.xlu1 %5232, %v2126_v54   ;;  %967 = vperm.xlu0 %5231, %v894_v55  }
  0x2a   :  { %2153 = vperm.xlu1 %5232, %v2128_v58   ;;  %2148 = vperm.xlu0 %5231, %v2127_v59  }
  0x2b   :  { %4271 = vmatmul.mubr.msk.bf16.gmra.mxu0 %vm177_vm0, %v160_v46  ;;  %4280 = vmatmul.mubr.msk.bf16.gmra.mxu1 %vm177_vm0, %v134_v47  ;;  %v2899_v46 = vld [vmem:[%s7069_s15 + $0x54] sm:$0xff] }
  0x2c   :  { %284 = vmatprep.mubr.bf16.mxu0 %v5365_v2  ;;  %419 = vmatprep.mubr.bf16.mxu1 %v5365_v2  ;;  %v468_v47 = vld [vmem:[%s7073_s27 + $0x52] sm:$0xff] }
  0x2d   :  { %v478_v51 = vpack.c.bf16 %v469_v48, %v468_v47 }
  0x2e   :  { %2163 = vperm.xlu1 %5232, %v2130_v0   ;;  %2158 = vperm.xlu0 %5231, %v2129_v1  }
  0x32   :  { %2173 = vperm.xlu1 %5232, %v2132_v5   ;;  %2168 = vperm.xlu0 %5231, %v2131_v6  }
  0x33   :  { %4272 = vmatmul.mubr.msk.bf16.gmra.mxu0 %vm177_vm0, %v161_v56  ;;  %4281 = vmatmul.mubr.msk.bf16.gmra.mxu1 %vm177_vm0, %v135_v57 }
  0x34   :  { %294 = vmatprep.mubr.bf16.mxu0 %v5365_v2  ;;  %429 = vmatprep.mubr.bf16.mxu1 %v5365_v2 }
  0x36   :  { %2183 = vperm.xlu1 %5232, %v2134_v11   ;;  %2178 = vperm.xlu0 %5231, %v2133_v12  }
  0x3a   :  { %2193 = vperm.xlu1 %5232, %v2136_v15   ;;  %2188 = vperm.xlu0 %5231, %v2135_v16  }
  0x3b   :  { %4273 = vmatmul.mubr.msk.bf16.gmra.mxu0 %vm177_vm0, %v162_v3  ;;  %4282 = vmatmul.mubr.msk.bf16.gmra.mxu1 %vm177_vm0, %v136_v4 }
  0x3c   :  { %439 = vmatprep.mubr.bf16.mxu1 %v5365_v2  ;;  %550 = vmatprep.mubr.bf16.mxu0 %v5365_v2 }
  0x3e   :  { %2203 = vperm.xlu1 %5232, %v2138_v20   ;;  %2198 = vperm.xlu0 %5231, %v2137_v21  }
  0x42   :  { %2213 = vperm.xlu1 %5232, %v2140_v24   ;;  %2208 = vperm.xlu0 %5231, %v2139_v25  }
  0x43   :  { %4283 = vmatmul.mubr.msk.bf16.gmra.mxu1 %vm177_vm0, %v137_v13  ;;  %4289 = vmatmul.mubr.msk.bf16.vlgmr.msra.gmra.mxu0 %vm177_vm0, %v473_v14 }
  0x44   :  { %449 = vmatprep.mubr.bf16.mxu1 %v5365_v2  ;;  %560 = vmatprep.mubr.bf16.mxu0 %v5365_v2 }
  0x46   :  { %2910 = vperm.xlu1 %5232, %v2890_v28   ;;  %2905 = vperm.xlu0 %5231, %v2889_v29  }
  0x4a   :  { %2920 = vperm.xlu1 %5232, %v2892_v31   ;;  %2915 = vperm.xlu0 %5231, %v2891_v32  }
  0x4b   :  { %4284 = vmatmul.mubr.msk.bf16.gmra.mxu1 %vm177_vm0, %v138_v22  ;;  %4290 = vmatmul.mubr.msk.bf16.gmra.mxu0 %vm177_vm0, %v474_v23 }
  0x4c   :  { %570 = vmatprep.mubr.bf16.mxu0 %v5365_v2 }
  0x4e   :  { %2930 = vperm.xlu1 %5232, %v2894_v35   ;;  %2925 = vperm.xlu0 %5231, %v2893_v36  }
  0x52   :  { %2940 = vperm.xlu1 %5232, %v2896_v38   ;;  %2935 = vperm.xlu0 %5231, %v2895_v39  }
  0x53   :  { %4291 = vmatmul.mubr.msk.bf16.gmra.mxu0 %vm177_vm0, %v475_v30 }
  0x54   :  { %580 = vmatprep.mubr.bf16.mxu0 %v5365_v2 }
  0x56   :  { %2950 = vperm.xlu1 %5232, %v2898_v42   ;;  %2945 = vperm.xlu0 %5231, %v2897_v43  }
  0x5a   :  { %2960 = vperm.xlu1 %5232, %v2900_v45   ;;  %2955 = vperm.xlu0 %5231, %v2899_v46  }
  0x5b   :  { %4292 = vmatmul.mubr.msk.bf16.gmra.mxu0 %vm177_vm0, %v476_v37 }
  0x5c   :  { %590 = vmatprep.mubr.bf16.mxu0 %v5365_v2 }
  0x5e   :  { %2970 = vperm.xlu1 %5232, %v2902_v49   ;;  %2965 = vperm.xlu0 %5231, %v2901_v50  }
  0x63   :  { %4293 = vmatmul.mubr.msk.bf16.gmra.mxu0 %vm177_vm0, %v477_v44 }
  0x64   :  { %600 = vmatprep.mubr.bf16.mxu0 %v5365_v2 }
  0x65   :  { %21 = vsyncpa [#allocation6], 0  ;;  %v470_v52 = vld [vmem:[%s7073_s27 + $0x62] sm:$0xff]  ;;  %v471_v53 = vld [vmem:[%s7073_s27 + $0x6a] sm:$0xff]  ;;  %v5366_v5 = vmov 0.0   ;;  %vm761_vm1 = vcmask 1046528  }
  0x66   :  { %v479_v54 = vpack.c.bf16 %v471_v53, %v470_v52  ;;  %v472_v55 = vld [vmem:[%s7073_s27 + $0x72] sm:$0x3f]  ;;  %v5242_v56 = vld [vmem:[%s7057_s3 + $0xf8] sm:$0xff]   ;;  %v5246_v0 = vld [vmem:[%s7057_s3 + $0xe8] sm:$0xff]   ;;  %55 = vst [vmem:[#allocation2 + $0xb0] sm:$0xff] %v5366_v5  ;;  %vm1030_vm2 = vcmask 1040384  }
  0x67   :  { %4583 = vmatprep.subr.bf16.mxu1 %v5242_v56  ;;  %v5243_v57 = vld [vmem:[%s7057_s3 + $0xb8] sm:$0xff]   ;;  %v480_v58 = vpack.c.bf16 %v472_v55, %v472_v55  ;;  %v5245_v59 = vld [vmem:[%s7057_s3 + $0xb0] sm:$0xff]   ;;  %v5254_v1 = vld [vmem:[%s7057_s3 + $0x68] sm:$0xff]   ;;  %56 = vst [vmem:[#allocation2] sm:$0xff] %v5366_v5  ;;  %vm1760_vm3 = vcmask 1045504   ;;  %vm5367_vm4 = vmmov 0  }
  0x68   :  { %4584 = vmatpush3.bf16.msra.mxu1 %v5243_v57  ;;  %v5248_v60 = vld [vmem:[%s7057_s3 + $0x78] sm:$0xff]   ;;  %v5252_v62 = vld [vmem:[%s7057_s3 + $0x70] sm:$0xff]   ;;  %v5247_v3 = vld [vmem:[%s7057_s3 + $0xa8] sm:$0xff]   ;;  %83 = vst [vmem:[#allocation2 + $0xe0] sm:$0xff] %v5366_v5  ;;  %vm100_vm5 = vcmask 523264   ;;  %vm2833_vm6 = vcmask 1043456  }
  0x69   :  { %v5249_v61 = vld [vmem:[%s7057_s3 + $0x38] sm:$0xff]   ;;  %4647 = vmatprep.subr.bf16.mxu0 %v5248_v60  ;;  %v5253_v63 = vld [vmem:[%s7057_s3 + $0x30] sm:$0xff]   ;;  %v5255_v4 = vld [vmem:[%s7057_s3 + $0x28] sm:$0xff]   ;;  %84 = vst [vmem:[#allocation2 + $0x20] sm:$0xff] %v5366_v5  ;;  %vm3000_vm7 = vcmask 519168   ;;  %vm3564_vm8 = vcmask 261120  }
  0x6a   :  { %4648 = vmatpush3.bf16.msra.mxu0 %v5249_v61  ;;  %85 = vst [vmem:[#allocation3] sm:$0xff] %v5366_v5  ;;  %86 = vst [vmem:[#allocation3 + $0x8] sm:$0xff] %v5366_v5  ;;  %v5258_v6 = vld [vmem:[%s7057_s3 + $0x60] sm:$0xff]   ;;  %v5260_v8 = vld [vmem:[%s7057_s3 + $0x58] sm:$0xff]   ;;  %vm4246_vm9 = vcmask 24576   ;;  %s5368_s18 = smov [#allocation5]  }
  0x6b   :  { %4294 = vmatmul.mubr.msk.bf16.gmra.mxu0 %vm177_vm0, %v478_v51  ;;  %4649 = vmatprep.subr.bf16.mxu0 %v5252_v62  ;;  %87 = vst [vmem:[#allocation3 + $0x10] sm:$0xff] %v5366_v5  ;;  %88 = vst [vmem:[#allocation3 + $0x18] sm:$0xff] %v5366_v5  ;;  %v5259_v7 = vld [vmem:[%s7057_s3 + $0x20] sm:$0xff]   ;;  %v5261_v9 = vld [vmem:[%s7057_s3 + $0x18] sm:$0xff]   ;;  %s4255_s19 = sshll.u32 %s5368_s18, 4  ;;  %s4256_s19 = int_to_ptr.vmem [resolvable:$true] %s4255_s19 }
  0x6c   :  { %610 = vmatprep.mubr.bf16.mxu0 %v5365_v2  ;;  %89 = vst [vmem:[#allocation3 + $0x20] sm:$0xff] %v5366_v5  ;;  %90 = vst [vmem:[#allocation3 + $0x28] sm:$0xff] %v5366_v5  ;;  %v5250_v10 = vld [vmem:[%s7057_s3 + $0xe0] sm:$0xff]   ;;  %v5264_v12 = vld [vmem:[%s7057_s3 + $0x50] sm:$0xff]   ;;  %s5343_s20 = scalar_lea.vmem %s4256_s19, 32  ;;  %p5348_p1 = scmp.lt.s32.totalorder %s4256_s19, %s4256_s19 }
  0x6d   :  { %91 = vst [vmem:[#allocation3 + $0x30] sm:$0xff] %v5366_v5  ;;  %92 = vst [vmem:[#allocation3 + $0x38] sm:$0xff] %v5366_v5  ;;  %v5251_v11 = vld [vmem:[%s7057_s3 + $0xa0] sm:$0xff]   ;;  %v5265_v13 = vld [vmem:[%s7057_s3 + $0x10] sm:$0xff]   ;;  %p5344_p0 = scmp.ne.s32.totalorder %s4256_s19, %s5343_s20  ;;  %p5349_p2 = scmp.lt.s32.totalorder %s5343_s20, %s5343_s20 }
  0x6e   :  { %4650 = vmatpush3.bf16.msra.mxu0 %v5253_v63  ;;  %93 = vst [vmem:[#allocation3 + $0x40] sm:$0xff] %v5366_v5  ;;  %94 = vst [vmem:[#allocation3 + $0x48] sm:$0xff] %v5366_v5  ;;  %v5256_v14 = vld [vmem:[%s7057_s3 + $0xd8] sm:$0xff]   ;;  %v5266_v16 = vld [vmem:[%s7057_s3 + $0x48] sm:$0xff]  }
  0x6f   :  { %95 = vst [vmem:[#allocation3 + $0x50] sm:$0xff] %v5366_v5  ;;  %96 = vst [vmem:[#allocation3 + $0x58] sm:$0xff] %v5366_v5  ;;  %4651 = vmatprep.subr.bf16.mxu0 %v5254_v1  ;;  %v5257_v15 = vld [vmem:[%s7057_s3 + $0x98] sm:$0xff]   ;;  %v5267_v17 = vld [vmem:[%s7057_s3 + $0x8] sm:$0xff]   ;;  %p5350_p3 = por %p5349_p2, %p5348_p1 }
  0x70   :  { %97 = vst [vmem:[#allocation3 + $0x60] sm:$0xff] %v5366_v5  ;;  %98 = vst [vmem:[#allocation3 + $0x68] sm:$0xff] %v5366_v5  ;;  %v5262_v18 = vld [vmem:[%s7057_s3 + $0xd0] sm:$0xff]   ;;  %v5270_v20 = vld [vmem:[%s7057_s3 + $0x40] sm:$0xff]  }
  0x71   :  { %99 = vst [vmem:[#allocation3 + $0x70] sm:$0xff] %v5366_v5  ;;  %v5263_v19 = vld [vmem:[%s7057_s3 + $0x90] sm:$0xff]   ;;  %v5271_v21 = vld [vmem:[%s7057_s3] sm:$0xff]   ;;  %v5268_v22 = vld [vmem:[%s7057_s3 + $0xc8] sm:$0xff]   ;;  %p5351_p4 = pnand %p5350_p3, %p5344_p0 }
  0x72   :  { %4652 = vmatpush3.bf16.msra.mxu0 %v5255_v4  ;;  %v5269_v23 = vld [vmem:[%s7057_s3 + $0x88] sm:$0xff]   ;;  %v5272_v24 = vld [vmem:[%s7057_s3 + $0xc0] sm:$0xff]   ;;  %v5274_v26 = vld [vmem:[%s7057_s3 + $0x178] sm:$0xff]  }
  0x73   :  { %4295 = vmatmul.mubr.msk.bf16.gmra.mxu0 %vm177_vm0, %v479_v54  ;;  %4653 = vmatprep.subr.bf16.mxu0 %v5258_v6  ;;  %v5273_v25 = vld [vmem:[%s7057_s3 + $0x80] sm:$0xff]  }
  0x74   :  { %620 = vmatprep.mubr.bf16.mxu0 %v5365_v2  ;;  %v5244_v2 = vld [vmem:[%s7057_s3 + $0xf0] sm:$0xff]  }
  0x75   :  { %4585 = vmatprep.subr.bf16.mxu1 %v5244_v2 }
  0x76   :  { %4586 = vmatpush3.bf16.msra.mxu1 %v5245_v59  ;;  %4654 = vmatpush3.bf16.msra.mxu0 %v5259_v7  ;;  %v661_v7 = vlaneseq }
  0x77   :  { %4587 = vmatprep.subr.bf16.mxu1 %v5246_v0  ;;  %4655 = vmatprep.subr.bf16.mxu0 %v5260_v8 }
  0x7a   :  { %4588 = vmatpush3.bf16.msra.mxu1 %v5247_v3  ;;  %4656 = vmatpush3.bf16.msra.mxu0 %v5261_v9 }
  0x7b   :  { %4296 = vmatmul.mubr.msk.bf16.gmra.mxu0 %vm177_vm0, %v480_v58  ;;  %4589 = vmatprep.subr.bf16.mxu1 %v5250_v10 }
  0x7c   :  { %4657 = vmatprep.subr.bf16.mxu0 %v5264_v12  ;;  %v662_v12 = vshrl.u32 %v661_v7, 7 }
  0x7e   :  { %4590 = vmatpush3.bf16.msra.mxu1 %v5251_v11  ;;  %4658 = vmatpush3.bf16.msra.mxu0 %v5265_v13 }
  0x7f   :  { %4591 = vmatprep.subr.bf16.mxu1 %v5256_v14  ;;  %4659 = vmatprep.subr.bf16.mxu0 %v5266_v16 }
  0x82   :  { %4592 = vmatpush3.bf16.msra.mxu1 %v5257_v15  ;;  %4660 = vmatpush3.bf16.msra.mxu0 %v5267_v17  ;;  %v663_v17 = vsub.s32 0, %v662_v12 }
  0x83   :  { %4593 = vmatprep.subr.bf16.mxu1 %v5262_v18  ;;  %4661 = vmatprep.subr.bf16.mxu0 %v5270_v20  ;;  %v659_v20 = vld [vmem:[%s7056_s2] sm:$0x3] }
  0x86   :  { %4594 = vmatpush3.bf16.msra.mxu1 %v5263_v19  ;;  %4662 = vmatpush3.bf16.msra.mxu0 %v5271_v21 }
  0x87   :  { %4897 = vmatprep.subr.bf16.mxu0 %v5366_v5  ;;  %4595 = vmatprep.subr.bf16.mxu1 %v5268_v22 }
  0x8a   :  { %4596 = vmatpush3.bf16.msra.mxu1 %v5269_v23  ;;  %v667_v23 = vsub.s32 1, %v662_v12 }
  0x8b   :  { %4597 = vmatprep.subr.bf16.mxu1 %v5272_v24 }
  0x8e   :  { %4598 = vmatpush3.bf16.msra.mxu1 %v5273_v25  ;;  %v5935_v25 = vrot.slane %v659_v20, %v663_v17 }
  0x8f   :  { %4711 = vmatprep.subr.bf16.mxu1 %v5274_v26 }
  0xcb   :  { %v236_v27 = vpop.f32.mrf.mxu0  ;;  %v5888_v28 = vpop.f32.mrf.mxu1 }
  0xcc   :  { %7074 = vst [vmem:[#allocation8_spill] sm:$0xff] %v5888_v28 }
  0xcd   :  { %v5890_v29 = vpop.f32.mrf.mxu0  ;;  %v5892_v30 = vpop.f32.mrf.mxu1 }
  0xce   :  { %7075 = vst [vmem:[#allocation9_spill] sm:$0xff] %v5892_v30 }
  0xcf   :  { %v5894_v31 = vpop.f32.mrf.mxu0  ;;  %v310_v32 = vpop.f32.mrf.mxu1 }
  0xd1   :  { %v5896_v33 = vpop.f32.mrf.mxu0  ;;  %v311_v34 = vpop.f32.mrf.mxu1 }
  0xd3   :  { %v5898_v35 = vpop.f32.mrf.mxu0  ;;  %v381_v36 = vpop.f32.mrf.mxu1 }
  0xd4   :  { %v382_v24 = vadd.f32 %v381_v36, %v236_v27 }
  0xd5   :  { %v5900_v37 = vpop.f32.mrf.mxu0  ;;  %v383_v38 = vpop.f32.mrf.mxu1 }
  0xd6   :  { %v384_v34 = vadd.f32 %v383_v38, %v5890_v29 }
  0xd7   :  { %v5902_v39 = vpop.f32.mrf.mxu0  ;;  %v385_v40 = vpop.f32.mrf.mxu1 }
  0xd9   :  { %v5904_v41 = vpop.f32.mrf.mxu0  ;;  %v387_v42 = vpop.f32.mrf.mxu1 }
  0xdb   :  { %v5906_v43 = vpop.f32.mrf.mxu0  ;;  %v391_v44 = vpop.f32.mrf.mxu1 }
  0xdc   :  { %v392_v27 = vadd.f32 %v391_v44, %v5898_v35 }
  0xdd   :  { %v5908_v45 = vpop.f32.mrf.mxu0  ;;  %v393_v46 = vpop.f32.mrf.mxu1 }
  0xde   :  { %v394_v36 = vadd.f32 %v393_v46, %v5900_v37 }
  0xdf   :  { %v5910_v47 = vpop.f32.mrf.mxu0  ;;  %v395_v48 = vpop.f32.mrf.mxu1 }
  0xe0   :  { %v396_v17 = vadd.f32 %v395_v48, %v5902_v39 }
  0xe1   :  { %v5912_v49 = vpop.f32.mrf.mxu0  ;;  %v397_v50 = vpop.f32.mrf.mxu1 }
  0xe2   :  { %v398_v29 = vadd.f32 %v397_v50, %v5904_v41 }
  0xe3   :  { %v266_v51 = vpop.f32.mrf.mxu0  ;;  %v401_v52 = vpop.f32.mrf.mxu1 }
  0xe5   :  { %v268_v53 = vpop.f32.mrf.mxu0  ;;  %v403_v54 = vpop.f32.mrf.mxu1 }
  0xe7   :  { %v5914_v55 = vpop.f32.mrf.mxu0  ;;  %v405_v56 = vpop.f32.mrf.mxu1 }
  0xe9   :  { %v272_v57 = vpop.f32.mrf.mxu0  ;;  %v407_v58 = vpop.f32.mrf.mxu1 }
  0xea   :  { %v5957_v35 = vadd.f32 %v407_v58, %v5912_v49 }
  0xeb   :  { %v5916_v2 = vpop.f32.mrf.mxu0  ;;  %v411_v59 = vpop.f32.mrf.mxu1 }
  0xec   :  { %v5959_v37 = vadd.f32 %v411_v59, %v266_v51 }
  0xed   :  { %v278_v60 = vpop.f32.mrf.mxu0  ;;  %v413_v61 = vpop.f32.mrf.mxu1 }
  0xee   :  { %v5961_v39 = vadd.f32 %v413_v61, %v268_v53 }
  0xef   :  { %v280_v62 = vpop.f32.mrf.mxu0  ;;  %v415_v63 = vpop.f32.mrf.mxu1 }
  0xf1   :  { %v5918_v0 = vpop.f32.mrf.mxu0  ;;  %v417_v1 = vpop.f32.mrf.mxu1 }
  0xf2   :  { %v5967_v44 = vadd.f32 %v417_v1, %v272_v57 }
  0xf3   :  { %v286_v3 = vpop.f32.mrf.mxu0  ;;  %v421_v4 = vpop.f32.mrf.mxu1 }
  0xf5   :  { %v5920_v5 = vpop.f32.mrf.mxu0  ;;  %v423_v6 = vpop.f32.mrf.mxu1 }
  0xf6   :  { %v5973_v48 = vadd.f32 %v423_v6, %v278_v60 }
  0xf7   :  { %v290_v8 = vpop.f32.mrf.mxu0  ;;  %v425_v9 = vpop.f32.mrf.mxu1 }
  0xf8   :  { %v5975_v49 = vadd.f32 %v425_v9, %v280_v62 }
  0xf9   :  { %v5922_v10 = vpop.f32.mrf.mxu0  ;;  %v427_v11 = vpop.f32.mrf.mxu1 }
  0xfa   :  { %v5978_v53 = vadd.f32 %v427_v11, %v5918_v0 }
  0xfb   :  { %v5924_v13 = vpop.f32.mrf.mxu0  ;;  %v431_v14 = vpop.f32.mrf.mxu1 }
  0xfc   :  { %7076 = vst [vmem:[#allocation10_spill] sm:$0xff] %v5924_v13  ;;  %v388_v13 = vadd.f32 %v387_v42, %v5896_v33  ;;  %v5954_v33 = vadd.f32 %v405_v56, %v5910_v47  ;;  %v5971_v47 = vadd.f32 %v421_v4, %v5916_v2 }
  0xfd   :  { %v5926_v15 = vpop.f32.mrf.mxu0  ;;  %v433_v16 = vpop.f32.mrf.mxu1 }
  0xfe   :  { %7077 = vst [vmem:[#allocation11_spill] sm:$0xff] %v5926_v15  ;;  %v386_v15 = vadd.f32 %v385_v40, %v5894_v31  ;;  %v5951_v31 = vadd.f32 %v403_v54, %v5908_v45  ;;  %v5980_v54 = vadd.f32 %v431_v14, %v286_v3  ;;  %v5983_v57 = vadd.f32 %v433_v16, %v5920_v5  ;;  %v898_v14 = vpop.permute.xlu0 %897 }
  0xff   :  { %v5928_v18 = vpop.f32.mrf.mxu0  ;;  %v435_v19 = vpop.f32.mrf.mxu1 }
 0x100   :  { %7078 = vst [vmem:[#allocation12_spill] sm:$0xff] %v5928_v18  ;;  %v5938_v18 = vrot.slane %v659_v20, %v667_v23  ;;  %v5948_v20 = vadd.f32 %v401_v52, %v5906_v43  ;;  %v5965_v43 = vadd.f32 %v415_v63, %v5914_v55  ;;  %v5985_v58 = vadd.f32 %v435_v19, %v290_v8 }
 0x101   :  { %v5933_v21 = vpop.f32.mrf.mxu0  ;;  %v437_v22 = vpop.f32.mrf.mxu1 }
 0x102   :  { %7079 = vst [vmem:[#allocation13_spill] sm:$0xff] %v5933_v21  ;;  %v5992_v3 = vadd.f32 %v437_v22, %v5922_v10 }
 0x103   :  { %v441_v26 = vpop.f32.mrf.mxu1  ;;  %v552_v32 = vpop.f32.mrf.mxu0  ;;  %v7080_v4 = vld [vmem:[#allocation10_spill] sm:$0xff] }
 0x104   :  { %v629_v7 = vadd.f32 %v552_v32, %v382_v24  ;;  %v5995_v6 = vadd.f32 %v441_v26, %v7080_v4 }
 0x105   :  { %v443_v30 = vpop.f32.mrf.mxu1  ;;  %v554_v28 = vpop.f32.mrf.mxu0  ;;  %v7081_v5 = vld [vmem:[#allocation11_spill] sm:$0xff] }
 0x106   :  { %v671_v21 = vadd.f32 %v5935_v25, %v629_v7  ;;  %v630_v12 = vadd.f32 %v554_v28, %v384_v34  ;;  %v5998_v8 = vadd.f32 %v443_v30, %v7081_v5 }
 0x107   :  { %v445_v38 = vpop.f32.mrf.mxu1  ;;  %v556_v24 = vpop.f32.mrf.mxu0  ;;  %v7082_v10 = vld [vmem:[#allocation12_spill] sm:$0xff] }
 0x108   :  { %v631_v28 = vadd.f32 %v556_v24, %v386_v15  ;;  %v672_v40 = vadd.f32 %v5938_v18, %v630_v12  ;;  %v701_v45 = vmax.f32 %v671_v21, 0.0  ;;  %v6003_v22 = vadd.f32 %v445_v38, %v7082_v10 }
 0x109   :  { %v447_v41 = vpop.f32.mrf.mxu1  ;;  %v558_v42 = vpop.f32.mrf.mxu0 }
 0x10a   :  { %v673_v46 = vadd.f32 %v5935_v25, %v631_v28  ;;  %v632_v50 = vadd.f32 %v558_v42, %v388_v13  ;;  %v702_v2 = vmax.f32 %v672_v40, 0.0  ;;  %v762_v62 = vrot.slane %v701_v45, 1  ;;  %v7083_v28 = vld [vmem:[#allocation13_spill] sm:$0xff] }
 0x10b   :  { %v451_v51 = vpop.f32.mrf.mxu1  ;;  %v562_v52 = vpop.f32.mrf.mxu0  ;;  %v6007_v40 = vadd.f32 %v447_v41, %v7083_v28 }
 0x10c   :  { %v703_v55 = vmax.f32 %v673_v46, 0.0  ;;  %v633_v56 = vadd.f32 %v562_v52, %v392_v27  ;;  %v674_v59 = vadd.f32 %v5938_v18, %v632_v50  ;;  %v765_v23 = vrot.slane %v702_v2, 1  ;;  %v903_v41 = vpop.permute.xlu0 %902 }
 0x10d   :  { %v5988_v60 = vpop.f32.mrf.mxu1  ;;  %v564_v61 = vpop.f32.mrf.mxu0 }
 0x10e   :  { %v763_v63 = vrot.slane %v703_v55, 1  ;;  %v675_v0 = vadd.f32 %v5935_v25, %v633_v56  ;;  %v634_v1 = vadd.f32 %v564_v61, %v394_v36  ;;  %v704_v9 = vmax.f32 %v674_v59, 0.0 }
 0x10f   :  { %v566_v11 = vpop.f32.mrf.mxu0  ;;  %v455_v13 = vpop.f32.mrf.mxu1 }
 0x110   :  { %v764_v15 = vsel %vm761_vm1, %v762_v62, %v763_v63  ;;  %v705_v16 = vmax.f32 %v675_v0, 0.0  ;;  %v676_v19 = vadd.f32 %v5938_v18, %v634_v1  ;;  %v635_v21 = vadd.f32 %v566_v11, %v396_v17  ;;  %v7084_v17 = vld [vmem:[#allocation8_spill] sm:$0xff] }
 0x111   :  { %v850_v26 = vmax.f32 %v701_v45, %v764_v15  ;;  %v766_v32 = vrot.slane %v704_v9, 1  ;;  %v568_v34 = vpop.f32.mrf.mxu0  ;;  %v456_v30 = vpop.f32.mrf.mxu1  ;;  %v6011_v46 = vadd.f32 %v451_v51, %v7084_v17 }
 0x112   :  { %v768_v7 = vrot.slane %v705_v16, 1  ;;  %v706_v12 = vmax.f32 %v676_v19, 0.0  ;;  %v677_v27 = vadd.f32 %v5935_v25, %v635_v21  ;;  %v636_v36 = vadd.f32 %v568_v34, %v398_v29 }
 0x113   :  { %v970_v24 = vmul.f32 %v898_v14, %v850_v26  ;;  %v767_v42 = vsel %vm761_vm1, %v765_v23, %v766_v32  ;;  %v572_v38 = vpop.f32.mrf.mxu0 }
 0x114   :  { %v851_v50 = vmax.f32 %v702_v2, %v767_v42  ;;  %v769_v45 = vsel %vm761_vm1, %v763_v63, %v768_v7  ;;  %v770_v52 = vrot.slane %v706_v12, 1  ;;  %v707_v56 = vmax.f32 %v677_v27, 0.0 }
 0x115   :  { %v1031_v59 = vrot.slane %v970_v24, 7  ;;  %v852_v61 = vmax.f32 %v703_v55, %v769_v45  ;;  %v678_v62 = vadd.f32 %v5938_v18, %v636_v36  ;;  %v637_v29 = vadd.f32 %v572_v38, %v5948_v20  ;;  %v574_v0 = vpop.f32.mrf.mxu0 }
 0x116   :  { %v971_v1 = vmul.f32 %v898_v14, %v851_v50  ;;  %v771_v4 = vsel %vm761_vm1, %v766_v32, %v770_v52  ;;  %v772_v5 = vrot.slane %v707_v56, 1  ;;  %v638_v51 = vadd.f32 %v574_v0, %v5951_v31  ;;  %v908_v31 = vpop.permute.xlu1 %907 }
 0x117   :  { %1119 = vst [vmem:[#allocation2 + $0xb0] sm:$0xfe] %v1031_v59  ;;  %v972_v2 = vmul.f32 %v903_v41, %v852_v61  ;;  %v853_v11 = vmax.f32 %v704_v9, %v771_v4  ;;  %v708_v63 = vmax.f32 %v678_v62, 0.0  ;;  %v679_v13 = vadd.f32 %v5935_v25, %v637_v29  ;;  %v576_v15 = vpop.f32.mrf.mxu0 }
 0x118   :  { %v1032_v55 = vrot.slane %v971_v1, 7  ;;  %v773_v19 = vsel %vm761_vm1, %v768_v7, %v772_v5  ;;  %v680_v20 = vadd.f32 %v5938_v18, %v638_v51  ;;  %v639_v21 = vadd.f32 %v576_v15, %v5954_v33 }
 0x119   :  { %v1033_v14 = vrot.slane %v972_v2, 7  ;;  %v973_v23 = vmul.f32 %v903_v41, %v853_v11  ;;  %v854_v10 = vmax.f32 %v705_v16, %v773_v19  ;;  %v774_v26 = vrot.slane %v708_v63, 1  ;;  %v578_v32 = vpop.f32.mrf.mxu0 }
 0x11a   :  { %1120 = vst [vmem:[#allocation2] sm:$0xfe] %v1032_v55  ;;  %v709_v34 = vmax.f32 %v679_v13, 0.0  ;;  %v710_v9 = vmax.f32 %v680_v20, 0.0  ;;  %v681_v30 = vadd.f32 %v5935_v25, %v639_v21  ;;  %v640_v27 = vadd.f32 %v578_v32, %v5957_v35  ;;  %v913_v2 = vpop.permute.xlu1 %912 }
 0x11b   :  { %v6025_v36 = vsel %vm1030_vm2, %v1031_v59, %v1033_v14  ;;  %v1035_v7 = vrot.slane %v973_v23, 7  ;;  %v974_v24 = vmul.f32 %v908_v31, %v854_v10  ;;  %v775_v33 = vsel %vm761_vm1, %v770_v52, %v774_v26  ;;  %v582_v28 = vpop.f32.mrf.mxu0  ;;  %v918_v23 = vpop.permute.xlu0 %917 }
 0x11c   :  { %v855_v42 = vmax.f32 %v706_v12, %v775_v33  ;;  %v776_v16 = vrot.slane %v709_v34, 1  ;;  %v778_v17 = vrot.slane %v710_v9, 1  ;;  %v711_v38 = vmax.f32 %v681_v30, 0.0 }
 0x11d   :  { %v6029_v50 = vsel %vm1030_vm2, %v1032_v55, %v1035_v7  ;;  %v1037_v45 = vrot.slane %v974_v24, 7  ;;  %v682_v61 = vadd.f32 %v5938_v18, %v640_v27  ;;  %v641_v35 = vadd.f32 %v582_v28, %v5959_v37  ;;  %v584_v62 = vpop.f32.mrf.mxu0 }
 0x11e   :  { %v975_v59 = vmul.f32 %v908_v31, %v855_v42  ;;  %v777_v29 = vsel %vm761_vm1, %v772_v5, %v776_v16  ;;  %v779_v0 = vsel %vm761_vm1, %v774_v26, %v778_v17  ;;  %v780_v52 = vrot.slane %v711_v38, 1 }
 0x11f   :  { %v6036_v12 = vsel %vm1030_vm2, %v1033_v14, %v1037_v45  ;;  %v856_v41 = vmax.f32 %v707_v56, %v777_v29  ;;  %v857_v1 = vmax.f32 %v708_v63, %v779_v0  ;;  %v712_v4 = vmax.f32 %v682_v61, 0.0  ;;  %v586_v51 = vpop.f32.mrf.mxu0 }
 0x120   :  { %v1039_v11 = vrot.slane %v975_v59, 7  ;;  %v781_v13 = vsel %vm761_vm1, %v776_v16, %v780_v52  ;;  %v683_v37 = vadd.f32 %v5935_v25, %v641_v35  ;;  %v642_v15 = vadd.f32 %v584_v62, %v5961_v39 }
 0x121   :  { %v976_v55 = vmul.f32 %v913_v2, %v856_v41  ;;  %v977_v5 = vmul.f32 %v913_v2, %v857_v1  ;;  %v858_v19 = vmax.f32 %v709_v34, %v781_v13  ;;  %v782_v20 = vrot.slane %v712_v4, 1  ;;  %v588_v21 = vpop.f32.mrf.mxu0  ;;  %v923_v41 = vpop.permute.xlu1 %922 }
 0x122   :  { %v6042_v14 = vsel %vm1030_vm2, %v1035_v7, %v1039_v11  ;;  %v713_v56 = vmax.f32 %v683_v37, 0.0  ;;  %v684_v63 = vadd.f32 %v5938_v18, %v642_v15  ;;  %v643_v10 = vadd.f32 %v586_v51, %v5965_v43  ;;  %v1150_v15 = vld [vmem:[#allocation2] sm:$0xff] }
 0x123   :  { %v1041_v26 = vrot.slane %v976_v55, 7  ;;  %v1043_v32 = vrot.slane %v977_v5, 7  ;;  %v978_v31 = vmul.f32 %v918_v23, %v858_v19  ;;  %v783_v30 = vsel %vm761_vm1, %v778_v17, %v782_v20  ;;  %v592_v39 = vpop.f32.mrf.mxu0 }
 0x124   :  { %v859_v27 = vmax.f32 %v710_v9, %v783_v30  ;;  %v784_v24 = vrot.slane %v713_v56, 1  ;;  %v714_v34 = vmax.f32 %v684_v63, 0.0  ;;  %v685_v33 = vadd.f32 %v5935_v25, %v643_v10  ;;  %v928_v63 = vpop.permute.xlu0 %927  ;;  %v1149_v30 = vld [vmem:[#allocation2 + $0xb0] sm:$0xff] }
 0x125   :  { %v6049_v28 = vsel %vm1030_vm2, %v1037_v45, %v1041_v26  ;;  %v6052_v7 = vsel %vm1030_vm2, %v1039_v11, %v1043_v32  ;;  %v1045_v42 = vrot.slane %v978_v31, 7  ;;  %v644_v43 = vadd.f32 %v588_v21, %v5967_v44  ;;  %v594_v16 = vpop.f32.mrf.mxu0 }
 0x126   :  { %v979_v61 = vmul.f32 %v918_v23, %v859_v27  ;;  %v785_v35 = vsel %vm761_vm1, %v780_v52, %v784_v24  ;;  %v786_v17 = vrot.slane %v714_v34, 1  ;;  %v715_v62 = vmax.f32 %v685_v33, 0.0 }
 0x127   :  { %v6057_v9 = vsel %vm1030_vm2, %v1041_v26, %v1045_v42  ;;  %v860_v59 = vmax.f32 %v711_v38, %v785_v35  ;;  %v686_v29 = vadd.f32 %v5938_v18, %v644_v43  ;;  %v645_v45 = vadd.f32 %v592_v39, %v5971_v47  ;;  %v596_v0 = vpop.f32.mrf.mxu0 }
 0x128   :  { %v1047_v1 = vrot.slane %v979_v61, 7  ;;  %v787_v51 = vsel %vm761_vm1, %v782_v20, %v786_v17  ;;  %v788_v44 = vrot.slane %v715_v62, 1  ;;  %v646_v2 = vadd.f32 %v594_v16, %v5973_v48 }
 0x129   :  { %v980_v11 = vmul.f32 %v923_v41, %v860_v59  ;;  %v861_v52 = vmax.f32 %v712_v4, %v787_v51  ;;  %v716_v13 = vmax.f32 %v686_v29, 0.0  ;;  %v687_v37 = vadd.f32 %v5935_v25, %v645_v45  ;;  %v598_v55 = vpop.f32.mrf.mxu0 }
 0x12a   :  { %v6065_v38 = vsel %vm1030_vm2, %v1043_v32, %v1047_v1  ;;  %v789_v47 = vsel %vm761_vm1, %v784_v24, %v788_v44  ;;  %v6069_v5 = vadd.f32 %v5938_v18, %v646_v2  ;;  %v647_v19 = vadd.f32 %v596_v0, %v5975_v49 }
 0x12b   :  { %v1049_v20 = vrot.slane %v980_v11, 7  ;;  %v981_v21 = vmul.f32 %v923_v41, %v861_v52  ;;  %v862_v48 = vmax.f32 %v713_v56, %v789_v47  ;;  %v790_v23 = vrot.slane %v716_v13, 1  ;;  %v602_v4 = vpop.f32.mrf.mxu0 }
 0x12c   :  { %v717_v10 = vmax.f32 %v687_v37, 0.0  ;;  %v718_v26 = vmax.f32 %v6069_v5, 0.0  ;;  %v6074_v31 = vadd.f32 %v5935_v25, %v647_v19  ;;  %v1180_v32 = vpack.c.bf16 %v6029_v50, %v1150_v15  ;;  %v933_v37 = vpop.permute.xlu1 %932 }
 0x12d   :  { %v6078_v39 = vsel %vm1030_vm2, %v1045_v42, %v1049_v20  ;;  %v1051_v27 = vrot.slane %v981_v21, 7  ;;  %v982_v49 = vmul.f32 %v928_v63, %v862_v48  ;;  %v791_v24 = vsel %vm761_vm1, %v786_v17, %v790_v23  ;;  %v604_v56 = vpop.f32.mrf.mxu0  ;;  %v938_v48 = vpop.permute.xlu0 %937 }
 0x12e   :  { %v863_v33 = vmax.f32 %v714_v34, %v791_v24  ;;  %v792_v43 = vrot.slane %v717_v10, 1  ;;  %v794_v16 = vrot.slane %v718_v26, 1  ;;  %v719_v61 = vmax.f32 %v6074_v31, 0.0  ;;  %1651 = vmatprep.mubr.bf16.mxu0 %v1180_v32 }
 0x12f   :  { %v6083_v35 = vsel %vm1030_vm2, %v1047_v1, %v1051_v27  ;;  %v1053_v59 = vrot.slane %v982_v49, 7  ;;  %v648_v29 = vadd.f32 %v598_v55, %v5978_v53  ;;  %v1179_v42 = vpack.c.bf16 %v6025_v36, %v1149_v30  ;;  %v606_v45 = vpop.f32.mrf.mxu0 }
 0x130   :  { %v983_v0 = vmul.f32 %v928_v63, %v863_v33  ;;  %v793_v41 = vsel %vm761_vm1, %v788_v44, %v792_v43  ;;  %v795_v17 = vsel %vm761_vm1, %v790_v23, %v794_v16  ;;  %v796_v34 = vrot.slane %v719_v61, 1 }
 0x131   :  { %v6090_v51 = vsel %vm1030_vm2, %v1049_v20, %v1053_v59  ;;  %v864_v2 = vmax.f32 %v715_v62, %v793_v41  ;;  %v865_v11 = vmax.f32 %v716_v13, %v795_v17  ;;  %v690_v1 = vadd.f32 %v5938_v18, %v648_v29  ;;  %1652 = vmatmul.mubr.bf16.vlgmr.msra.gmra.mxu0 %v1179_v42  ;;  %v608_v52 = vpop.f32.mrf.mxu0 }
 0x132   :  { %v1055_v53 = vrot.slane %v983_v0, 7  ;;  %v797_v15 = vsel %vm761_vm1, %v792_v43, %v796_v34  ;;  %v649_v55 = vadd.f32 %v602_v4, %v5980_v54  ;;  %v650_v44 = vadd.f32 %v604_v56, %v5983_v57 }
 0x133   :  { %v984_v47 = vmul.f32 %v933_v37, %v864_v2  ;;  %v985_v5 = vmul.f32 %v933_v37, %v865_v11  ;;  %v866_v19 = vmax.f32 %v717_v10, %v797_v15  ;;  %v720_v21 = vmax.f32 %v690_v1, 0.0  ;;  %v612_v20 = vpop.f32.mrf.mxu0  ;;  %v7085_v1 = vld [vmem:[#allocation9_spill] sm:$0xff] }
 0x134   :  { %v6097_v62 = vsel %vm1030_vm2, %v1051_v27, %v1055_v53  ;;  %v691_v13 = vadd.f32 %v5935_v25, %v649_v55  ;;  %v6101_v23 = vadd.f32 %v5938_v18, %v650_v44  ;;  %v651_v63 = vadd.f32 %v606_v45, %v5985_v58 }
 0x135   :  { %v1057_v31 = vrot.slane %v984_v47, 7  ;;  %v1059_v54 = vrot.slane %v985_v5, 7  ;;  %v986_v4 = vmul.f32 %v938_v48, %v866_v19  ;;  %v798_v57 = vrot.slane %v720_v21, 1  ;;  %v614_v32 = vpop.f32.mrf.mxu0  ;;  %v1227_v19 = vld [vmem:[#allocation2 + $0xb0] sm:$0xfc] }
 0x136   :  { %v721_v30 = vmax.f32 %v691_v13, 0.0  ;;  %v722_v10 = vmax.f32 %v6101_v23, 0.0  ;;  %v6106_v49 = vadd.f32 %v5935_v25, %v651_v63  ;;  %v6110_v27 = vpack.c.bf16 %v6052_v7, %v6042_v14 }
 0x137   :  { %v6113_v24 = vsel %vm1030_vm2, %v1053_v59, %v1057_v31  ;;  %v6116_v58 = vsel %vm1030_vm2, %v1055_v53, %v1059_v54  ;;  %v1061_v56 = vrot.slane %v986_v4, 7  ;;  %v799_v33 = vsel %vm761_vm1, %v794_v16, %v798_v57  ;;  %v616_v43 = vpop.f32.mrf.mxu0 }
 0x138   :  { %v867_v29 = vmax.f32 %v718_v26, %v799_v33  ;;  %v800_v42 = vrot.slane %v721_v30, 1  ;;  %v802_v45 = vrot.slane %v722_v10, 1  ;;  %v723_v0 = vmax.f32 %v6106_v49, 0.0  ;;  %1659 = vmatprep.mubr.bf16.mxu0 %v6110_v27 }
 0x139   :  { %v6122_v14 = vsel %vm1030_vm2, %v1057_v31, %v1061_v56  ;;  %v652_v7 = vadd.f32 %v608_v52, %v5992_v3  ;;  %v6127_v59 = vpack.c.bf16 %v6049_v28, %v6036_v12  ;;  %v653_v41 = vadd.f32 %v612_v20, %v5995_v6  ;;  %v618_v16 = vpop.f32.mrf.mxu0  ;;  %v1228_v12 = vld [vmem:[#allocation2] sm:$0xfc]  ;;  %v943_v28 = vpop.permute.xlu1 %942 }
 0x13a   :  { %v987_v17 = vmul.f32 %v938_v48, %v867_v29  ;;  %v801_v26 = vsel %vm761_vm1, %v796_v34, %v800_v42  ;;  %v803_v2 = vsel %vm761_vm1, %v798_v57, %v802_v45  ;;  %v804_v11 = vrot.slane %v723_v0, 1  ;;  %v948_v20 = vpop.permute.xlu0 %947 }
 0x13b   :  { %v6134_v37 = vadd.f32 %v5988_v60, %v7085_v1  ;;  %v868_v53 = vmax.f32 %v719_v61, %v801_v26  ;;  %v869_v15 = vmax.f32 %v720_v21, %v803_v2  ;;  %v6137_v3 = vadd.f32 %v5938_v18, %v652_v7  ;;  %1660 = vmatmul.mubr.bf16.gmra.mxu0 %v6127_v59  ;;  %v622_v6 = vpop.f32.mrf.mxu0 }
 0x13c   :  { %v1063_v52 = vrot.slane %v987_v17, 7  ;;  %v805_v34 = vsel %vm761_vm1, %v800_v42, %v804_v11  ;;  %v1286_v55 = vrot.slane %v6127_v59, 1  ;;  %v6143_v44 = vadd.f32 %v5935_v25, %v653_v41 }
 0x13d   :  { %v988_v60 = vmul.f32 %v943_v28, %v868_v53  ;;  %v989_v47 = vmul.f32 %v943_v28, %v869_v15  ;;  %v870_v61 = vmax.f32 %v721_v30, %v805_v34  ;;  %v724_v5 = vmax.f32 %v6137_v3, 0.0  ;;  %v6146_v21 = vpop.f32.mrf.mxu0  ;;  %v5275_v28 = vld [vmem:[%s7057_s3 + $0x138] sm:$0xff]  }
 0x13e   :  { %v6149_v48 = vsel %vm1030_vm2, %v1059_v54, %v1063_v52  ;;  %v725_v13 = vmax.f32 %v6143_v44, 0.0  ;;  %v1232_v23 = vpack.c.bf16 %v6029_v50, %v1228_v12  ;;  %v1289_v63 = vrot.slane %v6110_v27, 1  ;;  %v5281_v44 = vld [vmem:[%s7057_s3 + $0x120] sm:$0xff]  }
 0x13f   :  { %v1065_v31 = vrot.slane %v988_v60, 7  ;;  %v1067_v4 = vrot.slane %v989_v47, 7  ;;  %v990_v57 = vmul.f32 %v948_v20, %v870_v61  ;;  %v806_v30 = vrot.slane %v724_v5, 1  ;;  %v626_v49 = vpop.f32.mrf.mxu0 }
 0x140   :  { %v808_v33 = vrot.slane %v725_v13, 1  ;;  %v1288_v29 = vrot.slane %v1232_v23, 1  ;;  %v1231_v54 = vpack.c.bf16 %v6025_v36, %v1227_v19  ;;  %v654_v42 = vadd.f32 %v614_v32, %v5998_v8 }
 0x141   :  { %v6161_v7 = vsel %vm1030_vm2, %v1061_v56, %v1065_v31  ;;  %v1068_v41 = vsel %vm1030_vm2, %v1063_v52, %v1067_v4  ;;  %v1069_v17 = vrot.slane %v990_v57, 7  ;;  %v807_v26 = vsel %vm761_vm1, %v802_v45, %v806_v30  ;;  %v627_v2 = vpop.f32.mrf.mxu0 }
 0x142   :  { %v871_v1 = vmax.f32 %v722_v10, %v807_v26  ;;  %v809_v53 = vsel %vm761_vm1, %v804_v11, %v808_v33  ;;  %v1290_v15 = vsel %vm761_vm1, %v1288_v29, %v1289_v63  ;;  %v1285_v12 = vrot.slane %v1231_v54, 1  ;;  %v5276_v10 = vld [vmem:[%s7057_s3 + $0x170] sm:$0xff]   ;;  %v953_v11 = vpop.permute.xlu1 %952  ;;  %v958_v29 = vpop.permute.xlu0 %957 }
 0x143   :  { %v6171_v8 = vsel %vm1030_vm2, %v1065_v31, %v1069_v17  ;;  %v872_v32 = vmax.f32 %v723_v0, %v809_v53  ;;  %1459 = vmatprep.mubr.bf16.mxu1 %v1290_v15  ;;  %v696_v56 = vadd.f32 %v5938_v18, %v654_v42  ;;  %v655_v45 = vadd.f32 %v616_v43, %v6003_v22  ;;  %v5278_v31 = vld [vmem:[%s7057_s3 + $0x168] sm:$0xff]  }
 0x144   :  { %v6178_v52 = vmul.f32 %v948_v20, %v871_v1  ;;  %v1287_v34 = vsel %vm761_vm1, %v1285_v12, %v1286_v55  ;;  %v6185_v60 = vpack.c.bf16 %v6083_v35, %v6065_v38  ;;  %v656_v0 = vadd.f32 %v618_v16, %v6007_v40  ;;  %v5277_v16 = vld [vmem:[%s7057_s3 + $0x130] sm:$0xff]  }
 0x145   :  { %v6188_v47 = vmul.f32 %v953_v11, %v872_v32  ;;  %1460 = vmatmul.mubr.bf16.vlgmr.msra.gmra.mxu1 %v1287_v34  ;;  %v726_v22 = vmax.f32 %v696_v56, 0.0  ;;  %v697_v43 = vadd.f32 %v5935_v25, %v655_v45  ;;  %v6193_v61 = vpack.c.bf16 %v6078_v39, %v6057_v9  ;;  %v5282_v45 = vld [vmem:[%s7057_s3 + $0x158] sm:$0xff]  }
 0x146   :  { %v1071_v19 = vrot.slane %v6178_v52, 7  ;;  %4712 = vmatpush3.bf16.msra.mxu1 %v5275_v28  ;;  %1667 = vmatprep.mubr.bf16.mxu0 %v6185_v60  ;;  %v6198_v38 = vadd.f32 %v5938_v18, %v656_v0  ;;  %v657_v40 = vadd.f32 %v622_v6, %v6011_v46  ;;  %v1293_v35 = vrot.slane %v6185_v60, 1 }
 0x147   :  { %v1073_v20 = vrot.slane %v6188_v47, 7  ;;  %v810_v9 = vrot.slane %v726_v22, 1  ;;  %v727_v39 = vmax.f32 %v697_v43, 0.0  ;;  %1668 = vmatmul.mubr.bf16.gmra.mxu0 %v6193_v61  ;;  %v1291_v23 = vrot.slane %v6193_v61, 1  ;;  %4713 = vmatprep.subr.bf16.mxu1 %v5276_v10  ;;  %v963_v10 = vpop.permute.xlu1 %962  ;;  %v5284_v47 = vld [vmem:[%s7057_s3 + $0x150] sm:$0xff]  }
 0x148   :  { %v1072_v46 = vsel %vm1030_vm2, %v1067_v4, %v1071_v19  ;;  %v728_v6 = vmax.f32 %v6198_v38, 0.0  ;;  %v699_v57 = vadd.f32 %v5935_v25, %v657_v40  ;;  %v1294_v49 = vsel %vm761_vm1, %v1289_v63, %v1293_v35 }
 0x149   :  { %v6218_v54 = vsel %vm1030_vm2, %v1069_v17, %v1073_v20  ;;  %v811_v42 = vsel %vm761_vm1, %v806_v30, %v810_v9  ;;  %v812_v26 = vrot.slane %v727_v39, 1  ;;  %1467 = vmatprep.mubr.bf16.mxu1 %v1294_v49  ;;  %v1292_v4 = vsel %vm761_vm1, %v1286_v55, %v1291_v23  ;;  %v5279_v30 = vld [vmem:[%s7057_s3 + $0x128] sm:$0xff]  }
 0x14a   :  { %v873_v25 = vmax.f32 %v724_v5, %v811_v42  ;;  %v814_v63 = vrot.slane %v728_v6, 1  ;;  %v729_v2 = vmax.f32 %v699_v57, 0.0  ;;  %v658_v17 = vadd.f32 %v6146_v21, %v6134_v37  ;;  %4714 = vmatpush3.bf16.msra.mxu1 %v5277_v16  ;;  %v5280_v37 = vld [vmem:[%s7057_s3 + $0x160] sm:$0xff]  }
 0x14b   :  { %v813_v1 = vsel %vm761_vm1, %v808_v33, %v812_v26  ;;  %v6238_v55 = vpack.c.bf16 %v6116_v58, %v6097_v62  ;;  %v6242_v3 = vpack.c.bf16 %v6113_v24, %v6090_v51  ;;  %4715 = vmatprep.subr.bf16.mxu1 %v5278_v31  ;;  %v6245_v5 = vpack.c.bf16 %v1068_v41, %v6149_v48 }
 0x14c   :  { %v993_v21 = vmul.f32 %v953_v11, %v873_v25  ;;  %v874_v33 = vmax.f32 %v725_v13, %v813_v1  ;;  %v815_v53 = vsel %vm761_vm1, %v810_v9, %v814_v63  ;;  %v816_v62 = vrot.slane %v729_v2, 1  ;;  %v968_v13 = vpop.permute.xlu0 %967 }
 0x14d   :  { %v875_v58 = vmax.f32 %v726_v22, %v815_v53  ;;  %1468 = vmatmul.mubr.bf16.gmra.mxu1 %v1292_v4  ;;  %v700_v51 = vadd.f32 %v5938_v18, %v658_v17  ;;  %1675 = vmatprep.mubr.bf16.mxu0 %v6238_v55  ;;  %v1297_v24 = vrot.slane %v6238_v55, 1  ;;  %v1295_v0 = vrot.slane %v6242_v3, 1  ;;  %v1716_v4 = vld [vmem:[#allocation2] sm:$0xf0]  ;;  %v1715_v17 = vld [vmem:[#allocation2 + $0xb0] sm:$0xf0] }
 0x14e   :  { %v1075_v48 = vrot.slane %v993_v21, 7  ;;  %v994_v41 = vmul.f32 %v958_v29, %v874_v33  ;;  %v817_v15 = vsel %vm761_vm1, %v812_v26, %v816_v62  ;;  %v878_v12 = vmax.f32 %v729_v2, %v816_v62  ;;  %4716 = vmatpush3.bf16.msra.mxu1 %v5279_v30  ;;  %v5286_v30 = vld [vmem:[%s7057_s3 + $0x148] sm:$0xff]  }
 0x14f   :  { %v995_v28 = vmul.f32 %v958_v29, %v875_v58  ;;  %v876_v32 = vmax.f32 %v727_v39, %v817_v15  ;;  %v730_v56 = vmax.f32 %v700_v51, 0.0  ;;  %1676 = vmatmul.mubr.bf16.gmra.mxu0 %v6242_v3  ;;  %v1298_v18 = vsel %vm761_vm1, %v1293_v35, %v1297_v24  ;;  %4717 = vmatprep.subr.bf16.mxu1 %v5280_v37 }
 0x150   :  { %v1076_v11 = vsel %vm1030_vm2, %v1071_v19, %v1075_v48  ;;  %v1077_v52 = vrot.slane %v994_v41, 7  ;;  %v998_v34 = vmul.f32 %v968_v13, %v878_v12  ;;  %1475 = vmatprep.mubr.bf16.mxu1 %v1298_v18  ;;  %1683 = vmatprep.mubr.bf16.mxu0 %v6245_v5  ;;  %v1301_v9 = vrot.slane %v6245_v5, 1  ;;  %v5283_v19 = vld [vmem:[%s7057_s3 + $0x118] sm:$0xff]  }
 0x151   :  { %v1079_v22 = vrot.slane %v995_v28, 7  ;;  %v996_v43 = vmul.f32 %v963_v10, %v876_v32  ;;  %v818_v40 = vrot.slane %v730_v56, 1  ;;  %v6272_v39 = vpack.c.bf16 %v1076_v11, %v1072_v46 }
 0x152   :  { %v1078_v35 = vsel %vm1030_vm2, %v1073_v20, %v1077_v52  ;;  %v1085_v16 = vrot.slane %v998_v34, 7  ;;  %4718 = vmatpush3.bf16.msra.mxu1 %v5281_v44  ;;  %v1296_v46 = vsel %vm761_vm1, %v1291_v23, %v1295_v0  ;;  %v6289_v42 = vpack.c.bf16 %v6161_v7, %v6122_v14  ;;  %v5285_v14 = vld [vmem:[%s7057_s3 + $0x110] sm:$0xff]  }
 0x153   :  { %v1080_v31 = vsel %vm1030_vm2, %v1075_v48, %v1079_v22  ;;  %v1081_v57 = vrot.slane %v996_v43, 7  ;;  %v819_v49 = vsel %vm761_vm1, %v814_v63, %v818_v40  ;;  %v879_v29 = vmax.f32 %v730_v56, %v818_v40  ;;  %4719 = vmatprep.subr.bf16.mxu1 %v5282_v45  ;;  %v5289_v56 = vld [vmem:[%s7057_s3 + $0x100] sm:$0xff]  }
 0x154   :  { %v877_v20 = vmax.f32 %v728_v6, %v819_v49  ;;  %v1302_v26 = vsel %vm761_vm1, %v1297_v24, %v1301_v9  ;;  %v1305_v23 = vrot.slane %v6272_v39, 1  ;;  %v1720_v1 = vpack.c.bf16 %v6029_v50, %v1716_v4 }
 0x155   :  { %v1082_v25 = vsel %vm1030_vm2, %v1077_v52, %v1081_v57  ;;  %v1086_v63 = vsel %vm1030_vm2, %v1081_v57, %v1085_v16  ;;  %v999_v2 = vmul.f32 %v968_v13, %v879_v29  ;;  %1476 = vmatmul.mubr.bf16.gmra.mxu1 %v1296_v46  ;;  %v1765_v37 = vrot.slane %v6110_v27, 2 }
 0x156   :  { %1147 = vst [vmem:[#allocation2 + $0xe0] sm:$0x3f] %v1086_v63  ;;  %v997_v38 = vmul.f32 %v963_v10, %v877_v20  ;;  %1483 = vmatprep.mubr.bf16.mxu1 %v1302_v26  ;;  %4720 = vmatpush3.bf16.msra.mxu1 %v5283_v19  ;;  %v6294_v6 = vpack.c.bf16 %v1082_v25, %v1078_v35  ;;  %v1762_v21 = vrot.slane %v6127_v59, 2  ;;  %v1299_v53 = vrot.slane %v6289_v42, 1  ;;  %v5287_v59 = vld [vmem:[%s7057_s3 + $0x108] sm:$0xff]   ;;  %v6348_v19 = vld [vmem:[#allocation3] sm:$0xff] }
 0x157   :  { %v1087_v7 = vrot.slane %v999_v2, 7  ;;  %1684 = vmatmul.mubr.bf16.gmra.mxu0 %v6289_v42  ;;  %4721 = vmatprep.subr.bf16.mxu1 %v5284_v47  ;;  %v1719_v62 = vpack.c.bf16 %v6025_v36, %v1715_v17  ;;  %v1764_v58 = vrot.slane %v1720_v1, 2  ;;  %v1767_v51 = vrot.slane %v6193_v61, 2  ;;  %v5288_v61 = vld [vmem:[%s7057_s3 + $0x140] sm:$0xff]   ;;  %v5290_v1 = vld [vmem:[%s7059_s5 + $0x78] sm:$0xff]   ;;  %101 = vst.msk [vmem:[#allocation4] sm:$0xff] %vm100_vm5, %v6348_v19 }
 0x158   :  { %v1083_v33 = vrot.slane %v997_v38, 7  ;;  %1691 = vmatprep.mubr.bf16.mxu0 %v6272_v39  ;;  %v1189_v50 = vpack.c.bf16 %v6218_v54, %v6171_v8  ;;  %v1306_v36 = vsel %vm761_vm1, %v1301_v9, %v1305_v23  ;;  %v1300_v12 = vsel %vm761_vm1, %v1295_v0, %v1299_v53  ;;  %4898 = vmatpush3.bf16.msra.mxu0 %v5290_v1 }
 0x159   :  { %v1761_v41 = vrot.slane %v1719_v62, 2  ;;  %v1766_v8 = vsel %vm1760_vm3, %v1764_v58, %v1765_v37  ;;  %v1768_v54 = vsel %vm1760_vm3, %v1762_v21, %v1767_v51  ;;  %v1771_v13 = vrot.slane %v6242_v3, 2  ;;  %4899 = vmatprep.subr.bf16.mxu0 %v6348_v19  ;;  %v5293_v62 = vld [vmem:[%s7059_s5 + $0x60] sm:$0xff]   ;;  %v5294_v58 = vld [vmem:[%s7059_s5 + $0x38] sm:$0xff]   ;;  %102 = vst.msk [vmem:[#allocation4 + $0x8] sm:$0xff] %vm100_vm5, %v6348_v19  ;;  %103 = vst.msk [vmem:[#allocation4 + $0x10] sm:$0xff] %vm100_vm5, %v6348_v19 }
 0x15a   :  { %v1084_v24 = vsel %vm1030_vm2, %v1079_v22, %v1083_v33  ;;  %v1088_v48 = vsel %vm1030_vm2, %v1083_v33, %v1087_v7  ;;  %4722 = vmatpush3.bf16.msra.mxu1 %v5285_v14  ;;  %v1775_v32 = vrot.slane %v6289_v42, 2  ;;  %v1777_v45 = vrot.slane %v6245_v5, 2  ;;  %v5291_v33 = vld [vmem:[%s7059_s5 + $0x70] sm:$0xff]   ;;  %104 = vst.msk [vmem:[#allocation4 + $0x18] sm:$0xff] %vm100_vm5, %v6348_v19  ;;  %105 = vst.msk [vmem:[#allocation4 + $0x20] sm:$0xff] %vm100_vm5, %v6348_v19 }
 0x15b   :  { %1148 = vst [vmem:[#allocation2 + $0x20] sm:$0x3f] %v1088_v48  ;;  %v6319_v15 = vpack.c.bf16 %v1084_v24, %v1080_v31  ;;  %4723 = vmatprep.subr.bf16.mxu1 %v5286_v30  ;;  %v1763_v44 = vsel %vm1760_vm3, %v1761_v41, %v1762_v21  ;;  %v1772_v18 = vsel %vm1760_vm3, %v1767_v51, %v1771_v13  ;;  %v1781_v10 = vrot.slane %v6272_v39, 2  ;;  %v5295_v51 = vld [vmem:[%s7059_s5 + $0x58] sm:$0xff]   ;;  %v5296_v24 = vld [vmem:[%s7059_s5 + $0x30] sm:$0xff]   ;;  %v5297_v48 = vld [vmem:[%s7059_s5 + $0x28] sm:$0xff]  }
 0x15c   :  { %v1776_v11 = vsel %vm1760_vm3, %v1771_v13, %v1775_v32  ;;  %v1779_v52 = vrot.slane %v1189_v50, 2  ;;  %v1303_v34 = vrot.slane %v1189_v50, 1  ;;  %v1783_v43 = vrot.slane %v6294_v6, 2  ;;  %4900 = vmatpush3.bf16.msra.mxu0 %v5291_v33  ;;  %v5300_v41 = vld [vmem:[%s7059_s5 + $0x18] sm:$0xff]   ;;  %106 = vst.msk [vmem:[#allocation4 + $0x28] sm:$0xff] %vm100_vm5, %v6348_v19  ;;  %107 = vst.msk [vmem:[#allocation4 + $0x30] sm:$0xff] %vm100_vm5, %v6348_v19 }
 0x15d   :  { %1484 = vmatmul.mubr.bf16.gmra.mxu1 %v1300_v12  ;;  %v1309_v28 = vrot.slane %v6319_v15, 1  ;;  %v1782_v0 = vsel %vm1760_vm3, %v1777_v45, %v1781_v10  ;;  %v1785_v22 = vrot.slane %v6319_v15, 2  ;;  %v1307_v29 = vrot.slane %v6294_v6, 1  ;;  %v1229_v47 = vld [vmem:[#allocation2 + $0xe0] sm:$0x3f]  ;;  %4901 = vmatprep.subr.bf16.mxu0 %v6348_v19  ;;  %108 = vst.msk [vmem:[#allocation4 + $0x38] sm:$0xff] %vm100_vm5, %v6348_v19 }
 0x15e   :  { %1491 = vmatprep.mubr.bf16.mxu1 %v1306_v36  ;;  %4724 = vmatpush3.bf16.msra.mxu1 %v5287_v59  ;;  %v1780_v5 = vsel %vm1760_vm3, %v1775_v32, %v1779_v52  ;;  %v1784_v9 = vsel %vm1760_vm3, %v1779_v52, %v1783_v43  ;;  %v1304_v31 = vsel %vm761_vm1, %v1299_v53, %v1303_v34  ;;  %v1177_v20 = vld [vmem:[#allocation2 + $0xe0] sm:$0xf]  ;;  %v1769_v2 = vrot.slane %v6185_v60, 2  ;;  %v5292_v53 = vld [vmem:[%s7059_s5 + $0x68] sm:$0xff]  }
 0x15f   :  { %1692 = vmatmul.mubr.bf16.gmra.mxu0 %v1189_v50  ;;  %v1310_v3 = vsel %vm761_vm1, %v1305_v23, %v1309_v28  ;;  %4725 = vmatprep.subr.bf16.mxu1 %v5288_v61  ;;  %v1786_v16 = vsel %vm1760_vm3, %v1781_v10, %v1785_v22  ;;  %v1308_v42 = vsel %vm761_vm1, %v1303_v34, %v1307_v29  ;;  %v1773_v38 = vrot.slane %v6238_v55, 2  ;;  %v1717_v23 = vld [vmem:[#allocation2 + $0xe0] sm:$0xff]  ;;  %v5298_v50 = vld [vmem:[%s7059_s5 + $0x50] sm:$0xff]   ;;  %v5301_v36 = vld [vmem:[%s7059_s5 + $0x48] sm:$0xff]  }
 0x160   :  { %1699 = vmatprep.mubr.bf16.mxu0 %v6319_v15  ;;  %v1233_v26 = vpack.c.bf16 %v1229_v47, %v1229_v47  ;;  %v1193_v4 = vpack.c.bf16 %v1177_v20, %v1177_v20  ;;  %v1770_v17 = vsel %vm1760_vm3, %v1765_v37, %v1769_v2  ;;  %v1721_v30 = vpack.c.bf16 %v1717_v23, %v1717_v23  ;;  %v5299_v59 = vld [vmem:[%s7059_s5 + $0x20] sm:$0xff]   ;;  %v5302_v15 = vld [vmem:[%s7059_s5 + $0x10] sm:$0xff]   ;;  %v5303_v61 = vld [vmem:[%s7059_s5 + $0x8] sm:$0xff]  }
 0x161   :  { %v1778_v14 = vsel %vm1760_vm3, %v1773_v38, %v1777_v45  ;;  %4902 = vmatpush3.bf16.msra.mxu0 %v5292_v53  ;;  %v5304_v12 = vld [vmem:[%s7059_s5 + $0x40] sm:$0xff]   ;;  %109 = vst.msk [vmem:[#allocation4 + $0x40] sm:$0xff] %vm100_vm5, %v6348_v19  ;;  %110 = vst.msk [vmem:[#allocation4 + $0x48] sm:$0xff] %vm100_vm5, %v6348_v19 }
 0x162   :  { %v1178_v40 = vld [vmem:[#allocation2 + $0x20] sm:$0xf]  ;;  %4726 = vmatpush3.bf16.msra.mxu1 %v5289_v56  ;;  %v1311_v25 = vrot.slane %v1233_v26, 1  ;;  %v1787_v37 = vrot.slane %v1721_v30, 2  ;;  %4903 = vmatprep.subr.bf16.mxu0 %v6348_v19  ;;  %111 = vst.msk [vmem:[#allocation4 + $0x50] sm:$0xff] %vm100_vm5, %v6348_v19  ;;  %112 = vst.msk [vmem:[#allocation4 + $0x58] sm:$0xff] %vm100_vm5, %v6348_v19 }
 0x163   :  { %v1230_v35 = vld [vmem:[#allocation2 + $0x20] sm:$0x3f]  ;;  %4941 = vmatprep.subr.bf16.mxu1 %v6348_v19  ;;  %v1194_v57 = vpack.c.bf16 %v1178_v40, %v1178_v40  ;;  %113 = vst.msk [vmem:[#allocation4 + $0x60] sm:$0xff] %vm100_vm5, %v6348_v19  ;;  %114 = vst.msk [vmem:[#allocation4 + $0x68] sm:$0xff] %vm100_vm5, %v6348_v19 }
 0x164   :  { %v1234_v39 = vpack.c.bf16 %v1230_v35, %v1230_v35  ;;  %v1312_v63 = vsel %vm761_vm1, %v1307_v29, %v1311_v25  ;;  %v1718_v7 = vld [vmem:[#allocation2 + $0x20] sm:$0xff]  ;;  %v1788_v21 = vsel %vm1760_vm3, %v1783_v43, %v1787_v37  ;;  %115 = vst.msk [vmem:[#allocation4 + $0x70] sm:$0xff] %vm100_vm5, %v6348_v19 }
 0x165   :  { %1492 = vmatmul.mubr.bf16.gmra.mxu1 %v1304_v31  ;;  %v1722_v60 = vpack.c.bf16 %v1718_v7, %v1718_v7  ;;  %4904 = vmatpush3.bf16.msra.mxu0 %v5293_v62 }
 0x166   :  { %1499 = vmatprep.mubr.bf16.mxu1 %v1310_v3  ;;  %v1313_v49 = vrot.slane %v1234_v39, 1  ;;  %4905 = vmatprep.subr.bf16.mxu0 %v6348_v19 }
 0x167   :  { %1700 = vmatmul.mubr.bf16.gmra.mxu0 %v6294_v6  ;;  %v1774_v6 = vsel %vm1760_vm3, %v1769_v2, %v1773_v38  ;;  %v1789_v27 = vrot.slane %v1722_v60, 2 }
 0x168   :  { %1707 = vmatprep.mubr.bf16.mxu0 %v1194_v57  ;;  %v1314_v46 = vsel %vm761_vm1, %v1309_v28, %v1313_v49 }
 0x169   :  { %v1790_v55 = vsel %vm1760_vm3, %v1785_v22, %v1789_v27  ;;  %4906 = vmatpush3.bf16.msra.mxu0 %v5295_v51 }
 0x16a   :  { %4907 = vmatprep.subr.bf16.mxu0 %v6348_v19 }
 0x16d   :  { %1500 = vmatmul.mubr.bf16.gmra.mxu1 %v1308_v42  ;;  %4908 = vmatpush3.bf16.msra.mxu0 %v5298_v50 }
 0x16e   :  { %1507 = vmatprep.mubr.bf16.mxu1 %v1314_v46  ;;  %4909 = vmatprep.subr.bf16.mxu0 %v6348_v19 }
 0x16f   :  { %1708 = vmatmul.mubr.bf16.gmra.mxu0 %v1193_v4 }
 0x170   :  { %4913 = vmatprep.mubr.msk.bf16.mxu0 %vm5367_vm4, %v6348_v19 }
 0x171   :  { %4910 = vmatpush3.bf16.msra.mxu0 %v5301_v36 }
 0x172   :  { %4911 = vmatprep.subr.bf16.mxu0 %v6348_v19 }
 0x175   :  { %1508 = vmatmul.mubr.bf16.gmra.mxu1 %v1312_v63  ;;  %4912 = vmatpush3.bf16.msra.mxu0 %v5304_v12 }
 0x176   :  { %1515 = vmatprep.mubr.bf16.mxu1 %v1313_v49  ;;  %4985 = vmatprep.subr.bf16.mxu0 %v6348_v19 }
 0x17d   :  { %1516 = vmatmul.mubr.bf16.gmra.mxu1 %v1311_v25 }
 0x17e   :  { %1935 = vmatprep.mubr.bf16.mxu1 %v1766_v8 }
 0x185   :  { %1936 = vmatmul.mubr.bf16.vlgmr.msra.gmra.mxu1 %v1763_v44  ;;  %v5305_v44 = vld [vmem:[%s7059_s5] sm:$0xff]  }
 0x186   :  { %1943 = vmatprep.mubr.bf16.mxu1 %v1770_v17  ;;  %4942 = vmatpush3.bf16.msra.mxu1 %v5294_v58 }
 0x187   :  { %4943 = vmatprep.subr.bf16.mxu1 %v6348_v19 }
 0x18a   :  { %4944 = vmatpush3.bf16.msra.mxu1 %v5296_v24 }
 0x18b   :  { %4945 = vmatprep.subr.bf16.mxu1 %v6348_v19 }
 0x18d   :  { %1944 = vmatmul.mubr.bf16.gmra.mxu1 %v1768_v54 }
 0x18e   :  { %1951 = vmatprep.mubr.bf16.mxu1 %v1774_v6  ;;  %4946 = vmatpush3.bf16.msra.mxu1 %v5297_v48 }
 0x18f   :  { %4947 = vmatprep.subr.bf16.mxu1 %v6348_v19 }
 0x192   :  { %4948 = vmatpush3.bf16.msra.mxu1 %v5299_v59 }
 0x193   :  { %4949 = vmatprep.subr.bf16.mxu1 %v6348_v19 }
 0x195   :  { %1952 = vmatmul.mubr.bf16.gmra.mxu1 %v1772_v18 }
 0x196   :  { %1959 = vmatprep.mubr.bf16.mxu1 %v1778_v14  ;;  %4950 = vmatpush3.bf16.msra.mxu1 %v5300_v41 }
 0x197   :  { %4951 = vmatprep.subr.bf16.mxu1 %v6348_v19 }
 0x19a   :  { %4952 = vmatpush3.bf16.msra.mxu1 %v5302_v15 }
 0x19b   :  { %4953 = vmatprep.subr.bf16.mxu1 %v6348_v19 }
 0x19d   :  { %1960 = vmatmul.mubr.bf16.gmra.mxu1 %v1776_v11 }
 0x19e   :  { %1967 = vmatprep.mubr.bf16.mxu1 %v1782_v0  ;;  %4954 = vmatpush3.bf16.msra.mxu1 %v5303_v61 }
 0x19f   :  { %4955 = vmatprep.subr.bf16.mxu1 %v6348_v19 }
 0x1a2   :  { %4956 = vmatpush3.bf16.msra.mxu1 %v5305_v44 }
 0x1a3   :  { %5029 = vmatprep.subr.bf16.mxu1 %v6348_v19 }
 0x1a5   :  { %1968 = vmatmul.mubr.bf16.gmra.mxu1 %v1780_v5 }
 0x1a6   :  { %1975 = vmatprep.mubr.bf16.mxu1 %v1786_v16 }
 0x1ad   :  { %1976 = vmatmul.mubr.bf16.gmra.mxu1 %v1784_v9 }
 0x1ae   :  { %1983 = vmatprep.mubr.bf16.mxu1 %v1790_v55 }
 0x1b5   :  { %1984 = vmatmul.mubr.bf16.gmra.mxu1 %v1788_v21 }
 0x1b6   :  { %1991 = vmatprep.mubr.bf16.mxu1 %v1789_v27 }
 0x1bd   :  { %1992 = vmatmul.mubr.bf16.gmra.mxu1 %v1787_v37 }
 0x1be   :  { %4957 = vmatprep.mubr.msk.bf16.mxu1 %vm5367_vm4, %v6348_v19 }
 0x1f1   :  { %v4663_v8 = vpop.f32.mrf.mxu0 }
 0x1f3   :  { %v4664_v54 = vpop.f32.mrf.mxu0 }
 0x1f4   :  { %v4665_v13 = vadd.f32 %v4664_v54, %v4663_v8 }
 0x1f5   :  { %v4666_v28 = vpop.f32.mrf.mxu0 }
 0x1f7   :  { %v4667_v32 = vpop.f32.mrf.mxu0 }
 0x1f8   :  { %v4668_v9 = vadd.f32 %v4667_v32, %v4666_v28 }
 0x1fb   :  { %v4669_v56 = vpop.f32.mrf.mxu0 }
 0x1fd   :  { %v4670_v18 = vpop.f32.mrf.mxu0 }
 0x1fe   :  { %v4671_v45 = vadd.f32 %v4670_v18, %v4669_v56 }
 0x1ff   :  { %v4672_v10 = vpop.f32.mrf.mxu0 }
 0x201   :  { %v4673_v3 = vpop.f32.mrf.mxu0 }
 0x202   :  { %v4674_v2 = vadd.f32 %v4673_v3, %v4672_v10 }
 0x205   :  { %v4599_v11 = vpop.f32.mrf.mxu1 }
 0x207   :  { %v4600_v52 = vpop.f32.mrf.mxu1  ;;  %v4675_v34 = vpop.f32.mrf.mxu0 }
 0x208   :  { %v4601_v0 = vadd.f32 %v4600_v52, %v4599_v11 }
 0x209   :  { %v4602_v22 = vpop.f32.mrf.mxu1  ;;  %v4676_v43 = vpop.f32.mrf.mxu0 }
 0x20a   :  { %v6434_v5 = vadd.f32 %v4665_v13, %v4601_v0  ;;  %v4677_v40 = vadd.f32 %v4676_v43, %v4675_v34 }
 0x20b   :  { %v4603_v35 = vpop.f32.mrf.mxu1  ;;  %v4678_v16 = vpop.f32.mrf.mxu0 }
 0x20c   :  { %v4604_v39 = vadd.f32 %v4603_v35, %v4602_v22 }
 0x20d   :  { %v4605_v31 = vpop.f32.mrf.mxu1  ;;  %v4679_v57 = vpop.f32.mrf.mxu0 }
 0x20e   :  { %v6436_v49 = vadd.f32 %v4668_v9, %v4604_v39  ;;  %v4680_v33 = vadd.f32 %v4679_v57, %v4678_v16 }
 0x20f   :  { %v4606_v29 = vpop.f32.mrf.mxu1  ;;  %v4681_v47 = vpop.f32.mrf.mxu0 }
 0x210   :  { %v4607_v20 = vadd.f32 %v4606_v29, %v4605_v31 }
 0x211   :  { %v4608_v46 = vpop.f32.mrf.mxu1  ;;  %v4682_v42 = vpop.f32.mrf.mxu0 }
 0x212   :  { %v6438_v26 = vadd.f32 %v4671_v45, %v4607_v20  ;;  %v4683_v4 = vadd.f32 %v4682_v42, %v4681_v47 }
 0x213   :  { %v4609_v25 = vpop.f32.mrf.mxu1  ;;  %v4684_v63 = vpop.f32.mrf.mxu0 }
 0x214   :  { %v4610_v17 = vadd.f32 %v4609_v25, %v4608_v46 }
 0x215   :  { %v4611_v38 = vpop.f32.mrf.mxu1  ;;  %v4685_v6 = vpop.f32.mrf.mxu0 }
 0x216   :  { %v6440_v14 = vadd.f32 %v4674_v2, %v4610_v17  ;;  %v4686_v54 = vadd.f32 %v4685_v6, %v4684_v63 }
 0x217   :  { %v4612_v7 = vpop.f32.mrf.mxu1  ;;  %v4687_v60 = vpop.f32.mrf.mxu0 }
 0x218   :  { %v4613_v27 = vadd.f32 %v4612_v7, %v4611_v38 }
 0x219   :  { %v4614_v23 = vpop.f32.mrf.mxu1  ;;  %v4688_v30 = vpop.f32.mrf.mxu0 }
 0x21a   :  { %v6442_v55 = vadd.f32 %v4677_v40, %v4613_v27  ;;  %v4689_v1 = vadd.f32 %v4688_v30, %v4687_v60 }
 0x21b   :  { %v4615_v37 = vpop.f32.mrf.mxu1  ;;  %v4690_v21 = vpop.f32.mrf.mxu0 }
 0x21c   :  { %v4616_v53 = vadd.f32 %v4615_v37, %v4614_v23 }
 0x21d   :  { %v4617_v62 = vpop.f32.mrf.mxu1  ;;  %v4691_v58 = vpop.f32.mrf.mxu0 }
 0x21e   :  { %v6444_v51 = vadd.f32 %v4680_v33, %v4616_v53  ;;  %v4692_v0 = vadd.f32 %v4691_v58, %v4690_v21 }
 0x21f   :  { %v4618_v24 = vpop.f32.mrf.mxu1  ;;  %v4693_v48 = vpop.f32.mrf.mxu0 }
 0x220   :  { %v4619_v50 = vadd.f32 %v4618_v24, %v4617_v62 }
 0x221   :  { %v4620_v59 = vpop.f32.mrf.mxu1  ;;  %v4694_v41 = vpop.f32.mrf.mxu0 }
 0x222   :  { %v6446_v36 = vadd.f32 %v4683_v4, %v4619_v50  ;;  %v4695_v15 = vadd.f32 %v4694_v41, %v4693_v48  ;;  %v6467_v50 = vld [vmem:[%s7058_s4] ss:$0 sm:$0xff] }
 0x223   :  { %v4621_v61 = vpop.f32.mrf.mxu1  ;;  %v4696_v8 = vpop.f32.mrf.mxu0 }
 0x224   :  { %v4622_v12 = vadd.f32 %v4621_v61, %v4620_v59 }
 0x225   :  { %v4623_v44 = vpop.f32.mrf.mxu1  ;;  %v4697_v13 = vpop.f32.mrf.mxu0 }
 0x226   :  { %v6448_v28 = vadd.f32 %v4686_v54, %v4622_v12  ;;  %v4698_v42 = vadd.f32 %v4697_v13, %v4696_v8 }
 0x227   :  { %v4624_v32 = vpop.f32.mrf.mxu1  ;;  %v4699_v56 = vpop.f32.mrf.mxu0 }
 0x228   :  { %v4625_v18 = vadd.f32 %v4624_v32, %v4623_v44 }
 0x229   :  { %v4626_v45 = vpop.f32.mrf.mxu1  ;;  %v4700_v10 = vpop.f32.mrf.mxu0 }
 0x22a   :  { %v6450_v3 = vadd.f32 %v4689_v1, %v4625_v18  ;;  %v4701_v11 = vadd.f32 %v4700_v10, %v4699_v56 }
 0x22b   :  { %v4627_v52 = vpop.f32.mrf.mxu1  ;;  %v4702_v34 = vpop.f32.mrf.mxu0 }
 0x22c   :  { %v4628_v22 = vadd.f32 %v4627_v52, %v4626_v45 }
 0x22d   :  { %v4629_v43 = vpop.f32.mrf.mxu1  ;;  %v4703_v40 = vpop.f32.mrf.mxu0 }
 0x22e   :  { %v6452_v35 = vadd.f32 %v4692_v0, %v4628_v22  ;;  %v4704_v27 = vadd.f32 %v4703_v40, %v4702_v34 }
 0x22f   :  { %v4630_v16 = vpop.f32.mrf.mxu1  ;;  %v4705_v9 = vpop.f32.mrf.mxu0 }
 0x230   :  { %v4631_v39 = vadd.f32 %v4630_v16, %v4629_v43 }
 0x231   :  { %v4632_v31 = vpop.f32.mrf.mxu1  ;;  %v4706_v57 = vpop.f32.mrf.mxu0 }
 0x232   :  { %v6454_v29 = vadd.f32 %v4695_v15, %v4631_v39  ;;  %v4707_v47 = vadd.f32 %v4706_v57, %v4705_v9  ;;  %v2144_v39 = vpop.permute.xlu1 %2143 }
 0x233   :  { %v4633_v20 = vpop.f32.mrf.mxu1  ;;  %v4708_v46 = vpop.f32.mrf.mxu0 }
 0x234   :  { %v4634_v4 = vadd.f32 %v4633_v20, %v4632_v31 }
 0x235   :  { %v4635_v25 = vpop.f32.mrf.mxu1  ;;  %v4709_v63 = vpop.f32.mrf.mxu0 }
 0x236   :  { %v6456_v2 = vadd.f32 %v4698_v42, %v4634_v4 }
 0x237   :  { %v4636_v17 = vpop.f32.mrf.mxu1 }
 0x238   :  { %v4637_v38 = vadd.f32 %v4636_v17, %v4635_v25  ;;  %v2149_v17 = vpop.permute.xlu0 %2148 }
 0x239   :  { %v4638_v6 = vpop.f32.mrf.mxu1 }
 0x23a   :  { %v6458_v7 = vadd.f32 %v4701_v11, %v4637_v38 }
 0x23b   :  { %v4639_v60 = vpop.f32.mrf.mxu1 }
 0x23c   :  { %v4640_v23 = vadd.f32 %v4639_v60, %v4638_v6 }
 0x23d   :  { %v4641_v30 = vpop.f32.mrf.mxu1 }
 0x23e   :  { %v6460_v1 = vadd.f32 %v4704_v27, %v4640_v23 }
 0x23f   :  { %v4642_v37 = vpop.f32.mrf.mxu1 }
 0x240   :  { %v4643_v21 = vadd.f32 %v4642_v37, %v4641_v30 }
 0x241   :  { %v4644_v33 = vpop.f32.mrf.mxu1 }
 0x242   :  { %v6462_v53 = vadd.f32 %v4707_v47, %v4643_v21 }
 0x243   :  { %v4645_v62 = vpop.f32.mrf.mxu1 }
 0x244   :  { %v2154_v62 = vpop.permute.xlu1 %2153 }
 0x245   :  { %v4727_v58 = vpop.f32.mrf.mxu1 }
 0x247   :  { %v4728_v24 = vpop.f32.mrf.mxu1 }
 0x248   :  { %v4729_v48 = vadd.f32 %v4728_v24, %v4727_v58 }
 0x249   :  { %v4730_v59 = vpop.f32.mrf.mxu1 }
 0x24a   :  { %v1999_v41 = vadd.f32 %v4729_v48, %v6434_v5 }
 0x24b   :  { %v4731_v15 = vpop.f32.mrf.mxu1 }
 0x24c   :  { %v2021_v61 = vadd.f32 %v6467_v50, %v1999_v41  ;;  %v4732_v8 = vadd.f32 %v4731_v15, %v4730_v59 }
 0x24d   :  { %v4733_v54 = vpop.f32.mrf.mxu1 }
 0x24e   :  { %v2000_v12 = vadd.f32 %v4732_v8, %v6436_v49  ;;  %v2036_v13 = vmax.f32 %v2021_v61, 0.0 }
 0x24f   :  { %v4734_v44 = vpop.f32.mrf.mxu1 }
 0x250   :  { %v2022_v32 = vadd.f32 %v6467_v50, %v2000_v12  ;;  %v4735_v56 = vadd.f32 %v4734_v44, %v4733_v54  ;;  %v2067_v52 = vrot.slane %v2036_v13, 2  ;;  %v2159_v12 = vpop.permute.xlu0 %2158 }
 0x251   :  { %v4736_v18 = vpop.f32.mrf.mxu1 }
 0x252   :  { %v2037_v45 = vmax.f32 %v2022_v32, 0.0  ;;  %v2001_v10 = vadd.f32 %v4735_v56, %v6438_v26 }
 0x253   :  { %v4737_v11 = vpop.f32.mrf.mxu1 }
 0x254   :  { %v2068_v34 = vrot.slane %v2037_v45, 2  ;;  %v2023_v5 = vadd.f32 %v6467_v50, %v2001_v10  ;;  %v4738_v0 = vadd.f32 %v4737_v11, %v4736_v18 }
 0x255   :  { %v4739_v22 = vpop.f32.mrf.mxu1 }
 0x256   :  { %v2069_v43 = vsel %vm1760_vm3, %v2067_v52, %v2068_v34  ;;  %v2038_v40 = vmax.f32 %v2023_v5, 0.0  ;;  %v2002_v49 = vadd.f32 %v4738_v0, %v6440_v14  ;;  %v2164_v0 = vpop.permute.xlu1 %2163 }
 0x257   :  { %v2111_v16 = vmax.f32 %v2036_v13, %v2069_v43  ;;  %v4740_v9 = vpop.f32.mrf.mxu1 }
 0x258   :  { %v2070_v31 = vrot.slane %v2038_v40, 2  ;;  %v2024_v57 = vadd.f32 %v6467_v50, %v2002_v49  ;;  %v4741_v47 = vadd.f32 %v4740_v9, %v4739_v22 }
 0x259   :  { %v2216_v26 = vmul.f32 %v2144_v39, %v2111_v16  ;;  %v4742_v20 = vpop.f32.mrf.mxu1 }
 0x25a   :  { %v2071_v46 = vsel %vm1760_vm3, %v2068_v34, %v2070_v31  ;;  %v2039_v42 = vmax.f32 %v2024_v57, 0.0  ;;  %v2003_v4 = vadd.f32 %v4741_v47, %v6442_v55  ;;  %v5306_v47 = vld [vmem:[%s7059_s5 + $0xb8] sm:$0xff]  }
 0x25b   :  { %2231 = vst [vmem:[#allocation3 + $0x2] sm:$0xff] %v2216_v26  ;;  %v2112_v25 = vmax.f32 %v2037_v45, %v2071_v46  ;;  %v4743_v63 = vpop.f32.mrf.mxu1 }
 0x25c   :  { %v2072_v38 = vrot.slane %v2039_v42, 2  ;;  %v2025_v14 = vadd.f32 %v6467_v50, %v2003_v4  ;;  %v4744_v6 = vadd.f32 %v4743_v63, %v4742_v20 }
 0x25d   :  { %v2217_v60 = vmul.f32 %v2149_v17, %v2112_v25  ;;  %v4745_v27 = vpop.f32.mrf.mxu1 }
 0x25e   :  { %v2073_v23 = vsel %vm1760_vm3, %v2070_v31, %v2072_v38  ;;  %v2040_v30 = vmax.f32 %v2025_v14, 0.0  ;;  %v2004_v37 = vadd.f32 %v4744_v6, %v6444_v51 }
 0x25f   :  { %2232 = vst [vmem:[#allocation3 + $0xa] sm:$0xff] %v2217_v60  ;;  %v2113_v21 = vmax.f32 %v2038_v40, %v2073_v23  ;;  %v4746_v33 = vpop.f32.mrf.mxu1  ;;  %v5307_v23 = vld [vmem:[%s7059_s5 + $0xb0] sm:$0xff]  }
 0x260   :  { %v2074_v55 = vrot.slane %v2040_v30, 2  ;;  %v2026_v58 = vadd.f32 %v6467_v50, %v2004_v37  ;;  %v4747_v24 = vadd.f32 %v4746_v33, %v4745_v27 }
 0x261   :  { %v2218_v48 = vmul.f32 %v2154_v62, %v2113_v21  ;;  %v4748_v59 = vpop.f32.mrf.mxu1 }
 0x262   :  { %v2075_v41 = vsel %vm1760_vm3, %v2072_v38, %v2074_v55  ;;  %v2041_v15 = vmax.f32 %v2026_v58, 0.0  ;;  %v2005_v61 = vadd.f32 %v4747_v24, %v6446_v36  ;;  %v2246_v11 = vld [vmem:[#allocation3] sm:$0xff] }
 0x263   :  { %2233 = vst [vmem:[#allocation3 + $0x12] sm:$0xff] %v2218_v48  ;;  %v2114_v8 = vmax.f32 %v2039_v42, %v2075_v41  ;;  %v4749_v54 = vpop.f32.mrf.mxu1  ;;  %v2169_v42 = vpop.permute.xlu0 %2168 }
 0x264   :  { %v2076_v51 = vrot.slane %v2041_v15, 2  ;;  %v2027_v44 = vadd.f32 %v6467_v50, %v2005_v61  ;;  %v4750_v13 = vadd.f32 %v4749_v54, %v4748_v59 }
 0x265   :  { %v2219_v32 = vmul.f32 %v2159_v12, %v2114_v8  ;;  %v4751_v56 = vpop.f32.mrf.mxu1  ;;  %v5308_v8 = vld [vmem:[%s7059_s5 + $0xa8] sm:$0xff]  }
 0x266   :  { %v2077_v18 = vsel %vm1760_vm3, %v2074_v55, %v2076_v51  ;;  %v2042_v45 = vmax.f32 %v2027_v44, 0.0  ;;  %v2006_v10 = vadd.f32 %v4750_v13, %v6448_v28  ;;  %v6489_v52 = vld [vmem:[#allocation3 + $0x8] sm:$0xff] }
 0x267   :  { %2234 = vst [vmem:[#allocation3 + $0x1a] sm:$0xff] %v2219_v32  ;;  %v2115_v36 = vmax.f32 %v2040_v30, %v2077_v18  ;;  %v4752_v34 = vpop.f32.mrf.mxu1  ;;  %v2260_v5 = vpack.c.bf16 %v6489_v52, %v2246_v11  ;;  %v2283_v31 = vld [vmem:[#allocation3 + $0x4] sm:$0xff]  ;;  %v2179_v44 = vpop.permute.xlu0 %2178 }
 0x268   :  { %v2078_v22 = vrot.slane %v2042_v45, 2  ;;  %v2028_v43 = vadd.f32 %v6467_v50, %v2006_v10  ;;  %v4753_v40 = vadd.f32 %v4752_v34, %v4751_v56 }
 0x269   :  { %v2220_v49 = vmul.f32 %v2164_v0, %v2115_v36  ;;  %v4754_v16 = vpop.f32.mrf.mxu1  ;;  %4958 = vmatmul.mubr.bf16.vlgmr.msra.gmra.mxu1 %v2260_v5  ;;  %v5309_v5 = vld [vmem:[%s7059_s5 + $0xa0] sm:$0xff]  }
 0x26a   :  { %v2079_v9 = vsel %vm1760_vm3, %v2076_v51, %v2078_v22  ;;  %v2043_v39 = vmax.f32 %v2028_v43, 0.0  ;;  %v2007_v28 = vadd.f32 %v4753_v40, %v6450_v3  ;;  %v2284_v57 = vld [vmem:[#allocation3 + $0xc] sm:$0xff]  ;;  %4961 = vmatprep.mubr.msk.bf16.mxu1 %vm5367_vm4, %v6348_v19 }
 0x26b   :  { %2235 = vst [vmem:[#allocation3 + $0x22] sm:$0xff] %v2220_v49  ;;  %v2116_v26 = vmax.f32 %v2041_v15, %v2079_v9  ;;  %v4755_v20 = vpop.f32.mrf.mxu1  ;;  %v2297_v46 = vpack.c.bf16 %v2284_v57, %v2283_v31  ;;  %v6503_v60 = vld [vmem:[#allocation3 + $0x10] sm:$0xff] }
 0x26c   :  { %v2080_v4 = vrot.slane %v2043_v39, 2  ;;  %v2029_v25 = vadd.f32 %v6467_v50, %v2007_v28  ;;  %v4756_v63 = vadd.f32 %v4755_v20, %v4754_v16  ;;  %v5310_v20 = vld [vmem:[%s7059_s5 + $0x98] sm:$0xff]  }
 0x26d   :  { %v2221_v17 = vmul.f32 %v2169_v42, %v2116_v26  ;;  %v4757_v3 = vpop.f32.mrf.mxu1  ;;  %4914 = vmatmul.mubr.bf16.vlgmr.msra.gmra.mxu0 %v2297_v46 }
 0x26e   :  { %v2081_v38 = vsel %vm1760_vm3, %v2078_v22, %v2080_v4  ;;  %v2044_v14 = vmax.f32 %v2029_v25, 0.0  ;;  %v2008_v6 = vadd.f32 %v4756_v63, %v6452_v35  ;;  %4986 = vmatpush3.bf16.msra.mxu0 %v5306_v47  ;;  %v6505_v27 = vld [vmem:[#allocation3 + $0x18] sm:$0xff]  ;;  %4917 = vmatprep.mubr.msk.bf16.mxu0 %vm5367_vm4, %v6348_v19  ;;  %v2174_v35 = vpop.permute.xlu1 %2173  ;;  %v2189_v25 = vpop.permute.xlu0 %2188 }
 0x26f   :  { %2236 = vst [vmem:[#allocation3 + $0x2a] sm:$0xff] %v2221_v17  ;;  %v2117_v30 = vmax.f32 %v2042_v45, %v2081_v38  ;;  %v4758_v37 = vpop.f32.mrf.mxu1  ;;  %v2261_v21 = vpack.c.bf16 %v6505_v27, %v6503_v60  ;;  %4987 = vmatprep.subr.bf16.mxu0 %v6348_v19  ;;  %v2285_v15 = vld [vmem:[#allocation3 + $0x14] sm:$0xff] }
 0x270   :  { %v2082_v33 = vrot.slane %v2044_v14, 2  ;;  %v2030_v62 = vadd.f32 %v6467_v50, %v2008_v6  ;;  %v4759_v55 = vadd.f32 %v4758_v37, %v4757_v3 }
 0x271   :  { %v2222_v58 = vmul.f32 %v2174_v35, %v2117_v30  ;;  %v4760_v24 = vpop.f32.mrf.mxu1  ;;  %4962 = vmatmul.mubr.bf16.gmra.mxu1 %v2261_v21  ;;  %v5311_v21 = vld [vmem:[%s7059_s5 + $0x90] sm:$0xff]  }
 0x272   :  { %v2083_v48 = vsel %vm1760_vm3, %v2080_v4, %v2082_v33  ;;  %v2045_v59 = vmax.f32 %v2030_v62, 0.0  ;;  %v2009_v41 = vadd.f32 %v4759_v55, %v6454_v29  ;;  %v2286_v61 = vld [vmem:[#allocation3 + $0x1c] sm:$0xff]  ;;  %4988 = vmatpush3.bf16.msra.mxu0 %v5307_v23  ;;  %4965 = vmatprep.mubr.msk.bf16.mxu1 %vm5367_vm4, %v6348_v19 }
 0x273   :  { %2237 = vst [vmem:[#allocation3 + $0x32] sm:$0xff] %v2222_v58  ;;  %v2118_v54 = vmax.f32 %v2043_v39, %v2083_v48  ;;  %v4761_v12 = vpop.f32.mrf.mxu1  ;;  %v2298_v51 = vpack.c.bf16 %v2286_v61, %v2285_v15  ;;  %4989 = vmatprep.subr.bf16.mxu0 %v6348_v19  ;;  %v6527_v36 = vld [vmem:[#allocation3 + $0x20] sm:$0xff] }
 0x274   :  { %v2084_v13 = vrot.slane %v2045_v59, 2  ;;  %v2031_v29 = vadd.f32 %v6467_v50, %v2009_v41  ;;  %v4762_v32 = vadd.f32 %v4761_v12, %v4760_v24  ;;  %v5312_v12 = vld [vmem:[%s7059_s5 + $0x88] sm:$0xff]  }
 0x275   :  { %v2223_v56 = vmul.f32 %v2179_v44, %v2118_v54  ;;  %v4763_v18 = vpop.f32.mrf.mxu1  ;;  %4918 = vmatmul.mubr.bf16.gmra.mxu0 %v2298_v51 }
 0x276   :  { %v2085_v45 = vsel %vm1760_vm3, %v2082_v33, %v2084_v13  ;;  %v2046_v10 = vmax.f32 %v2031_v29, 0.0  ;;  %v2010_v11 = vadd.f32 %v4762_v32, %v6456_v2  ;;  %v6529_v34 = vld [vmem:[#allocation3 + $0x28] sm:$0xff]  ;;  %4921 = vmatprep.mubr.msk.bf16.mxu0 %vm5367_vm4, %v6348_v19  ;;  %4990 = vmatpush3.bf16.msra.mxu0 %v5308_v8  ;;  %v2184_v2 = vpop.permute.xlu1 %2183  ;;  %v2199_v29 = vpop.permute.xlu0 %2198 }
 0x277   :  { %2238 = vst [vmem:[#allocation3 + $0x3a] sm:$0xff] %v2223_v56  ;;  %v2119_v0 = vmax.f32 %v2044_v14, %v2085_v45  ;;  %v4764_v22 = vpop.f32.mrf.mxu1  ;;  %v2262_v43 = vpack.c.bf16 %v6529_v34, %v6527_v36  ;;  %4991 = vmatprep.subr.bf16.mxu0 %v6348_v19  ;;  %v2287_v47 = vld [vmem:[#allocation3 + $0x24] sm:$0xff] }
 0x278   :  { %v2086_v40 = vrot.slane %v2046_v10, 2  ;;  %v2032_v49 = vadd.f32 %v6467_v50, %v2010_v11  ;;  %v4765_v16 = vadd.f32 %v4764_v22, %v4763_v18 }
 0x279   :  { %v2224_v9 = vmul.f32 %v2184_v2, %v2119_v0  ;;  %v4766_v39 = vpop.f32.mrf.mxu1  ;;  %4966 = vmatmul.mubr.bf16.gmra.mxu1 %v2262_v43  ;;  %v5313_v0 = vld [vmem:[%s7059_s5 + $0x80] sm:$0xff]  }
 0x27a   :  { %v2087_v28 = vsel %vm1760_vm3, %v2084_v13, %v2086_v40  ;;  %v2047_v31 = vmax.f32 %v2032_v49, 0.0  ;;  %v2011_v57 = vadd.f32 %v4765_v16, %v6458_v7  ;;  %v2288_v26 = vld [vmem:[#allocation3 + $0x2c] sm:$0xff]  ;;  %4969 = vmatprep.mubr.msk.bf16.mxu1 %vm5367_vm4, %v6348_v19  ;;  %4992 = vmatpush3.bf16.msra.mxu0 %v5309_v5  ;;  %v2194_v35 = vpop.permute.xlu1 %2193 }
 0x27b   :  { %2239 = vst [vmem:[#allocation3 + $0x42] sm:$0xff] %v2224_v9  ;;  %v2120_v46 = vmax.f32 %v2045_v59, %v2087_v28  ;;  %v4767_v42 = vpop.f32.mrf.mxu1  ;;  %v2299_v4 = vpack.c.bf16 %v2288_v26, %v2287_v47  ;;  %4993 = vmatprep.subr.bf16.mxu0 %v6348_v19  ;;  %v6551_v30 = vld [vmem:[#allocation3 + $0x30] sm:$0xff] }
 0x27c   :  { %v2088_v63 = vrot.slane %v2047_v31, 2  ;;  %v2033_v7 = vadd.f32 %v6467_v50, %v2011_v57  ;;  %v4768_v17 = vadd.f32 %v4767_v42, %v4766_v39  ;;  %v2209_v57 = vpop.permute.xlu0 %2208 }
 0x27d   :  { %v2225_v3 = vmul.f32 %v2189_v25, %v2120_v46  ;;  %v4769_v38 = vpop.f32.mrf.mxu1  ;;  %4922 = vmatmul.mubr.bf16.gmra.mxu0 %v2299_v4 }
 0x27e   :  { %v2089_v14 = vsel %vm1760_vm3, %v2086_v40, %v2088_v63  ;;  %v2048_v6 = vmax.f32 %v2033_v7, 0.0  ;;  %v2012_v23 = vadd.f32 %v4768_v17, %v6460_v1  ;;  %v6553_v37 = vld [vmem:[#allocation3 + $0x38] sm:$0xff]  ;;  %4925 = vmatprep.mubr.msk.bf16.mxu0 %vm5367_vm4, %v6348_v19  ;;  %4994 = vmatpush3.bf16.msra.mxu0 %v5310_v20  ;;  %v2204_v56 = vpop.permute.xlu1 %2203 }
 0x27f   :  { %2240 = vst [vmem:[#allocation3 + $0x4a] sm:$0xff] %v2225_v3  ;;  %v2121_v33 = vmax.f32 %v2046_v10, %v2089_v14  ;;  %v4770_v62 = vpop.f32.mrf.mxu1  ;;  %v2263_v55 = vpack.c.bf16 %v6553_v37, %v6551_v30  ;;  %4995 = vmatprep.subr.bf16.mxu0 %v6348_v19  ;;  %v2289_v8 = vld [vmem:[#allocation3 + $0x34] sm:$0xff] }
 0x280   :  { %v2090_v1 = vrot.slane %v2048_v6, 2  ;;  %v2034_v58 = vadd.f32 %v6467_v50, %v2012_v23  ;;  %v4771_v24 = vadd.f32 %v4770_v62, %v4769_v38  ;;  %v2609_v23 = vpack.c.bf16 %v6503_v60, %v6489_v52  ;;  %v5317_v62 = vld [vmem:[%s7061_s7 + $0x18] sm:$0xff]  }
 0x281   :  { %v2226_v48 = vmul.f32 %v2194_v35, %v2121_v33  ;;  %v4772_v59 = vpop.f32.mrf.mxu1  ;;  %4970 = vmatmul.mubr.bf16.gmra.mxu1 %v2263_v55  ;;  %v2611_v35 = vpack.c.bf16 %v6551_v30, %v6529_v34  ;;  %v5314_v34 = vld [vmem:[%s7061_s7 + $0x38] sm:$0xff]   ;;  %v5316_v33 = vld [vmem:[%s7061_s7 + $0x28] sm:$0xff]   ;;  %v5318_v55 = vld [vmem:[%s7061_s7 + $0x10] sm:$0xff]  }
 0x282   :  { %v2091_v41 = vsel %vm1760_vm3, %v2088_v63, %v2090_v1  ;;  %v2049_v15 = vmax.f32 %v2034_v58, 0.0  ;;  %v2013_v61 = vadd.f32 %v4771_v24, %v6462_v53  ;;  %v2290_v54 = vld [vmem:[#allocation3 + $0x3c] sm:$0xff]  ;;  %4973 = vmatprep.mubr.msk.bf16.mxu1 %vm5367_vm4, %v6348_v19  ;;  %4996 = vmatpush3.bf16.msra.mxu0 %v5311_v21  ;;  %v2214_v39 = vpop.permute.xlu1 %2213  ;;  %v2610_v21 = vpack.c.bf16 %v6527_v36, %v6505_v27  ;;  %v5321_v24 = vld [vmem:[%s7061_s7] sm:$0xff]  }
 0x283   :  { %2241 = vst [vmem:[#allocation3 + $0x52] sm:$0xff] %v2226_v48  ;;  %v2122_v51 = vmax.f32 %v2047_v31, %v2091_v41  ;;  %v4773_v44 = vpop.f32.mrf.mxu1  ;;  %v2300_v13 = vpack.c.bf16 %v2290_v54, %v2289_v8  ;;  %4997 = vmatprep.subr.bf16.mxu0 %v6348_v19  ;;  %v2254_v11 = vld [vmem:[#allocation3 + $0x40] sm:$0xff]  ;;  %5030 = vmatpush3.bf16.msra.mxu1 %v5314_v34  ;;  %v5320_v58 = vld [vmem:[%s7061_s7 + $0x8] sm:$0xff]  }
 0x284   :  { %v2092_v32 = vrot.slane %v2049_v15, 2  ;;  %v2035_v53 = vadd.f32 %v6467_v50, %v2013_v61  ;;  %v2612_v52 = vpack.c.bf16 %v2254_v11, %v6553_v37  ;;  %5031 = vmatprep.subr.bf16.mxu1 %v6348_v19  ;;  %v5315_v37 = vld [vmem:[%s7061_s7 + $0x30] sm:$0xff]  }
 0x285   :  { %v2227_v18 = vmul.f32 %v2199_v29, %v2122_v51  ;;  %4926 = vmatmul.mubr.bf16.gmra.mxu0 %v2300_v13 }
 0x286   :  { %v2093_v45 = vsel %vm1760_vm3, %v2090_v1, %v2092_v32  ;;  %v2050_v10 = vmax.f32 %v2035_v53, 0.0  ;;  %v2255_v5 = vld [vmem:[#allocation3 + $0x48] sm:$0xff]  ;;  %4929 = vmatprep.mubr.msk.bf16.mxu0 %vm5367_vm4, %v6348_v19  ;;  %4998 = vmatpush3.bf16.msra.mxu0 %v5312_v12  ;;  %v5319_v1 = vld [vmem:[%s7061_s7 + $0x20] sm:$0xff]  }
 0x287   :  { %2242 = vst [vmem:[#allocation3 + $0x5a] sm:$0xff] %v2227_v18  ;;  %v2123_v22 = vmax.f32 %v2048_v6, %v2093_v45  ;;  %v2264_v43 = vpack.c.bf16 %v2255_v5, %v2254_v11  ;;  %4999 = vmatprep.subr.bf16.mxu0 %v6348_v19  ;;  %v2291_v16 = vld [vmem:[#allocation3 + $0x44] sm:$0xff]  ;;  %5032 = vmatpush3.bf16.msra.mxu1 %v5315_v37 }
 0x288   :  { %v2094_v50 = vrot.slane %v2050_v10, 2  ;;  %5033 = vmatprep.subr.bf16.mxu1 %v6348_v19 }
 0x289   :  { %v2228_v2 = vmul.f32 %v2204_v56, %v2123_v22  ;;  %4974 = vmatmul.mubr.bf16.gmra.mxu1 %v2264_v43 }
 0x28a   :  { %v2095_v40 = vsel %vm1760_vm3, %v2092_v32, %v2094_v50  ;;  %v2125_v49 = vmax.f32 %v2050_v10, %v2094_v50  ;;  %v2292_v9 = vld [vmem:[#allocation3 + $0x4c] sm:$0xff]  ;;  %4977 = vmatprep.mubr.msk.bf16.mxu1 %vm5367_vm4, %v6348_v19  ;;  %5000 = vmatpush3.bf16.msra.mxu0 %v5313_v0 }
 0x28b   :  { %2243 = vst [vmem:[#allocation3 + $0x62] sm:$0xff] %v2228_v2  ;;  %v2124_v28 = vmax.f32 %v2049_v15, %v2095_v40  ;;  %v2301_v31 = vpack.c.bf16 %v2292_v9, %v2291_v16  ;;  %5065 = vmatprep.subr.bf16.mxu0 %v6348_v19  ;;  %v2256_v20 = vld [vmem:[#allocation3 + $0x50] sm:$0xff]  ;;  %5034 = vmatpush3.bf16.msra.mxu1 %v5316_v33 }
 0x28c   :  { %v2230_v47 = vmul.f32 %v2214_v39, %v2125_v49  ;;  %v2613_v60 = vpack.c.bf16 %v2256_v20, %v2255_v5  ;;  %5035 = vmatprep.subr.bf16.mxu1 %v6348_v19 }
 0x28d   :  { %v2229_v26 = vmul.f32 %v2209_v57, %v2124_v28  ;;  %4930 = vmatmul.mubr.bf16.gmra.mxu0 %v2301_v31 }
 0x28e   :  { %2245 = vst [vmem:[#allocation3 + $0x72] sm:$0x3] %v2230_v47  ;;  %v2257_v46 = vld [vmem:[#allocation3 + $0x58] sm:$0xff]  ;;  %4933 = vmatprep.mubr.msk.bf16.mxu0 %vm5367_vm4, %v6348_v19 }
 0x28f   :  { %2244 = vst [vmem:[#allocation3 + $0x6a] sm:$0xff] %v2229_v26  ;;  %v2265_v42 = vpack.c.bf16 %v2257_v46, %v2256_v20  ;;  %v2293_v4 = vld [vmem:[#allocation3 + $0x54] sm:$0xff]  ;;  %5036 = vmatpush3.bf16.msra.mxu1 %v5319_v1 }
 0x290   :  { %5101 = vmatprep.subr.bf16.mxu1 %v6348_v19 }
 0x291   :  { %4978 = vmatmul.mubr.bf16.gmra.mxu1 %v2265_v42 }
 0x292   :  { %v2294_v25 = vld [vmem:[#allocation3 + $0x5c] sm:$0xff]  ;;  %4981 = vmatprep.mubr.msk.bf16.mxu1 %vm5367_vm4, %v6348_v19 }
 0x293   :  { %v2302_v63 = vpack.c.bf16 %v2294_v25, %v2293_v4  ;;  %v2258_v7 = vld [vmem:[#allocation3 + $0x60] sm:$0xff] }
 0x294   :  { %v2614_v27 = vpack.c.bf16 %v2258_v7, %v2257_v46 }
 0x295   :  { %4934 = vmatmul.mubr.bf16.gmra.mxu0 %v2302_v63 }
 0x296   :  { %v2259_v17 = vld [vmem:[#allocation3 + $0x68] sm:$0xff]  ;;  %4937 = vmatprep.mubr.msk.bf16.mxu0 %vm5367_vm4, %v6348_v19  ;;  %v2608_v36 = vld [vmem:[#allocation3 + $0x70] sm:$0xff] }
 0x297   :  { %v2266_v3 = vpack.c.bf16 %v2259_v17, %v2258_v7  ;;  %v2295_v38 = vld [vmem:[#allocation3 + $0x64] sm:$0xff]  ;;  %v2296_v14 = vld [vmem:[#allocation3 + $0x6c] sm:$0xff]  ;;  %v2615_v30 = vpack.c.bf16 %v2608_v36, %v2259_v17 }
 0x298   :  { %v2303_v6 = vpack.c.bf16 %v2296_v14, %v2295_v38 }
 0x299   :  { %4982 = vmatmul.mubr.bf16.gmra.mxu1 %v2266_v3 }
 0x29a   :  { %5037 = vmatprep.mubr.msk.bf16.mxu1 %vm5367_vm4, %v6348_v19 }
 0x29d   :  { %4938 = vmatmul.mubr.bf16.gmra.mxu0 %v2303_v6 }
 0x29e   :  { %5001 = vmatprep.mubr.msk.bf16.mxu0 %vm5367_vm4, %v6348_v19 }
 0x2a5   :  { %5002 = vmatmul.mubr.bf16.vlgmr.msra.gmra.mxu0 %v2609_v23 }
 0x2a6   :  { %5005 = vmatprep.mubr.msk.bf16.mxu0 %vm5367_vm4, %v6348_v19  ;;  %5066 = vmatpush3.bf16.msra.mxu0 %v5317_v62  ;;  %v6721_v62 = vld [vmem:[%s7060_s6] ss:$0 sm:$0xff] }
 0x2a7   :  { %5067 = vmatprep.subr.bf16.mxu0 %v6348_v19 }
 0x2aa   :  { %5068 = vmatpush3.bf16.msra.mxu0 %v5318_v55 }
 0x2ab   :  { %5069 = vmatprep.subr.bf16.mxu0 %v6348_v19 }
 0x2ad   :  { %5006 = vmatmul.mubr.bf16.gmra.mxu0 %v2610_v21 }
 0x2ae   :  { %5009 = vmatprep.mubr.msk.bf16.mxu0 %vm5367_vm4, %v6348_v19  ;;  %5070 = vmatpush3.bf16.msra.mxu0 %v5320_v58 }
 0x2af   :  { %5071 = vmatprep.subr.bf16.mxu0 %v6348_v19 }
 0x2b2   :  { %5072 = vmatpush3.bf16.msra.mxu0 %v5321_v24 }
 0x2b5   :  { %5010 = vmatmul.mubr.bf16.gmra.mxu0 %v2611_v35 }
 0x2b6   :  { %5013 = vmatprep.mubr.msk.bf16.mxu0 %vm5367_vm4, %v6348_v19 }
 0x2bd   :  { %5014 = vmatmul.mubr.bf16.gmra.mxu0 %v2612_v52 }
 0x2be   :  { %5017 = vmatprep.mubr.msk.bf16.mxu0 %vm5367_vm4, %v6348_v19 }
 0x2c5   :  { %5018 = vmatmul.mubr.bf16.gmra.mxu0 %v2613_v60 }
 0x2c6   :  { %5021 = vmatprep.mubr.msk.bf16.mxu0 %vm5367_vm4, %v6348_v19 }
 0x2cd   :  { %5022 = vmatmul.mubr.bf16.gmra.mxu0 %v2614_v27 }
 0x2ce   :  { %5025 = vmatprep.mubr.msk.bf16.mxu0 %vm5367_vm4, %v6348_v19 }
 0x2d5   :  { %5026 = vmatmul.mubr.bf16.gmra.mxu0 %v2615_v30 }
 0x2d6   :  { %5073 = vmatprep.mubr.msk.bf16.mxu0 %vm5367_vm4, %v6348_v19 }
 0x329   :  { %v2540_v48 = vpop.f32.mrf.mxu1 }
 0x32b   :  { %v4959_v59 = vpop.f32.mrf.mxu1 }
 0x32d   :  { %v2403_v41 = vpop.f32.mrf.mxu0  ;;  %v2543_v15 = vpop.f32.mrf.mxu1 }
 0x32e   :  { %v2541_v37 = vadd.f32 %v2540_v48, %v2403_v41 }
 0x32f   :  { %v4915_v61 = vpop.f32.mrf.mxu0  ;;  %v4960_v8 = vpop.f32.mrf.mxu1 }
 0x331   :  { %v2406_v54 = vpop.f32.mrf.mxu0  ;;  %v2548_v12 = vpop.f32.mrf.mxu1 }
 0x332   :  { %v2544_v58 = vadd.f32 %v2543_v15, %v2406_v54 }
 0x333   :  { %v4916_v51 = vpop.f32.mrf.mxu0  ;;  %v4963_v44 = vpop.f32.mrf.mxu1 }
 0x335   :  { %v2411_v13 = vpop.f32.mrf.mxu0  ;;  %v6676_v29 = vpop.f32.mrf.mxu1 }
 0x336   :  { %v2549_v51 = vadd.f32 %v2548_v12, %v2411_v13 }
 0x337   :  { %v4919_v32 = vpop.f32.mrf.mxu0  ;;  %v4964_v53 = vpop.f32.mrf.mxu1 }
 0x339   :  { %v2414_v56 = vpop.f32.mrf.mxu0  ;;  %v6678_v18 = vpop.f32.mrf.mxu1 }
 0x33b   :  { %v4920_v45 = vpop.f32.mrf.mxu0  ;;  %v4967_v10 = vpop.f32.mrf.mxu1 }
 0x33c   :  { %v2552_v10 = vadd.f32 %v6676_v29, %v2414_v56 }
 0x33d   :  { %v6680_v11 = vpop.f32.mrf.mxu0  ;;  %v6682_v5 = vpop.f32.mrf.mxu1 }
 0x33f   :  { %v4923_v0 = vpop.f32.mrf.mxu0  ;;  %v4968_v22 = vpop.f32.mrf.mxu1 }
 0x341   :  { %v6684_v43 = vpop.f32.mrf.mxu0  ;;  %v6686_v50 = vpop.f32.mrf.mxu1 }
 0x343   :  { %v4924_v2 = vpop.f32.mrf.mxu0  ;;  %v4971_v40 = vpop.f32.mrf.mxu1 }
 0x345   :  { %v6688_v49 = vpop.f32.mrf.mxu0  ;;  %v6690_v16 = vpop.f32.mrf.mxu1 }
 0x347   :  { %v4927_v9 = vpop.f32.mrf.mxu0  ;;  %v4972_v39 = vpop.f32.mrf.mxu1 }
 0x348   :  { %v2906_v39 = vpop.permute.xlu0 %2905 }
 0x349   :  { %v6692_v28 = vpop.f32.mrf.mxu0  ;;  %v6694_v31 = vpop.f32.mrf.mxu1 }
 0x34b   :  { %v4928_v57 = vpop.f32.mrf.mxu0  ;;  %v4975_v47 = vpop.f32.mrf.mxu1 }
 0x34c   :  { %v2557_v57 = vadd.f32 %v6678_v18, %v6680_v11 }
 0x34d   :  { %v6696_v26 = vpop.f32.mrf.mxu0  ;;  %v6698_v20 = vpop.f32.mrf.mxu1 }
 0x34f   :  { %v4931_v46 = vpop.f32.mrf.mxu0  ;;  %v4976_v42 = vpop.f32.mrf.mxu1 }
 0x351   :  { %v6700_v4 = vpop.f32.mrf.mxu0  ;;  %v6702_v25 = vpop.f32.mrf.mxu1 }
 0x353   :  { %v4932_v63 = vpop.f32.mrf.mxu0  ;;  %v4979_v7 = vpop.f32.mrf.mxu1 }
 0x355   :  { %v6704_v17 = vpop.f32.mrf.mxu0  ;;  %v6706_v3 = vpop.f32.mrf.mxu1 }
 0x357   :  { %v4935_v38 = vpop.f32.mrf.mxu0  ;;  %v4980_v14 = vpop.f32.mrf.mxu1 }
 0x359   :  { %v6708_v6 = vpop.f32.mrf.mxu0  ;;  %v6710_v23 = vpop.f32.mrf.mxu1 }
 0x35b   :  { %v4936_v21 = vpop.f32.mrf.mxu0  ;;  %v4983_v35 = vpop.f32.mrf.mxu1 }
 0x35c   :  { %v2911_v21 = vpop.permute.xlu1 %2910  ;;  %v2560_v35 = vadd.f32 %v6682_v5, %v6684_v43 }
 0x35d   :  { %v6712_v52 = vpop.f32.mrf.mxu0  ;;  %v6714_v60 = vpop.f32.mrf.mxu1 }
 0x35f   :  { %v4939_v27 = vpop.f32.mrf.mxu0  ;;  %v4984_v36 = vpop.f32.mrf.mxu1 }
 0x361   :  { %v6716_v34 = vpop.f32.mrf.mxu0 }
 0x363   :  { %v4940_v30 = vpop.f32.mrf.mxu0 }
 0x365   :  { %v2715_v33 = vpop.f32.mrf.mxu0 }
 0x366   :  { %v2770_v55 = vadd.f32 %v2715_v33, %v2541_v37 }
 0x367   :  { %v5003_v1 = vpop.f32.mrf.mxu0 }
 0x368   :  { %v2791_v24 = vadd.f32 %v6721_v62, %v2770_v55 }
 0x369   :  { %v2718_v59 = vpop.f32.mrf.mxu0 }
 0x36a   :  { %v2771_v61 = vadd.f32 %v2718_v59, %v2544_v58  ;;  %v2805_v44 = vmax.f32 %v2791_v24, 0.0  ;;  %v2916_v58 = vpop.permute.xlu0 %2915  ;;  %v2565_v24 = vadd.f32 %v6686_v50, %v6688_v49 }
 0x36b   :  { %v5004_v8 = vpop.f32.mrf.mxu0 }
 0x36c   :  { %v2792_v32 = vadd.f32 %v6721_v62, %v2771_v61  ;;  %v2834_v0 = vrot.slane %v2805_v44, 4 }
 0x36d   :  { %v2723_v53 = vpop.f32.mrf.mxu0 }
 0x36e   :  { %v2806_v48 = vmax.f32 %v2792_v32, 0.0  ;;  %v2772_v41 = vadd.f32 %v2723_v53, %v2549_v51 }
 0x36f   :  { %v5007_v45 = vpop.f32.mrf.mxu0 }
 0x370   :  { %v2835_v22 = vrot.slane %v2806_v48, 4  ;;  %v2793_v15 = vadd.f32 %v6721_v62, %v2772_v41  ;;  %v2568_v41 = vadd.f32 %v6690_v16, %v6692_v28  ;;  %v2573_v16 = vadd.f32 %v6694_v31, %v6696_v26 }
 0x371   :  { %v2726_v54 = vpop.f32.mrf.mxu0 }
 0x372   :  { %v2836_v2 = vsel %vm2833_vm6, %v2834_v0, %v2835_v22  ;;  %v2807_v40 = vmax.f32 %v2793_v15, 0.0  ;;  %v2773_v9 = vadd.f32 %v2726_v54, %v2552_v10 }
 0x373   :  { %v2875_v12 = vmax.f32 %v2805_v44, %v2836_v2  ;;  %v5008_v13 = vpop.f32.mrf.mxu0 }
 0x374   :  { %v2837_v47 = vrot.slane %v2807_v40, 4  ;;  %v2794_v46 = vadd.f32 %v6721_v62, %v2773_v9  ;;  %v2926_v13 = vpop.permute.xlu0 %2925 }
 0x375   :  { %v2973_v42 = vmul.f32 %v2906_v39, %v2875_v12  ;;  %v2731_v29 = vpop.f32.mrf.mxu0 }
 0x376   :  { %v2838_v56 = vsel %vm2833_vm6, %v2835_v22, %v2837_v47  ;;  %v2808_v63 = vmax.f32 %v2794_v46, 0.0  ;;  %v2774_v7 = vadd.f32 %v2731_v29, %v2557_v57 }
 0x377   :  { %2987 = vst.msk [vmem:[#allocation4 + $0x4] sm:$0xff] %vm100_vm5, %v2973_v42  ;;  %v2876_v38 = vmax.f32 %v2806_v48, %v2838_v56  ;;  %v5011_v14 = vpop.f32.mrf.mxu0  ;;  %v2921_v48 = vpop.permute.xlu1 %2920 }
 0x378   :  { %v2839_v27 = vrot.slane %v2808_v63, 4  ;;  %v2795_v18 = vadd.f32 %v6721_v62, %v2774_v7  ;;  %v2576_v14 = vadd.f32 %v6698_v20, %v6700_v4  ;;  %v5323_v20 = vld [vmem:[%s7061_s7 + $0x50] sm:$0xff]  }
 0x379   :  { %v2974_v11 = vmul.f32 %v2911_v21, %v2876_v38  ;;  %v2734_v36 = vpop.f32.mrf.mxu0 }
 0x37a   :  { %v2840_v30 = vsel %vm2833_vm6, %v2837_v47, %v2839_v27  ;;  %v2809_v37 = vmax.f32 %v2795_v18, 0.0  ;;  %v2775_v33 = vadd.f32 %v2734_v36, %v2560_v35 }
 0x37b   :  { %2988 = vst.msk [vmem:[#allocation4 + $0xc] sm:$0xff] %vm100_vm5, %v2974_v11  ;;  %v2877_v55 = vmax.f32 %v2807_v40, %v2840_v30  ;;  %v5012_v1 = vpop.f32.mrf.mxu0  ;;  %v2931_v38 = vpop.permute.xlu1 %2930 }
 0x37c   :  { %v2841_v59 = vrot.slane %v2809_v37, 4  ;;  %v2796_v5 = vadd.f32 %v6721_v62, %v2775_v33  ;;  %v2936_v1 = vpop.permute.xlu0 %2935 }
 0x37d   :  { %v2975_v43 = vmul.f32 %v2916_v58, %v2877_v55  ;;  %v2739_v61 = vpop.f32.mrf.mxu0  ;;  %v2581_v58 = vadd.f32 %v6702_v25, %v6704_v17  ;;  %v5324_v25 = vld [vmem:[%s7061_s7 + $0x48] sm:$0xff]  }
 0x37e   :  { %v2842_v8 = vsel %vm2833_vm6, %v2839_v27, %v2841_v59  ;;  %v2810_v51 = vmax.f32 %v2796_v5, 0.0  ;;  %v2776_v44 = vadd.f32 %v2739_v61, %v2565_v24  ;;  %v3002_v54 = vld [vmem:[#allocation4] sm:$0xff] }
 0x37f   :  { %2989 = vst.msk [vmem:[#allocation4 + $0x14] sm:$0xff] %vm100_vm5, %v2975_v43  ;;  %v2878_v32 = vmax.f32 %v2808_v63, %v2842_v8  ;;  %v5015_v53 = vpop.f32.mrf.mxu0  ;;  %v5322_v63 = vld [vmem:[%s7061_s7 + $0x58] sm:$0xff]  }
 0x380   :  { %v2843_v45 = vrot.slane %v2810_v51, 4  ;;  %v2797_v50 = vadd.f32 %v6721_v62, %v2776_v44 }
 0x381   :  { %v2976_v49 = vmul.f32 %v2921_v48, %v2878_v32  ;;  %v2742_v10 = vpop.f32.mrf.mxu0  ;;  %v2941_v48 = vpop.permute.xlu1 %2940 }
 0x382   :  { %v2844_v0 = vsel %vm2833_vm6, %v2841_v59, %v2843_v45  ;;  %v2811_v22 = vmax.f32 %v2797_v50, 0.0  ;;  %v2777_v15 = vadd.f32 %v2742_v10, %v2568_v41  ;;  %v3003_v2 = vld [vmem:[#allocation4 + $0x8] sm:$0xff]  ;;  %v2584_v41 = vadd.f32 %v6706_v3, %v6708_v6  ;;  %v5325_v3 = vld [vmem:[%s7061_s7 + $0x40] sm:$0xff]  }
 0x383   :  { %2990 = vst.msk [vmem:[#allocation4 + $0x1c] sm:$0xff] %vm100_vm5, %v2976_v49  ;;  %v2879_v40 = vmax.f32 %v2809_v37, %v2844_v0  ;;  %v5016_v9 = vpop.f32.mrf.mxu0  ;;  %v3015_v12 = vpack.c.bf16 %v3003_v2, %v3002_v54 }
 0x384   :  { %v2845_v28 = vrot.slane %v2811_v22, 4  ;;  %v2798_v39 = vadd.f32 %v6721_v62, %v2777_v15  ;;  %v2946_v9 = vpop.permute.xlu0 %2945 }
 0x385   :  { %v2977_v57 = vmul.f32 %v2926_v13, %v2879_v40  ;;  %v2747_v47 = vpop.f32.mrf.mxu0  ;;  %5074 = vmatmul.mubr.msk.bf16.vlgmr.msra.gmra.mxu0 %vm100_vm5, %v3015_v12  ;;  %v2589_v12 = vadd.f32 %v6710_v23, %v6712_v52 }
 0x386   :  { %v2846_v46 = vsel %vm2833_vm6, %v2843_v45, %v2845_v28  ;;  %v2812_v42 = vmax.f32 %v2798_v39, 0.0  ;;  %v2778_v29 = vadd.f32 %v2747_v47, %v2573_v16  ;;  %v3004_v56 = vld [vmem:[#allocation4 + $0x10] sm:$0xff]  ;;  %5077 = vmatprep.mubr.msk.bf16.mxu0 %vm5367_vm4, %v6348_v19 }
 0x387   :  { %2991 = vst.msk [vmem:[#allocation4 + $0x24] sm:$0xff] %vm100_vm5, %v2977_v57  ;;  %v2880_v31 = vmax.f32 %v2810_v51, %v2846_v46  ;;  %v5019_v26 = vpop.f32.mrf.mxu0  ;;  %v3031_v7 = vpack.c.bf16 %v3004_v56, %v3003_v2 }
 0x388   :  { %v2847_v21 = vrot.slane %v2812_v42, 4  ;;  %v2799_v35 = vadd.f32 %v6721_v62, %v2778_v29  ;;  %v2951_v29 = vpop.permute.xlu1 %2950 }
 0x389   :  { %v2978_v27 = vmul.f32 %v2931_v38, %v2880_v31  ;;  %v2750_v18 = vpop.f32.mrf.mxu0  ;;  %5038 = vmatmul.mubr.msk.bf16.vlgmr.msra.gmra.mxu1 %vm100_vm5, %v3031_v7 }
 0x38a   :  { %v2848_v11 = vsel %vm2833_vm6, %v2845_v28, %v2847_v21  ;;  %v2813_v36 = vmax.f32 %v2799_v35, 0.0  ;;  %v2779_v30 = vadd.f32 %v2750_v18, %v2576_v14  ;;  %5102 = vmatpush3.bf16.msra.mxu1 %v5322_v63  ;;  %v3005_v37 = vld [vmem:[#allocation4 + $0x18] sm:$0xff]  ;;  %5041 = vmatprep.mubr.msk.bf16.mxu1 %vm5367_vm4, %v6348_v19  ;;  %v2592_v63 = vadd.f32 %v6714_v60, %v6716_v34  ;;  %v2956_v34 = vpop.permute.xlu0 %2955 }
 0x38b   :  { %2992 = vst.msk [vmem:[#allocation4 + $0x2c] sm:$0xff] %vm100_vm5, %v2978_v27  ;;  %v2881_v4 = vmax.f32 %v2811_v22, %v2848_v11  ;;  %v5020_v33 = vpop.f32.mrf.mxu0  ;;  %v6770_v55 = vpack.c.bf16 %v3005_v37, %v3004_v56  ;;  %5103 = vmatprep.subr.bf16.mxu1 %v6348_v19 }
 0x38c   :  { %v2849_v24 = vrot.slane %v2813_v36, 4  ;;  %v2800_v59 = vadd.f32 %v6721_v62, %v2779_v30 }
 0x38d   :  { %v2979_v5 = vmul.f32 %v2936_v1, %v2881_v4  ;;  %v2755_v43 = vpop.f32.mrf.mxu0  ;;  %5078 = vmatmul.mubr.msk.bf16.gmra.mxu0 %vm100_vm5, %v6770_v55 }
 0x38e   :  { %v2850_v61 = vsel %vm2833_vm6, %v2847_v21, %v2849_v24  ;;  %v2814_v8 = vmax.f32 %v2800_v59, 0.0  ;;  %v2780_v51 = vadd.f32 %v2755_v43, %v2581_v58  ;;  %v3006_v44 = vld [vmem:[#allocation4 + $0x20] sm:$0xff]  ;;  %5081 = vmatprep.mubr.msk.bf16.mxu0 %vm5367_vm4, %v6348_v19  ;;  %5104 = vmatpush3.bf16.msra.mxu1 %v5323_v20 }
 0x38f   :  { %2993 = vst.msk [vmem:[#allocation4 + $0x34] sm:$0xff] %vm100_vm5, %v2979_v5  ;;  %v2882_v17 = vmax.f32 %v2812_v42, %v2850_v61  ;;  %v5023_v32 = vpop.f32.mrf.mxu0  ;;  %v3032_v53 = vpack.c.bf16 %v3006_v44, %v3005_v37  ;;  %5105 = vmatprep.subr.bf16.mxu1 %v6348_v19  ;;  %v2961_v37 = vpop.permute.xlu1 %2960 }
 0x390   :  { %v2851_v45 = vrot.slane %v2814_v8, 4  ;;  %v2801_v50 = vadd.f32 %v6721_v62, %v2780_v51 }
 0x391   :  { %v2980_v49 = vmul.f32 %v2941_v48, %v2882_v17  ;;  %v2758_v10 = vpop.f32.mrf.mxu0  ;;  %5042 = vmatmul.mubr.msk.bf16.gmra.mxu1 %vm100_vm5, %v3032_v53 }
 0x392   :  { %v2852_v0 = vsel %vm2833_vm6, %v2849_v24, %v2851_v45  ;;  %v2815_v22 = vmax.f32 %v2801_v50, 0.0  ;;  %v2781_v15 = vadd.f32 %v2758_v10, %v2584_v41  ;;  %v3007_v54 = vld [vmem:[#allocation4 + $0x28] sm:$0xff]  ;;  %5045 = vmatprep.mubr.msk.bf16.mxu1 %vm5367_vm4, %v6348_v19  ;;  %5106 = vmatpush3.bf16.msra.mxu1 %v5324_v25  ;;  %v2966_v25 = vpop.permute.xlu0 %2965 }
 0x393   :  { %2994 = vst.msk [vmem:[#allocation4 + $0x3c] sm:$0xff] %vm100_vm5, %v2980_v49  ;;  %v2883_v6 = vmax.f32 %v2813_v36, %v2852_v0  ;;  %v5024_v2 = vpop.f32.mrf.mxu0  ;;  %v6797_v40 = vpack.c.bf16 %v3007_v54, %v3006_v44  ;;  %5107 = vmatprep.subr.bf16.mxu1 %v6348_v19 }
 0x394   :  { %v2853_v13 = vrot.slane %v2815_v22, 4  ;;  %v2802_v16 = vadd.f32 %v6721_v62, %v2781_v15  ;;  %v3325_v15 = vld [vmem:[#allocation4 + $0x70] sm:$0xff]  ;;  %v5329_v2 = vld [vmem:[%s7063_s9] sm:$0xff]  }
 0x395   :  { %v2981_v28 = vmul.f32 %v2946_v9, %v2883_v6  ;;  %v2763_v39 = vpop.f32.mrf.mxu0  ;;  %5082 = vmatmul.mubr.msk.bf16.gmra.mxu0 %vm100_vm5, %v6797_v40  ;;  %v5327_v6 = vld [vmem:[%s7063_s9 + $0x8] sm:$0xff]  }
 0x396   :  { %v2854_v57 = vsel %vm2833_vm6, %v2851_v45, %v2853_v13  ;;  %v2816_v47 = vmax.f32 %v2802_v16, 0.0  ;;  %v2782_v46 = vadd.f32 %v2763_v39, %v2589_v12  ;;  %v3008_v42 = vld [vmem:[#allocation4 + $0x30] sm:$0xff]  ;;  %5085 = vmatprep.mubr.msk.bf16.mxu0 %vm5367_vm4, %v6348_v19  ;;  %5108 = vmatpush3.bf16.msra.mxu1 %v5325_v3  ;;  %v6886_v9 = vld [vmem:[%s7063_s9 + $0x28] sm:$0xff]  }
 0x397   :  { %2995 = vst.msk [vmem:[#allocation4 + $0x44] sm:$0xff] %vm100_vm5, %v2981_v28  ;;  %v2884_v23 = vmax.f32 %v2814_v8, %v2854_v57  ;;  %v5027_v52 = vpop.f32.mrf.mxu0  ;;  %v3033_v56 = vpack.c.bf16 %v3008_v42, %v3007_v54  ;;  %v2971_v8 = vpop.permute.xlu1 %2970  ;;  %v3332_v54 = vpack.c.bf16 %v3325_v15, %v3325_v15  ;;  %v5326_v3 = vld [vmem:[%s7063_s9 + $0x18] sm:$0xff]   ;;  %5149 = vmatprep.subr.bf16.mxu1 %v5327_v6 }
 0x398   :  { %v2855_v31 = vrot.slane %v2816_v47, 4  ;;  %v2803_v26 = vadd.f32 %v6721_v62, %v2782_v46  ;;  %5137 = vmatprep.subr.bf16.mxu0 %v5326_v3 }
 0x399   :  { %v2982_v7 = vmul.f32 %v2951_v29, %v2884_v23  ;;  %v2766_v38 = vpop.f32.mrf.mxu0  ;;  %5046 = vmatmul.mubr.msk.bf16.gmra.mxu1 %vm100_vm5, %v3033_v56  ;;  %5138 = vmatpush3.bf16.msra.mxu0 %v5326_v3 }
 0x39a   :  { %v2856_v14 = vsel %vm2833_vm6, %v2853_v13, %v2855_v31  ;;  %v2817_v21 = vmax.f32 %v2803_v26, 0.0  ;;  %v2783_v35 = vadd.f32 %v2766_v38, %v2592_v63  ;;  %v3009_v27 = vld [vmem:[#allocation4 + $0x38] sm:$0xff]  ;;  %5049 = vmatprep.mubr.msk.bf16.mxu1 %vm5367_vm4, %v6348_v19 }
 0x39b   :  { %2996 = vst.msk [vmem:[#allocation4 + $0x4c] sm:$0xff] %vm100_vm5, %v2982_v7  ;;  %v2885_v18 = vmax.f32 %v2815_v22, %v2856_v14  ;;  %v5028_v11 = vpop.f32.mrf.mxu0  ;;  %v3018_v60 = vpack.c.bf16 %v3009_v27, %v3008_v42 }
 0x39c   :  { %v2857_v36 = vrot.slane %v2817_v21, 4  ;;  %v2804_v30 = vadd.f32 %v6721_v62, %v2783_v35 }
 0x39d   :  { %v2983_v20 = vmul.f32 %v2956_v34, %v2885_v18  ;;  %5086 = vmatmul.mubr.msk.bf16.gmra.mxu0 %vm100_vm5, %v3018_v60 }
 0x39e   :  { %v2858_v4 = vsel %vm2833_vm6, %v2855_v31, %v2857_v36  ;;  %v2818_v33 = vmax.f32 %v2804_v30, 0.0  ;;  %v3010_v1 = vld [vmem:[#allocation4 + $0x40] sm:$0xff]  ;;  %5089 = vmatprep.mubr.msk.bf16.mxu0 %vm5367_vm4, %v6348_v19 }
 0x39f   :  { %2997 = vst.msk [vmem:[#allocation4 + $0x54] sm:$0xff] %vm100_vm5, %v2983_v20  ;;  %v2886_v58 = vmax.f32 %v2816_v47, %v2858_v4  ;;  %v3034_v24 = vpack.c.bf16 %v3010_v1, %v3009_v27 }
 0x3a0   :  { %v2859_v59 = vrot.slane %v2818_v33, 4 }
 0x3a1   :  { %v2984_v5 = vmul.f32 %v2961_v37, %v2886_v58  ;;  %5050 = vmatmul.mubr.msk.bf16.gmra.mxu1 %vm100_vm5, %v3034_v24 }
 0x3a2   :  { %v2860_v62 = vsel %vm2833_vm6, %v2857_v36, %v2859_v59  ;;  %v2888_v43 = vmax.f32 %v2818_v33, %v2859_v59  ;;  %v3011_v61 = vld [vmem:[#allocation4 + $0x48] sm:$0xff]  ;;  %5053 = vmatprep.mubr.msk.bf16.mxu1 %vm5367_vm4, %v6348_v19 }
 0x3a3   :  { %2998 = vst.msk [vmem:[#allocation4 + $0x5c] sm:$0xff] %vm100_vm5, %v2984_v5  ;;  %v2887_v51 = vmax.f32 %v2817_v21, %v2860_v62  ;;  %v3019_v44 = vpack.c.bf16 %v3011_v61, %v3010_v1 }
 0x3a4   :  { %v2986_v17 = vmul.f32 %v2971_v8, %v2888_v43 }
 0x3a5   :  { %v2985_v32 = vmul.f32 %v2966_v25, %v2887_v51  ;;  %5090 = vmatmul.mubr.msk.bf16.gmra.mxu0 %vm100_vm5, %v3019_v44 }
 0x3a6   :  { %3001 = vst.msk [vmem:[#allocation4 + $0x6c] sm:$0xf] %vm3000_vm7, %v2986_v17  ;;  %v3012_v53 = vld [vmem:[#allocation4 + $0x50] sm:$0xff]  ;;  %5093 = vmatprep.mubr.msk.bf16.mxu0 %vm5367_vm4, %v6348_v19 }
 0x3a7   :  { %2999 = vst.msk [vmem:[#allocation4 + $0x64] sm:$0xff] %vm100_vm5, %v2985_v32  ;;  %v3035_v48 = vpack.c.bf16 %v3012_v53, %v3011_v61 }
 0x3a9   :  { %5054 = vmatmul.mubr.msk.bf16.gmra.mxu1 %vm100_vm5, %v3035_v48 }
 0x3aa   :  { %v3013_v41 = vld [vmem:[#allocation4 + $0x58] sm:$0xff]  ;;  %5057 = vmatprep.mubr.msk.bf16.mxu1 %vm5367_vm4, %v6348_v19 }
 0x3ab   :  { %v3020_v45 = vpack.c.bf16 %v3013_v41, %v3012_v53 }
 0x3ad   :  { %5094 = vmatmul.mubr.msk.bf16.gmra.mxu0 %vm100_vm5, %v3020_v45 }
 0x3ae   :  { %v3014_v50 = vld [vmem:[#allocation4 + $0x60] sm:$0xff]  ;;  %5097 = vmatprep.mubr.msk.bf16.mxu0 %vm5367_vm4, %v6348_v19  ;;  %v3030_v0 = vld [vmem:[#allocation4 + $0x68] sm:$0xff] }
 0x3af   :  { %v3036_v49 = vpack.c.bf16 %v3014_v50, %v3013_v41  ;;  %v3021_v10 = vpack.c.bf16 %v3014_v50, %v3014_v50  ;;  %v3037_v22 = vpack.c.bf16 %v3030_v0, %v3030_v0 }
 0x3b1   :  { %5058 = vmatmul.mubr.msk.bf16.gmra.mxu1 %vm100_vm5, %v3036_v49 }
 0x3b2   :  { %5061 = vmatprep.mubr.msk.bf16.mxu1 %vm5367_vm4, %v6348_v19 }
 0x3b5   :  { %5098 = vmatmul.mubr.msk.bf16.gmra.mxu0 %vm100_vm5, %v3021_v10 }
 0x3b9   :  { %5062 = vmatmul.mubr.msk.bf16.gmra.mxu1 %vm100_vm5, %v3037_v22 }
 0x3ba   :  { %5109 = vmatprep.mubr.msk.bf16.mxu1 %vm5367_vm4, %v6348_v19 }
 0x3c1   :  { %5110 = vmatmul.mubr.msk.bf16.vlgmr.msra.gmra.mxu1 %vm100_vm5, %v6770_v55  ;;  %v3331_v55 = vpack.c.bf16 %v3030_v0, %v3014_v50 }
 0x3c2   :  { %5113 = vmatprep.mubr.msk.bf16.mxu1 %vm5367_vm4, %v6348_v19  ;;  %5150 = vmatpush3.bf16.msra.mxu1 %v5327_v6 }
 0x3c3   :  { %5151 = vmatprep.subr.bf16.mxu1 %v5329_v2 }
 0x3c6   :  { %5152 = vmatpush3.bf16.msra.mxu1 %v5329_v2 }
 0x3c9   :  { %5114 = vmatmul.mubr.msk.bf16.gmra.mxu1 %vm100_vm5, %v6797_v40  ;;  %v6881_v40 = vld [vmem:[%s7063_s9 + $0x38] sm:$0xff]  }
 0x3ca   :  { %5117 = vmatprep.mubr.msk.bf16.mxu1 %vm5367_vm4, %v6348_v19  ;;  %5173 = vmatprep.subr.bf16.mxu1 %v6881_v40 }
 0x3d1   :  { %5118 = vmatmul.mubr.msk.bf16.gmra.mxu1 %vm100_vm5, %v3018_v60 }
 0x3d2   :  { %5121 = vmatprep.mubr.msk.bf16.mxu1 %vm5367_vm4, %v6348_v19 }
 0x3d9   :  { %5122 = vmatmul.mubr.msk.bf16.gmra.mxu1 %vm100_vm5, %v3019_v44 }
 0x3da   :  { %5125 = vmatprep.mubr.msk.bf16.mxu1 %vm5367_vm4, %v6348_v19 }
 0x3e1   :  { %5126 = vmatmul.mubr.msk.bf16.gmra.mxu1 %vm100_vm5, %v3020_v45 }
 0x3e2   :  { %5129 = vmatprep.mubr.msk.bf16.mxu1 %vm5367_vm4, %v6348_v19 }
 0x3e9   :  { %5130 = vmatmul.mubr.msk.bf16.gmra.mxu1 %vm100_vm5, %v3331_v55 }
 0x3ea   :  { %5133 = vmatprep.mubr.msk.bf16.mxu1 %vm5367_vm4, %v6348_v19  ;;  %v5328_v19 = vld [vmem:[%s7063_s9 + $0x10] sm:$0xff]  }
 0x3eb   :  { %5139 = vmatprep.subr.bf16.mxu0 %v5328_v19 }
 0x3ec   :  { %5140 = vmatpush3.bf16.msra.mxu0 %v5328_v19  ;;  %v6929_v19 = vld [vmem:[%s7062_s8] ss:$0 sm:$0xff] }
 0x3ed   :  { %5161 = vmatprep.subr.bf16.mxu0 %v6886_v9 }
 0x3f1   :  { %5134 = vmatmul.mubr.msk.bf16.gmra.mxu1 %vm100_vm5, %v3332_v54 }
 0x445   :  { %v3259_v12 = vpop.f32.mrf.mxu0 }
 0x447   :  { %v5075_v13 = vpop.f32.mrf.mxu0 }
 0x449   :  { %v3126_v16 = vpop.f32.mrf.mxu1  ;;  %v3262_v28 = vpop.f32.mrf.mxu0 }
 0x44a   :  { %v3260_v54 = vadd.f32 %v3259_v12, %v3126_v16 }
 0x44b   :  { %v5039_v39 = vpop.f32.mrf.mxu1  ;;  %v5076_v57 = vpop.f32.mrf.mxu0 }
 0x44d   :  { %v3129_v47 = vpop.f32.mrf.mxu1  ;;  %v3267_v46 = vpop.f32.mrf.mxu0 }
 0x44e   :  { %v3263_v13 = vadd.f32 %v3262_v28, %v3129_v47 }
 0x44f   :  { %v5040_v42 = vpop.f32.mrf.mxu1  ;;  %v5079_v29 = vpop.f32.mrf.mxu0 }
 0x451   :  { %v3134_v23 = vpop.f32.mrf.mxu1  ;;  %v6890_v52 = vpop.f32.mrf.mxu0 }
 0x453   :  { %v5043_v56 = vpop.f32.mrf.mxu1  ;;  %v5080_v63 = vpop.f32.mrf.mxu0 }
 0x454   :  { %v3268_v56 = vadd.f32 %v3267_v46, %v3134_v23 }
 0x455   :  { %v3137_v31 = vpop.f32.mrf.mxu1  ;;  %v6892_v26 = vpop.f32.mrf.mxu0 }
 0x457   :  { %v5044_v7 = vpop.f32.mrf.mxu1  ;;  %v5083_v38 = vpop.f32.mrf.mxu0 }
 0x459   :  { %v6894_v14 = vpop.f32.mrf.mxu1  ;;  %v6896_v21 = vpop.f32.mrf.mxu0 }
 0x45a   :  { %v3276_v46 = vadd.f32 %v6892_v26, %v6894_v14 }
 0x45b   :  { %v5047_v35 = vpop.f32.mrf.mxu1  ;;  %v5084_v27 = vpop.f32.mrf.mxu0 }
 0x45c   :  { %v3271_v27 = vadd.f32 %v6890_v52, %v3137_v31 }
 0x45d   :  { %v6898_v18 = vpop.f32.mrf.mxu1  ;;  %v6900_v11 = vpop.f32.mrf.mxu0 }
 0x45e   :  { %v3279_v52 = vadd.f32 %v6896_v21, %v6898_v18 }
 0x45f   :  { %v5048_v60 = vpop.f32.mrf.mxu1  ;;  %v5087_v34 = vpop.f32.mrf.mxu0 }
 0x461   :  { %v6902_v36 = vpop.f32.mrf.mxu1  ;;  %v6904_v30 = vpop.f32.mrf.mxu0 }
 0x462   :  { %v3284_v21 = vadd.f32 %v6900_v11, %v6902_v36 }
 0x463   :  { %v5051_v37 = vpop.f32.mrf.mxu1  ;;  %v5088_v20 = vpop.f32.mrf.mxu0 }
 0x465   :  { %v6906_v4 = vpop.f32.mrf.mxu1  ;;  %v6908_v33 = vpop.f32.mrf.mxu0 }
 0x467   :  { %v5052_v1 = vpop.f32.mrf.mxu1  ;;  %v5091_v58 = vpop.f32.mrf.mxu0 }
 0x469   :  { %v6910_v24 = vpop.f32.mrf.mxu1  ;;  %v6912_v59 = vpop.f32.mrf.mxu0 }
 0x46b   :  { %v5055_v5 = vpop.f32.mrf.mxu1  ;;  %v5092_v62 = vpop.f32.mrf.mxu0 }
 0x46d   :  { %v6914_v43 = vpop.f32.mrf.mxu1  ;;  %v6916_v61 = vpop.f32.mrf.mxu0 }
 0x46f   :  { %v5056_v8 = vpop.f32.mrf.mxu1  ;;  %v5095_v51 = vpop.f32.mrf.mxu0 }
 0x470   :  { %v5332_v8 = vld [vmem:[%s7063_s9 + $0x30] sm:$0xff]  }
 0x471   :  { %v6918_v44 = vpop.f32.mrf.mxu1  ;;  %v6920_v25 = vpop.f32.mrf.mxu0 }
 0x473   :  { %v5059_v17 = vpop.f32.mrf.mxu1  ;;  %v5096_v32 = vpop.f32.mrf.mxu0 }
 0x475   :  { %v6922_v53 = vpop.f32.mrf.mxu1  ;;  %v3307_v48 = vpop.f32.mrf.mxu0 }
 0x477   :  { %v5060_v41 = vpop.f32.mrf.mxu1  ;;  %v5099_v45 = vpop.f32.mrf.mxu0 }
 0x478   :  { %v5335_v45 = vld [vmem:[%s7063_s9 + $0x58] sm:$0xff]  }
 0x479   :  { %v3174_v50 = vpop.f32.mrf.mxu1  ;;  %v3310_v49 = vpop.f32.mrf.mxu0 }
 0x47a   :  { %v6924_v10 = vadd.f32 %v3307_v48, %v3174_v50 }
 0x47b   :  { %v5063_v0 = vpop.f32.mrf.mxu1  ;;  %v5100_v22 = vpop.f32.mrf.mxu0 }
 0x47d   :  { %v3177_v55 = vpop.f32.mrf.mxu1 }
 0x47f   :  { %v5064_v15 = vpop.f32.mrf.mxu1 }
 0x481   :  { %v3421_v3 = vpop.f32.mrf.mxu1 }
 0x482   :  { %v3475_v6 = vadd.f32 %v3421_v3, %v3260_v54 }
 0x483   :  { %v5111_v2 = vpop.f32.mrf.mxu1 }
 0x484   :  { %v3495_v57 = vadd.f32 %v6929_v19, %v3475_v6  ;;  %v5333_v2 = vld [vmem:[%s7063_s9 + $0x20] sm:$0xff]  }
 0x485   :  { %v3424_v39 = vpop.f32.mrf.mxu1 }
 0x486   :  { %v3476_v42 = vadd.f32 %v3424_v39, %v3263_v13  ;;  %v3508_v38 = vmax.f32 %v3495_v57, 0.0 }
 0x487   :  { %v5112_v29 = vpop.f32.mrf.mxu1 }
 0x488   :  { %v3496_v63 = vadd.f32 %v6929_v19, %v3476_v42 }
 0x489   :  { %v3429_v7 = vpop.f32.mrf.mxu1 }
 0x48a   :  { %v3509_v12 = vmax.f32 %v3496_v63, 0.0  ;;  %v3477_v16 = vadd.f32 %v3429_v7, %v3268_v56  ;;  %v5334_v63 = vld [vmem:[%s7063_s9 + $0x48] sm:$0xff]  }
 0x48b   :  { %v5115_v35 = vpop.f32.mrf.mxu1 }
 0x48c   :  { %v3521_v60 = vpack.c.bf16 %v3509_v12, %v3508_v38  ;;  %v3497_v28 = vadd.f32 %v6929_v19, %v3477_v16  ;;  %v3300_v35 = vadd.f32 %v6916_v61, %v6918_v44 }
 0x48d   :  { %v3432_v34 = vpop.f32.mrf.mxu1 }
 0x48e   :  { %v3478_v47 = vadd.f32 %v3432_v34, %v3271_v27  ;;  %5153 = vmatprep.mubr.msk.bf16.mxu1 %vm3564_vm8, %v3521_v60  ;;  %v3510_v1 = vmax.f32 %v3497_v28, 0.0  ;;  %v3543_v17 = vrot.slane %v3521_v60, 4 }
 0x48f   :  { %v5116_v37 = vpop.f32.mrf.mxu1 }
 0x490   :  { %v3498_v23 = vadd.f32 %v6929_v19, %v3478_v47  ;;  %v3303_v37 = vadd.f32 %v6920_v25, %v6922_v53 }
 0x491   :  { %v3437_v20 = vpop.f32.mrf.mxu1 }
 0x492   :  { %v3511_v58 = vmax.f32 %v3498_v23, 0.0  ;;  %v3479_v5 = vadd.f32 %v3437_v20, %v3276_v46  ;;  %v5336_v23 = vld [vmem:[%s7063_s9 + $0x50] sm:$0xff]  }
 0x493   :  { %v5119_v62 = vpop.f32.mrf.mxu1 }
 0x494   :  { %v6941_v31 = vpack.c.bf16 %v3511_v58, %v3510_v1  ;;  %v3499_v26 = vadd.f32 %v6929_v19, %v3479_v5 }
 0x495   :  { %v3440_v51 = vpop.f32.mrf.mxu1 }
 0x496   :  { %v3480_v14 = vadd.f32 %v3440_v51, %v3279_v52  ;;  %5154 = vmatmul.mubr.msk.bf16.vlgmr.msra.gmra.mxu1 %vm3564_vm8, %v6941_v31  ;;  %v3544_v32 = vrot.slane %v6941_v31, 4  ;;  %v3512_v49 = vmax.f32 %v3499_v26, 0.0 }
 0x497   :  { %v5120_v48 = vpop.f32.mrf.mxu1  ;;  %5174 = vmatpush3.bf16.msra.mxu1 %v6881_v40  ;;  %v3287_v40 = vadd.f32 %v6904_v30, %v6906_v4  ;;  %v3292_v30 = vadd.f32 %v6908_v33, %v6910_v24  ;;  %v3295_v33 = vadd.f32 %v6912_v59, %v6914_v43 }
 0x498   :  { %v3500_v18 = vadd.f32 %v6929_v19, %v3480_v14  ;;  %v3545_v41 = vsel %vm2833_vm6, %v3543_v17, %v3544_v32  ;;  %5175 = vmatprep.subr.bf16.mxu1 %v5332_v8 }
 0x499   :  { %v3445_v50 = vpop.f32.mrf.mxu1  ;;  %5141 = vmatprep.mubr.msk.bf16.mxu0 %vm3564_vm8, %v3545_v41 }
 0x49a   :  { %v3513_v0 = vmax.f32 %v3500_v18, 0.0  ;;  %v3481_v22 = vadd.f32 %v3445_v50, %v3284_v21  ;;  %v5339_v50 = vld [vmem:[%s7065_s11 + $0x10] sm:$0xff]  }
 0x49b   :  { %v5123_v55 = vpop.f32.mrf.mxu1  ;;  %5176 = vmatpush3.bf16.msra.mxu1 %v5332_v8 }
 0x49c   :  { %v6961_v11 = vpack.c.bf16 %v3513_v0, %v3512_v49  ;;  %5197 = vmatprep.subr.bf16.mxu1 %v5335_v45  ;;  %v3501_v54 = vadd.f32 %v6929_v19, %v3481_v22  ;;  %v5340_v49 = vld [vmem:[%s7065_s11 + $0x8] sm:$0xff]   ;;  %v5341_v0 = vld [vmem:[%s7065_s11] sm:$0xff]  }
 0x49d   :  { %v3448_v36 = vpop.f32.mrf.mxu1 }
 0x49e   :  { %v3546_v15 = vrot.slane %v6961_v11, 4  ;;  %v3482_v3 = vadd.f32 %v3448_v36, %v3287_v40  ;;  %5157 = vmatprep.mubr.msk.bf16.mxu1 %vm3564_vm8, %v6961_v11  ;;  %v3514_v57 = vmax.f32 %v3501_v54, 0.0 }
 0x49f   :  { %v5124_v6 = vpop.f32.mrf.mxu1 }
 0x4a0   :  { %v3502_v4 = vadd.f32 %v6929_v19, %v3482_v3  ;;  %v3547_v13 = vsel %vm2833_vm6, %v3544_v32, %v3546_v15  ;;  %v5337_v32 = vld [vmem:[%s7063_s9 + $0x40] sm:$0xff]  }
 0x4a1   :  { %v3453_v39 = vpop.f32.mrf.mxu1  ;;  %5142 = vmatmul.mubr.msk.bf16.vlgmr.msra.gmra.mxu0 %vm3564_vm8, %v3547_v13 }
 0x4a2   :  { %v3515_v42 = vmax.f32 %v3502_v4, 0.0  ;;  %v3483_v29 = vadd.f32 %v3453_v39, %v3292_v30  ;;  %5162 = vmatpush3.bf16.msra.mxu0 %v6886_v9 }
 0x4a3   :  { %v5127_v56 = vpop.f32.mrf.mxu1  ;;  %5163 = vmatprep.subr.bf16.mxu0 %v5333_v2 }
 0x4a4   :  { %v6981_v24 = vpack.c.bf16 %v3515_v42, %v3514_v57  ;;  %v3503_v38 = vadd.f32 %v6929_v19, %v3483_v29 }
 0x4a5   :  { %v3456_v7 = vpop.f32.mrf.mxu1 }
 0x4a6   :  { %v3484_v12 = vadd.f32 %v3456_v7, %v3295_v33  ;;  %5158 = vmatmul.mubr.msk.bf16.gmra.mxu1 %vm3564_vm8, %v6981_v24  ;;  %v3548_v9 = vrot.slane %v6981_v24, 4  ;;  %5164 = vmatpush3.bf16.msra.mxu0 %v5333_v2  ;;  %v3516_v60 = vmax.f32 %v3503_v38, 0.0 }
 0x4a7   :  { %v5128_v16 = vpop.f32.mrf.mxu1  ;;  %5177 = vmatprep.mubr.msk.bf16.mxu1 %vm3564_vm8, %v3547_v13  ;;  %5185 = vmatprep.subr.bf16.mxu0 %v5334_v63 }
 0x4a8   :  { %v3504_v59 = vadd.f32 %v6929_v19, %v3484_v12  ;;  %v3549_v43 = vsel %vm2833_vm6, %v3546_v15, %v3548_v9 }
 0x4a9   :  { %v3461_v27 = vpop.f32.mrf.mxu1  ;;  %5145 = vmatprep.mubr.msk.bf16.mxu0 %vm3564_vm8, %v3549_v43 }
 0x4aa   :  { %v3517_v34 = vmax.f32 %v3504_v59, 0.0  ;;  %v3485_v28 = vadd.f32 %v3461_v27, %v3300_v35 }
 0x4ab   :  { %v5131_v47 = vpop.f32.mrf.mxu1 }
 0x4ac   :  { %v3525_v46 = vpack.c.bf16 %v3517_v34, %v3516_v60  ;;  %v3505_v20 = vadd.f32 %v6929_v19, %v3485_v28 }
 0x4ad   :  { %v3464_v61 = vpop.f32.mrf.mxu1 }
 0x4ae   :  { %v3550_v44 = vrot.slane %v3525_v46, 4  ;;  %v3486_v1 = vadd.f32 %v3464_v61, %v3303_v37  ;;  %5178 = vmatmul.mubr.msk.bf16.vlgmr.msra.gmra.mxu1 %vm3564_vm8, %v3549_v43  ;;  %v3518_v53 = vmax.f32 %v3505_v20, 0.0 }
 0x4af   :  { %v5132_v58 = vpop.f32.mrf.mxu1  ;;  %5198 = vmatpush3.bf16.msra.mxu1 %v5335_v45  ;;  %v5338_v45 = vld [vmem:[%s7065_s11 + $0x18] sm:$0xff]  }
 0x4b0   :  { %v3506_v5 = vadd.f32 %v6929_v19, %v3486_v1  ;;  %v3551_v62 = vsel %vm2833_vm6, %v3548_v9, %v3550_v44  ;;  %5199 = vmatprep.subr.bf16.mxu1 %v5336_v23 }
 0x4b1   :  { %v3469_v25 = vpop.f32.mrf.mxu1  ;;  %5146 = vmatmul.mubr.msk.bf16.gmra.mxu0 %vm3564_vm8, %v3551_v62  ;;  %5181 = vmatprep.mubr.msk.bf16.mxu1 %vm3564_vm8, %v3551_v62 }
 0x4b2   :  { %v3519_v52 = vmax.f32 %v3506_v5, 0.0  ;;  %5165 = vmatprep.mubr.msk.bf16.mxu0 %vm3564_vm8, %v6941_v31  ;;  %v3487_v17 = vadd.f32 %v3469_v25, %v6924_v10 }
 0x4b3   :  { %5200 = vmatpush3.bf16.msra.mxu1 %v5336_v23  ;;  %v5135_v8 = vpop.f32.mrf.mxu1 }
 0x4b4   :  { %v3526_v51 = vpack.c.bf16 %v3519_v52, %v3518_v53  ;;  %v3507_v21 = vadd.f32 %v6929_v19, %v3487_v17 }
 0x4b5   :  { %v3472_v26 = vpop.f32.mrf.mxu1 }
 0x4b6   :  { %v3830_v14 = vrot.slane %v3526_v51, 4  ;;  %v3520_v10 = vmax.f32 %v3507_v21, 0.0 }
 0x4b7   :  { %v5136_v48 = vpop.f32.mrf.mxu1 }
 0x4b8   :  { %v3831_v18 = vsel %vm2833_vm6, %v3550_v44, %v3830_v14  ;;  %v3527_v31 = vpack.c.bf16 %v3520_v10, %v3520_v10 }
 0x4b9   :  { %5166 = vmatmul.mubr.msk.bf16.vlgmr.msra.gmra.mxu0 %vm3564_vm8, %v6961_v11  ;;  %5182 = vmatmul.mubr.msk.bf16.gmra.mxu1 %vm3564_vm8, %v3831_v18 }
 0x4ba   :  { %5169 = vmatprep.mubr.msk.bf16.mxu0 %vm3564_vm8, %v6981_v24  ;;  %5186 = vmatpush3.bf16.msra.mxu0 %v5334_v63  ;;  %v4019_v19 = vrot.slane %v3527_v31, 4 }
 0x4bb   :  { %5201 = vmatprep.mubr.msk.bf16.mxu1 %vm3564_vm8, %v3549_v43  ;;  %5187 = vmatprep.subr.bf16.mxu0 %v5337_v32 }
 0x4bc   :  { %v4020_v41 = vsel %vm2833_vm6, %v3830_v14, %v4019_v19 }
 0x4be   :  { %5188 = vmatpush3.bf16.msra.mxu0 %v5337_v32 }
 0x4bf   :  { %5209 = vmatprep.subr.bf16.mxu0 %v5338_v45 }
 0x4c1   :  { %5170 = vmatmul.mubr.msk.bf16.gmra.mxu0 %vm3564_vm8, %v3525_v46  ;;  %5202 = vmatmul.mubr.msk.bf16.vlgmr.msra.gmra.mxu1 %vm3564_vm8, %v3551_v62 }
 0x4c2   :  { %5189 = vmatprep.mubr.msk.bf16.mxu0 %vm3564_vm8, %v6961_v11  ;;  %5205 = vmatprep.mubr.msk.bf16.mxu1 %vm3564_vm8, %v3831_v18 }
 0x4c9   :  { %5190 = vmatmul.mubr.msk.bf16.vlgmr.msra.gmra.mxu0 %vm3564_vm8, %v6981_v24  ;;  %5206 = vmatmul.mubr.msk.bf16.gmra.mxu1 %vm3564_vm8, %v4020_v41 }
 0x4ca   :  { %5193 = vmatprep.mubr.msk.bf16.mxu0 %vm3564_vm8, %v3525_v46  ;;  %5210 = vmatpush3.bf16.msra.mxu0 %v5338_v45 }
 0x4cb   :  { %5211 = vmatprep.subr.bf16.mxu0 %v5339_v50 }
 0x4ce   :  { %5212 = vmatpush3.bf16.msra.mxu0 %v5339_v50 }
 0x4cf   :  { %5213 = vmatprep.subr.bf16.mxu0 %v5340_v49 }
 0x4d1   :  { %5194 = vmatmul.mubr.msk.bf16.gmra.mxu0 %vm3564_vm8, %v3526_v51 }
 0x4d2   :  { %5214 = vmatpush3.bf16.msra.mxu0 %v5340_v49 }
 0x4d3   :  { %5215 = vmatprep.subr.bf16.mxu0 %v5341_v0 }
 0x4d6   :  { %5216 = vmatpush3.bf16.msra.mxu0 %v5341_v0 }
 0x556   :  { %v5155_v22 = vpop.f32.mrf.mxu1 }
 0x558   :  { %v3700_v55 = vpop.f32.mrf.mxu1 }
 0x55a   :  { %v5156_v40 = vpop.f32.mrf.mxu1 }
 0x55c   :  { %v3703_v36 = vpop.f32.mrf.mxu1 }
 0x561   :  { %v5143_v11 = vpop.f32.mrf.mxu0 }
 0x562   :  { %v3709_v60 = vadd.f32 %v5155_v22, %v5143_v11  ;;  %v4573_v22 = vld [vmem:[%s7064_s10] ss:$0 sm:$0xff] }
 0x563   :  { %v3611_v54 = vpop.f32.mrf.mxu0 }
 0x564   :  { %v3701_v47 = vadd.f32 %v3700_v55, %v3611_v54 }
 0x565   :  { %v5144_v2 = vpop.f32.mrf.mxu0 }
 0x566   :  { %v5159_v15 = vpop.f32.mrf.mxu1  ;;  %v3712_v61 = vadd.f32 %v5156_v40, %v5144_v2 }
 0x567   :  { %v3614_v13 = vpop.f32.mrf.mxu0 }
 0x568   :  { %v3716_v3 = vpop.f32.mrf.mxu1  ;;  %v3704_v1 = vadd.f32 %v3703_v36, %v3614_v13 }
 0x56a   :  { %v5160_v6 = vpop.f32.mrf.mxu1 }
 0x56c   :  { %v3719_v30 = vpop.f32.mrf.mxu1 }
 0x56e   :  { %v5179_v4 = vpop.f32.mrf.mxu1 }
 0x570   :  { %v3881_v39 = vpop.f32.mrf.mxu1 }
 0x571   :  { %v5147_v57 = vpop.f32.mrf.mxu0 }
 0x572   :  { %v5180_v42 = vpop.f32.mrf.mxu1  ;;  %v3725_v8 = vadd.f32 %v5159_v15, %v5147_v57 }
 0x573   :  { %v3627_v29 = vpop.f32.mrf.mxu0 }
 0x574   :  { %v3884_v63 = vpop.f32.mrf.mxu1  ;;  %v3717_v51 = vadd.f32 %v3716_v3, %v3627_v29 }
 0x575   :  { %v5148_v56 = vpop.f32.mrf.mxu0 }
 0x576   :  { %v3728_v45 = vadd.f32 %v5160_v6, %v5148_v56 }
 0x577   :  { %v3630_v33 = vpop.f32.mrf.mxu0 }
 0x578   :  { %v3720_v0 = vadd.f32 %v3719_v30, %v3630_v33 }
 0x579   :  { %v5167_v24 = vpop.f32.mrf.mxu0  ;;  %v5183_v7 = vpop.f32.mrf.mxu1 }
 0x57a   :  { %v3818_v37 = vadd.f32 %v5167_v24, %v3709_v60 }
 0x57b   :  { %v3785_v38 = vpop.f32.mrf.mxu0  ;;  %v3897_v12 = vpop.f32.mrf.mxu1 }
 0x57c   :  { %v3816_v44 = vadd.f32 %v3785_v38, %v3701_v47  ;;  %v3914_v62 = vadd.f32 %v5179_v4, %v3818_v37 }
 0x57d   :  { %v5168_v9 = vpop.f32.mrf.mxu0  ;;  %v5184_v16 = vpop.f32.mrf.mxu1 }
 0x57e   :  { %v3819_v58 = vadd.f32 %v5168_v9, %v3712_v61  ;;  %v3912_v52 = vadd.f32 %v3881_v39, %v3816_v44 }
 0x57f   :  { %v3788_v35 = vpop.f32.mrf.mxu0  ;;  %v3900_v59 = vpop.f32.mrf.mxu1 }
 0x580   :  { %v3817_v53 = vadd.f32 %v3788_v35, %v3704_v1  ;;  %v3915_v32 = vadd.f32 %v5180_v42, %v3819_v58 }
 0x581   :  { %v5171_v43 = vpop.f32.mrf.mxu0  ;;  %v5203_v27 = vpop.f32.mrf.mxu1 }
 0x582   :  { %v3822_v48 = vadd.f32 %v5171_v43, %v3725_v8  ;;  %v3913_v41 = vadd.f32 %v3884_v63, %v3817_v53 }
 0x583   :  { %v3801_v34 = vpop.f32.mrf.mxu0  ;;  %v4070_v28 = vpop.f32.mrf.mxu1 }
 0x584   :  { %v3820_v21 = vadd.f32 %v3801_v34, %v3717_v51  ;;  %v3918_v15 = vadd.f32 %v5183_v7, %v3822_v48 }
 0x585   :  { %v5172_v46 = vpop.f32.mrf.mxu0  ;;  %v5204_v23 = vpop.f32.mrf.mxu1 }
 0x586   :  { %v3823_v11 = vadd.f32 %v5172_v46, %v3728_v45  ;;  %v3916_v3 = vadd.f32 %v3897_v12, %v3820_v21 }
 0x587   :  { %v3804_v20 = vpop.f32.mrf.mxu0  ;;  %v4073_v5 = vpop.f32.mrf.mxu1 }
 0x588   :  { %v3821_v2 = vadd.f32 %v3804_v20, %v3720_v0  ;;  %v3919_v33 = vadd.f32 %v5184_v16, %v3823_v11 }
 0x589   :  { %v5191_v25 = vpop.f32.mrf.mxu0  ;;  %v5207_v18 = vpop.f32.mrf.mxu1 }
 0x58a   :  { %v4007_v17 = vadd.f32 %v5191_v25, %v3914_v62  ;;  %v3917_v43 = vadd.f32 %v3900_v59, %v3821_v2 }
 0x58b   :  { %v3974_v26 = vpop.f32.mrf.mxu0  ;;  %v4086_v36 = vpop.f32.mrf.mxu1 }
 0x58c   :  { %v4005_v14 = vadd.f32 %v3974_v26, %v3912_v52  ;;  %v4103_v50 = vadd.f32 %v5203_v27, %v4007_v17  ;;  %v4574_v52 = vld [vmem:[%s7066_s12] ss:$0 sm:$0xff] }
 0x58d   :  { %v5192_v10 = vpop.f32.mrf.mxu0  ;;  %v5208_v63 = vpop.f32.mrf.mxu1 }
 0x58e   :  { %v4101_v31 = vadd.f32 %v4070_v28, %v4005_v14  ;;  %v4008_v19 = vadd.f32 %v5192_v10, %v3915_v32  ;;  %v4118_v57 = vadd.f32 %v4573_v22, %v4103_v50 }
 0x58f   :  { %v3977_v49 = vpop.f32.mrf.mxu0  ;;  %v4089_v37 = vpop.f32.mrf.mxu1 }
 0x590   :  { %v4104_v55 = vadd.f32 %v5204_v23, %v4008_v19  ;;  %v4006_v40 = vadd.f32 %v3977_v49, %v3913_v41  ;;  %v4116_v4 = vadd.f32 %v4573_v22, %v4101_v31  ;;  %v4126_v7 = vmax.f32 %v4118_v57, 0.0 }
 0x591   :  { %v5195_v54 = vpop.f32.mrf.mxu0 }
 0x592   :  { %v4119_v13 = vadd.f32 %v4573_v22, %v4104_v55  ;;  %v4102_v39 = vadd.f32 %v4073_v5, %v4006_v40  ;;  %v4011_v6 = vadd.f32 %v5195_v54, %v3918_v15  ;;  %v4124_v38 = vmax.f32 %v4116_v4, 0.0 }
 0x593   :  { %v3990_v42 = vpop.f32.mrf.mxu0 }
 0x594   :  { %v4117_v29 = vadd.f32 %v4573_v22, %v4102_v39  ;;  %v4009_v30 = vadd.f32 %v3990_v42, %v3916_v3  ;;  %v4127_v56 = vmax.f32 %v4119_v13, 0.0  ;;  %v4107_v27 = vadd.f32 %v5207_v18, %v4011_v6 }
 0x595   :  { %v5196_v24 = vpop.f32.mrf.mxu0 }
 0x596   :  { %v4125_v9 = vmax.f32 %v4117_v29, 0.0  ;;  %v4105_v35 = vadd.f32 %v4086_v36, %v4009_v30  ;;  %v4012_v12 = vadd.f32 %v5196_v24, %v3919_v33  ;;  %v4133_v47 = vpack.c.bf16 %v4127_v56, %v4126_v7 }
 0x597   :  { %v3993_v60 = vpop.f32.mrf.mxu0  ;;  %v4122_v44 = vadd.f32 %v4573_v22, %v4107_v27 }
 0x598   :  { %v4132_v34 = vpack.c.bf16 %v4125_v9, %v4124_v38  ;;  %v4010_v28 = vadd.f32 %v3993_v60, %v3917_v43  ;;  %v4108_v46 = vadd.f32 %v5208_v63, %v4012_v12  ;;  %v4120_v23 = vadd.f32 %v4573_v22, %v4105_v35 }
 0x599   :  { %v4130_v5 = vmax.f32 %v4122_v44, 0.0 }
 0x59a   :  { %v4106_v61 = vadd.f32 %v4089_v37, %v4010_v28  ;;  %5217 = vmatprep.mubr.msk.bf16.mxu0 %vm100_vm5, %v4132_v34  ;;  %v4123_v16 = vadd.f32 %v4573_v22, %v4108_v46  ;;  %v4128_v59 = vmax.f32 %v4120_v23, 0.0 }
 0x59b   :  { %5218 = vmatmul.mubr.msk.bf16.vlgmr.msra.gmra.mxu0 %vm100_vm5, %v4133_v47 }
 0x59c   :  { %v4121_v20 = vadd.f32 %v4573_v22, %v4106_v61  ;;  %v4131_v1 = vmax.f32 %v4123_v16, 0.0 }
 0x59e   :  { %v4129_v58 = vmax.f32 %v4121_v20, 0.0  ;;  %v4135_v25 = vpack.c.bf16 %v4131_v1, %v4130_v5 }
 0x5a0   :  { %v4134_v62 = vpack.c.bf16 %v4129_v58, %v4128_v59 }
 0x5a2   :  { %5221 = vmatprep.mubr.msk.bf16.mxu0 %vm100_vm5, %v4134_v62 }
 0x5a3   :  { %5222 = vmatmul.mubr.msk.bf16.gmra.mxu0 %vm100_vm5, %v4135_v25 }
 0x65b   :  { %v5219_v53 = vpop.f32.mrf.mxu0 }
 0x65d   :  { %v4221_v8 = vpop.f32.mrf.mxu0 }
 0x65e   :  { %v4222_v51 = vadd.f32 %v4574_v52, %v4221_v8 }
 0x65f   :  { %v5220_v17 = vpop.f32.mrf.mxu0 }
 0x660   :  { %4247 = vst.msk [vmem:[#allocation5] sm:$0x1] %vm4246_vm9, %v4222_v51 }
 0x661   :  { %v4224_v26 = vpop.f32.mrf.mxu0 }
 0x663   :  { %v5223_v14 = vpop.f32.mrf.mxu0 }
 0x665   :  { %v4234_v32 = vpop.f32.mrf.mxu0 }
 0x667   :  { %v5224_v48 = vpop.f32.mrf.mxu0 }
 0x668   :  { %v4243_v21 = vadd.f32 %v5224_v48, %v4574_v52 }
 0x669   :  { %v4236_v18 = vpop.f32.mrf.mxu0 }
 0x66a   :  { %4248 = vst.msk [vmem:[#allocation5 + $0x1] sm:$0x1] %vm4246_vm9, %v4243_v21 }
 0x66b   :  { %5354 = shalt.err (!%p5351_p4)
}
 0x66c   :  { %4258 = dma.vmem_to_hbm [thread:$0]  %s4256_s19, 32, %s7070_s16, [#allocation6]  }
 0x66d   :  { %5363 = dma.done.wait [#allocation6], 32  }
 0x66e   :  { %5364 = vsyncadd [#allocation6], 4294967264 }
 0x66f   :  { %4262 = vsyncpa [#allocation6], 1 }

</bundles_post_ra>
